<compile_context>
chip_gen: v6e
topology: v6e:2x2x1
jax: 0.10.0
libtpu: 0.0.40
codegen_flags: <defaults>
</compile_context>

<pallas_src>
import functools

import jax
import jax.numpy as jnp
from jax import lax
from jax.experimental import pallas as pl
from jax.experimental.pallas import tpu as pltpu

EPS = 1e-5
IN_FEATURES = 800          # 50 * 4 * 4
HIDDEN = 100
NUM_CLASSES = 10
PAD = 128                  # lane width
VMEM_CAP_BYTES = 40 << 20  # leave headroom on v7x's 64 MiB physical VMEM


def _bn_relu(h, gamma, beta):
    """Training-mode BatchNorm1d (biased var, eps=1e-5) fused into one
    scale/shift, followed by ReLU.  h is f32 (B, C); gamma/beta are (1, C).
    Centered variance (numerically robust); rsqrt goes to the EUP."""
    mean = jnp.mean(h, axis=0, keepdims=True)
    centered = h - mean
    var = jnp.mean(centered * centered, axis=0, keepdims=True)
    scale = gamma * lax.rsqrt(var + EPS)
    return jnp.maximum(centered * scale + beta, 0.0)


def class_classifier_kernel(
    x_ref,                      # (B, 800)  f32
    w1_ref, g1_ref, be1_ref,    # (800,128) bf16, (1,128) f32, (1,128) f32
    w2_ref, g2_ref, be2_ref,    # (128,128) bf16, (1,128) f32, (1,128) f32
    w3_ref, b3_ref,             # (128,128) bf16, (1,128) f32
    o_ref,                      # (B, 128)  f32 log-softmax slab (padded cols = 0)
):
    # ---- Linear(800 -> 100, bias folded into BN) + BN + ReLU ----
    # In-kernel bf16 cast of x (VPU) hides under the MXU / x DMA.
    x = x_ref[...].astype(jnp.bfloat16)
    h = jnp.dot(x, w1_ref[...], preferred_element_type=jnp.float32)
    h = _bn_relu(h, g1_ref[...], be1_ref[...])
    # Dropout(p=0) is the identity — nothing to do.

    # ---- Linear(100 -> 100, bias folded into BN) + BN + ReLU ----
    h = jnp.dot(h.astype(jnp.bfloat16), w2_ref[...],
                preferred_element_type=jnp.float32)
    h = _bn_relu(h, g2_ref[...], be2_ref[...])

    # ---- Linear(100 -> 10) + masked LogSoftmax over the 128-wide slab ----
    z = jnp.dot(h.astype(jnp.bfloat16), w3_ref[...],
                preferred_element_type=jnp.float32) + b3_ref[...]
    col = lax.broadcasted_iota(jnp.int32, z.shape, 1)
    valid = col < NUM_CLASSES
    z = jnp.where(valid, z, -jnp.inf)                 # mask padded logits
    m = jnp.max(z, axis=1, keepdims=True)
    e = jnp.exp(z - m)                                # padded cols -> exp(-inf)=0
    lse = jnp.log(jnp.sum(e, axis=1, keepdims=True))
    logp = z - m - lse
    # Zero the padded columns so the stored slab carries no -inf.
    o_ref[...] = jnp.where(valid, logp, 0.0)          # lane-dense (B,128) store


def prepare_params(params):
    """One-time weight prep (outside the per-call path): pad feature dims to
    128 lanes and cast matmul operands to bf16; keep BN/softmax params f32.
    Linear weights are stored transposed as (in, out)."""
    w1, _b1, g1, be1, w2, _b2, g2, be2, w3, b3 = params

    def pad_cols(a):   # pad last dim to 128 lanes
        return jnp.pad(a, ((0, 0), (0, PAD - a.shape[1])))

    def pad_both(a):   # pad both dims to 128
        return jnp.pad(a, ((0, PAD - a.shape[0]), (0, PAD - a.shape[1])))

    return (
        pad_cols(w1).astype(jnp.bfloat16),      # (800, 128)
        pad_cols(g1), pad_cols(be1),            # (1, 128) f32
        pad_both(w2).astype(jnp.bfloat16),      # (128, 128)
        pad_cols(g2), pad_cols(be2),            # (1, 128) f32
        pad_both(w3).astype(jnp.bfloat16),      # (128, 128)
        pad_cols(b3),                           # (1, 128) f32
    )


@jax.jit
def class_classifier_forward(x, prepped):
    """x: (B, 800) f32.  prepped: output of prepare_params (padded bf16
    weights + f32 BN params).  Returns (B, 10) f32 log-probabilities."""
    B = x.shape[0]
    inputs = (x,) + tuple(prepped)

    vmem = pl.BlockSpec(memory_space=pltpu.MemorySpace.VMEM)
    data_bytes = sum(int(a.size) * a.dtype.itemsize for a in inputs)
    data_bytes += B * PAD * 4                   # output slab
    vmem_limit = int(min(2 * data_bytes + (8 << 20), VMEM_CAP_BYTES))

    out_pad = pl.pallas_call(
        class_classifier_kernel,
        out_shape=jax.ShapeDtypeStruct((B, PAD), jnp.float32),
        in_specs=[vmem] * len(inputs),
        out_specs=vmem,
        compiler_params=pltpu.CompilerParams(vmem_limit_bytes=vmem_limit),
    )(*inputs)
    # Slice fused under the same jit as the pallas_call (single dispatch).
    return out_pad[:, :NUM_CLASSES]


def init_params(key):
    """Deterministic synthetic parameters matching the module's shapes.
    Linear weights stored as (in, out); PyTorch stores (out, in)."""
    ks = jax.random.split(key, 10)
    w1 = jax.random.normal(ks[0], (IN_FEATURES, HIDDEN), jnp.float32) * 0.05
    b1 = jax.random.normal(ks[1], (1, HIDDEN), jnp.float32) * 0.05
    g1 = 1.0 + 0.1 * jax.random.normal(ks[2], (1, HIDDEN), jnp.float32)
    be1 = 0.1 * jax.random.normal(ks[3], (1, HIDDEN), jnp.float32)

    w2 = jax.random.normal(ks[4], (HIDDEN, HIDDEN), jnp.float32) * 0.05
    b2 = jax.random.normal(ks[5], (1, HIDDEN), jnp.float32) * 0.05
    g2 = 1.0 + 0.1 * jax.random.normal(ks[6], (1, HIDDEN), jnp.float32)
    be2 = 0.1 * jax.random.normal(ks[7], (1, HIDDEN), jnp.float32)

    w3 = jax.random.normal(ks[8], (HIDDEN, NUM_CLASSES), jnp.float32) * 0.05
    b3 = jax.random.normal(ks[9], (1, NUM_CLASSES), jnp.float32) * 0.05
    return (w1, b1, g1, be1, w2, b2, g2, be2, w3, b3)


def reference_forward_f32(x, params):
    """PyTorch-faithful f32 reference (biases included, plain BN formula)."""
    w1, b1, g1, be1, w2, b2, g2, be2, w3, b3 = params

    def bn(h, g, b):
        m = jnp.mean(h, axis=0, keepdims=True)
        v = jnp.mean((h - m) ** 2, axis=0, keepdims=True)
        return (h - m) * lax.rsqrt(v + EPS) * g + b

    h = jnp.maximum(bn(x @ w1 + b1, g1, be1), 0.0)
    h = jnp.maximum(bn(h @ w2 + b2, g2, be2), 0.0)
    z = h @ w3 + b3
    return jax.nn.log_softmax(z, axis=1)


def reference_forward_bf16(x, params):
    """Pure-JAX reference mirroring the kernel's arithmetic (bf16 matmul
    operands, f32 accumulation, biases folded away, fused BN affine)."""
    w1, _b1, g1, be1, w2, _b2, g2, be2, w3, b3 = params
    bf = jnp.bfloat16
    h = jnp.dot(x.astype(bf), w1.astype(bf), preferred_element_type=jnp.float32)
    h = _bn_relu(h, g1, be1)
    h = jnp.dot(h.astype(bf), w2.astype(bf), preferred_element_type=jnp.float32)
    h = _bn_relu(h, g2, be2)
    z = jnp.dot(h.astype(bf), w3.astype(bf), preferred_element_type=jnp.float32) + b3
    return jax.nn.log_softmax(z, axis=1)


if __name__ == "__main__":
    key = jax.random.PRNGKey(0)
    kx, kp = jax.random.split(key)

    # Batch >= 128 to amortize launch / weight-DMA overhead; input is the
    # flattened 50*4*4 = 800 feature vector per example.
    B = 256
    x = jax.random.normal(kx, (B, IN_FEATURES), jnp.float32)
    params = init_params(kp)

    # One-time weight prep (padding + bf16 casts) — NOT on the per-call path.
    prepped = jax.block_until_ready(prepare_params(params))

    out = class_classifier_forward(x, prepped)
    out = jax.block_until_ready(out)
    assert out.shape == (B, NUM_CLASSES)

    # Tight check vs. a pure-JAX replica of the kernel arithmetic.
    ref_match = reference_forward_bf16(x, params)
    assert jnp.allclose(out, ref_match, atol=1e-2, rtol=1e-2), \
        "mismatch vs bf16-matching reference"

    # Loose check vs. the PyTorch-faithful f32 reference (bf16 matmul error).
    ref_f32 = reference_forward_f32(x, params)
    assert jnp.allclose(out, ref_f32, atol=6e-2, rtol=6e-2), \
        "mismatch vs f32 reference"

    # log-softmax rows should sum to ~1 in probability space.
    assert jnp.allclose(jnp.exp(out).sum(axis=1), 1.0, atol=1e-3)

    print("KERNEL_OK")
</pallas_src>

<mosaic_0001>
module attributes {stable_mosaic.version = 11 : i64} {
  func.func @class_classifier_kernel(%arg0: memref<256x800xf32, #tpu.memory_space<vmem>>, %arg1: memref<800x128xbf16, #tpu.memory_space<vmem>>, %arg2: memref<1x128xf32, #tpu.memory_space<vmem>>, %arg3: memref<1x128xf32, #tpu.memory_space<vmem>>, %arg4: memref<128x128xbf16, #tpu.memory_space<vmem>>, %arg5: memref<1x128xf32, #tpu.memory_space<vmem>>, %arg6: memref<1x128xf32, #tpu.memory_space<vmem>>, %arg7: memref<128x128xbf16, #tpu.memory_space<vmem>>, %arg8: memref<1x128xf32, #tpu.memory_space<vmem>>, %arg9: memref<256x128xf32, #tpu.memory_space<vmem>>) attributes {dimension_semantics = [], scalar_prefetch = 0 : i64, scratch_operands = 0 : i64, tpu.core_type = #tpu.core_type<tc>} {
    %c0 = arith.constant 0 : index
    %c0_0 = arith.constant 0 : index
    %0 = vector.load %arg0[%c0, %c0_0] : memref<256x800xf32, #tpu.memory_space<vmem>>, vector<256x800xf32>
    %1 = arith.truncf %0 : vector<256x800xf32> to vector<256x800xbf16>
    %c0_1 = arith.constant 0 : index
    %c0_2 = arith.constant 0 : index
    %2 = vector.load %arg1[%c0_1, %c0_2] : memref<800x128xbf16, #tpu.memory_space<vmem>>, vector<800x128xbf16>
    %cst = arith.constant dense<0.000000e+00> : vector<256x128xf32>
    %3 = tpu.matmul %1, %2, %cst {dimension_numbers = #tpu.dot_dimension_numbers<[1], [0], [0], [1], [0, 0, 1, 1], [], []>} : vector<256x800xbf16>, vector<800x128xbf16>, vector<256x128xf32> -> vector<256x128xf32>
    %c0_3 = arith.constant 0 : index
    %c0_4 = arith.constant 0 : index
    %4 = vector.load %arg2[%c0_3, %c0_4] : memref<1x128xf32, #tpu.memory_space<vmem>>, vector<1x128xf32>
    %c0_5 = arith.constant 0 : index
    %c0_6 = arith.constant 0 : index
    %5 = vector.load %arg3[%c0_5, %c0_6] : memref<1x128xf32, #tpu.memory_space<vmem>>, vector<1x128xf32>
    %cst_7 = arith.constant dense<0.000000e+00> : vector<128xf32>
    %6 = vector.multi_reduction <add>, %3, %cst_7 [0] : vector<256x128xf32> to vector<128xf32>
    %7 = vector.shape_cast %6 : vector<128xf32> to vector<1x128xf32>
    %cst_8 = arith.constant 2.560000e+02 : f32
    %8 = vector.broadcast %cst_8 : f32 to vector<1x128xf32>
    %9 = arith.divf %7, %8 : vector<1x128xf32>
    %10 = vector.broadcast %9 : vector<1x128xf32> to vector<256x128xf32>
    %11 = arith.subf %3, %10 : vector<256x128xf32>
    %12 = arith.mulf %11, %11 : vector<256x128xf32>
    %cst_9 = arith.constant dense<0.000000e+00> : vector<128xf32>
    %13 = vector.multi_reduction <add>, %12, %cst_9 [0] : vector<256x128xf32> to vector<128xf32>
    %14 = vector.shape_cast %13 : vector<128xf32> to vector<1x128xf32>
    %cst_10 = arith.constant 2.560000e+02 : f32
    %15 = vector.broadcast %cst_10 : f32 to vector<1x128xf32>
    %16 = arith.divf %14, %15 : vector<1x128xf32>
    %cst_11 = arith.constant 9.99999974E-6 : f32
    %17 = vector.broadcast %cst_11 : f32 to vector<1x128xf32>
    %18 = arith.addf %16, %17 : vector<1x128xf32>
    %19 = math.rsqrt %18 : vector<1x128xf32>
    %20 = arith.mulf %4, %19 : vector<1x128xf32>
    %21 = vector.broadcast %20 : vector<1x128xf32> to vector<256x128xf32>
    %22 = arith.mulf %11, %21 : vector<256x128xf32>
    %23 = vector.broadcast %5 : vector<1x128xf32> to vector<256x128xf32>
    %24 = arith.addf %22, %23 : vector<256x128xf32>
    %cst_12 = arith.constant 0.000000e+00 : f32
    %25 = vector.broadcast %cst_12 : f32 to vector<256x128xf32>
    %26 = arith.maximumf %24, %25 : vector<256x128xf32>
    %27 = arith.truncf %26 : vector<256x128xf32> to vector<256x128xbf16>
    %c0_13 = arith.constant 0 : index
    %c0_14 = arith.constant 0 : index
    %28 = vector.load %arg4[%c0_13, %c0_14] : memref<128x128xbf16, #tpu.memory_space<vmem>>, vector<128x128xbf16>
    %cst_15 = arith.constant dense<0.000000e+00> : vector<256x128xf32>
    %29 = tpu.matmul %27, %28, %cst_15 {dimension_numbers = #tpu.dot_dimension_numbers<[1], [0], [0], [1], [0, 0, 1, 1], [], []>} : vector<256x128xbf16>, vector<128x128xbf16>, vector<256x128xf32> -> vector<256x128xf32>
    %c0_16 = arith.constant 0 : index
    %c0_17 = arith.constant 0 : index
    %30 = vector.load %arg5[%c0_16, %c0_17] : memref<1x128xf32, #tpu.memory_space<vmem>>, vector<1x128xf32>
    %c0_18 = arith.constant 0 : index
    %c0_19 = arith.constant 0 : index
    %31 = vector.load %arg6[%c0_18, %c0_19] : memref<1x128xf32, #tpu.memory_space<vmem>>, vector<1x128xf32>
    %cst_20 = arith.constant dense<0.000000e+00> : vector<128xf32>
    %32 = vector.multi_reduction <add>, %29, %cst_20 [0] : vector<256x128xf32> to vector<128xf32>
    %33 = vector.shape_cast %32 : vector<128xf32> to vector<1x128xf32>
    %cst_21 = arith.constant 2.560000e+02 : f32
    %34 = vector.broadcast %cst_21 : f32 to vector<1x128xf32>
    %35 = arith.divf %33, %34 : vector<1x128xf32>
    %36 = vector.broadcast %35 : vector<1x128xf32> to vector<256x128xf32>
    %37 = arith.subf %29, %36 : vector<256x128xf32>
    %38 = arith.mulf %37, %37 : vector<256x128xf32>
    %cst_22 = arith.constant dense<0.000000e+00> : vector<128xf32>
    %39 = vector.multi_reduction <add>, %38, %cst_22 [0] : vector<256x128xf32> to vector<128xf32>
    %40 = vector.shape_cast %39 : vector<128xf32> to vector<1x128xf32>
    %cst_23 = arith.constant 2.560000e+02 : f32
    %41 = vector.broadcast %cst_23 : f32 to vector<1x128xf32>
    %42 = arith.divf %40, %41 : vector<1x128xf32>
    %cst_24 = arith.constant 9.99999974E-6 : f32
    %43 = vector.broadcast %cst_24 : f32 to vector<1x128xf32>
    %44 = arith.addf %42, %43 : vector<1x128xf32>
    %45 = math.rsqrt %44 : vector<1x128xf32>
    %46 = arith.mulf %30, %45 : vector<1x128xf32>
    %47 = vector.broadcast %46 : vector<1x128xf32> to vector<256x128xf32>
    %48 = arith.mulf %37, %47 : vector<256x128xf32>
    %49 = vector.broadcast %31 : vector<1x128xf32> to vector<256x128xf32>
    %50 = arith.addf %48, %49 : vector<256x128xf32>
    %cst_25 = arith.constant 0.000000e+00 : f32
    %51 = vector.broadcast %cst_25 : f32 to vector<256x128xf32>
    %52 = arith.maximumf %50, %51 : vector<256x128xf32>
    %53 = arith.truncf %52 : vector<256x128xf32> to vector<256x128xbf16>
    %c0_26 = arith.constant 0 : index
    %c0_27 = arith.constant 0 : index
    %54 = vector.load %arg7[%c0_26, %c0_27] : memref<128x128xbf16, #tpu.memory_space<vmem>>, vector<128x128xbf16>
    %cst_28 = arith.constant dense<0.000000e+00> : vector<256x128xf32>
    %55 = tpu.matmul %53, %54, %cst_28 {dimension_numbers = #tpu.dot_dimension_numbers<[1], [0], [0], [1], [0, 0, 1, 1], [], []>} : vector<256x128xbf16>, vector<128x128xbf16>, vector<256x128xf32> -> vector<256x128xf32>
    %c0_29 = arith.constant 0 : index
    %c0_30 = arith.constant 0 : index
    %56 = vector.load %arg8[%c0_29, %c0_30] : memref<1x128xf32, #tpu.memory_space<vmem>>, vector<1x128xf32>
    %57 = vector.broadcast %56 : vector<1x128xf32> to vector<256x128xf32>
    %58 = arith.addf %55, %57 : vector<256x128xf32>
    %59 = tpu.iota {dimensions = array<i32: 1>} : vector<256x128xi32>
    %c10_i32 = arith.constant 10 : i32
    %60 = vector.broadcast %c10_i32 : i32 to vector<256x128xi32>
    %61 = arith.cmpi slt, %59, %60 : vector<256x128xi32>
    %cst_31 = arith.constant 0xFF800000 : f32
    %62 = vector.broadcast %cst_31 : f32 to vector<256x128xf32>
    %63 = arith.select %61, %58, %62 : vector<256x128xi1>, vector<256x128xf32>
    %cst_32 = arith.constant dense<0xFF800000> : vector<256xf32>
    %64 = vector.multi_reduction <maximumf>, %63, %cst_32 [1] : vector<256x128xf32> to vector<256xf32>
    %65 = vector.shape_cast %64 : vector<256xf32> to vector<256x1xf32>
    %66 = vector.broadcast %65 : vector<256x1xf32> to vector<256x128xf32>
    %67 = arith.subf %63, %66 : vector<256x128xf32>
    %68 = math.exp %67 : vector<256x128xf32>
    %cst_33 = arith.constant dense<0.000000e+00> : vector<256xf32>
    %69 = vector.multi_reduction <add>, %68, %cst_33 [1] : vector<256x128xf32> to vector<256xf32>
    %70 = vector.shape_cast %69 : vector<256xf32> to vector<256x1xf32>
    %71 = math.log %70 : vector<256x1xf32>
    %72 = vector.broadcast %65 : vector<256x1xf32> to vector<256x128xf32>
    %73 = arith.subf %63, %72 : vector<256x128xf32>
    %74 = vector.broadcast %71 : vector<256x1xf32> to vector<256x128xf32>
    %75 = arith.subf %73, %74 : vector<256x128xf32>
    %cst_34 = arith.constant 0.000000e+00 : f32
    %76 = vector.broadcast %cst_34 : f32 to vector<256x128xf32>
    %77 = arith.select %61, %75, %76 : vector<256x128xi1>, vector<256x128xf32>
    %c0_35 = arith.constant 0 : index
    %c0_36 = arith.constant 0 : index
    %78 = vector.load %arg9[%c0_35, %c0_36] : memref<256x128xf32, #tpu.memory_space<vmem>>, vector<256x128xf32>
    tpu.vector_store %arg9[%c0_35, %c0_36], %77 {strides = array<i32>} : memref<256x128xf32, #tpu.memory_space<vmem>>, vector<256x128xf32>,
    return
  }
}

</mosaic_0001>

<bundles_post_ra>
// kernel: class_classifier_forward.1
= control target key start
LH: loop header
LB: loop body
LE: loop exit
PB: predicated region body
PF: predicated region fallthrough
CT: control target
= control target key end

     0   :  { %vm769_vm0 = vcmask 261120   ;;  %s6203_s1 = inlined_call_operand.vmem [shape: bf16[800,128], index: 1, kind: input, shape index: {}]   ;;  %s6204_s0 = inlined_call_operand.vmem [shape: f32[256,800], index: 0, kind: input, shape index: {}]   ;;  %s6205_s4 = inlined_call_operand.vmem [shape: bf16[128,128], index: 4, kind: input, shape index: {}]   ;;  %s6206_s2 = inlined_call_operand.vmem [shape: f32[1,128], index: 2, kind: input, shape index: {}]   ;;  %s6207_s3 = inlined_call_operand.vmem [shape: f32[1,128], index: 3, kind: input, shape index: {}]   ;;  %s6208_s7 = inlined_call_operand.vmem [shape: bf16[128,128], index: 7, kind: input, shape index: {}]   ;;  %s6209_s5 = inlined_call_operand.vmem [shape: f32[1,128], index: 5, kind: input, shape index: {}]   ;;  %s6210_s6 = inlined_call_operand.vmem [shape: f32[1,128], index: 6, kind: input, shape index: {}]   ;;  %s6211_s8 = inlined_call_operand.vmem [shape: f32[1,128], index: 8, kind: input, shape index: {}]   ;;  %s6212_s9 = inlined_call_operand.vmem [shape: f32[256,128], index: 9, kind: output, shape index: {}]  }
   0x1   :  { %v3516_v0 = vld [vmem:[%s6203_s1 + $0x78] sm:$0xff]   ;;  %v3518_v2 = vld [vmem:[%s6203_s1 + $0x70] sm:$0xff]   ;;  %v3520_v4 = vld [vmem:[%s6203_s1 + $0x68] sm:$0xff]  }
   0x2   :  { %v3517_v1 = vld [vmem:[%s6203_s1 + $0x38] sm:$0xff]   ;;  %2966 = vmatprep.subr.bf16.mxu0 %v3516_v0  ;;  %3500 = vmatprep.subr.bf16.mxu1 %v3516_v0  ;;  %v3519_v3 = vld [vmem:[%s6203_s1 + $0x30] sm:$0xff]   ;;  %v3521_v5 = vld [vmem:[%s6203_s1 + $0x28] sm:$0xff]  }
   0x3   :  { %2967 = vmatpush3.bf16.msra.mxu0 %v3517_v1  ;;  %3508 = vmatpush3.bf16.msra.mxu1 %v3517_v1  ;;  %v3522_v6 = vld [vmem:[%s6203_s1 + $0x60] sm:$0xff]   ;;  %v3524_v8 = vld [vmem:[%s6203_s1 + $0x58] sm:$0xff]   ;;  %v3526_v10 = vld [vmem:[%s6203_s1 + $0x50] sm:$0xff]  }
   0x4   :  { %2968 = vmatprep.subr.bf16.mxu0 %v3518_v2  ;;  %3501 = vmatprep.subr.bf16.mxu1 %v3518_v2  ;;  %v3523_v7 = vld [vmem:[%s6203_s1 + $0x20] sm:$0xff]   ;;  %v3525_v9 = vld [vmem:[%s6203_s1 + $0x18] sm:$0xff]   ;;  %v34_v11 = vld [vmem:[%s6204_s0 + $0x8] sm:$0xff] }
   0x5   :  { %v41_v12 = vld [vmem:[%s6204_s0 + $0x40] sm:$0xff]  ;;  %v202_v13 = vld [vmem:[%s6204_s0 + $0x548] sm:$0xff]  ;;  %v3527_v17 = vld [vmem:[%s6203_s1 + $0x10] sm:$0xff]  }
   0x6   :  { %v258_v14 = vpack.c.bf16 %v41_v12, %v34_v11  ;;  %v209_v15 = vld [vmem:[%s6204_s0 + $0x580] sm:$0xff]  ;;  %v3528_v18 = vld [vmem:[%s6203_s1 + $0x48] sm:$0xff]   ;;  %v40_v23 = vld [vmem:[%s6204_s0 + $0x38] sm:$0xff] }
   0x7   :  { %2969 = vmatpush3.bf16.msra.mxu0 %v3519_v3  ;;  %3509 = vmatpush3.bf16.msra.mxu1 %v3519_v3  ;;  %v342_v16 = vpack.c.bf16 %v209_v15, %v202_v13  ;;  %v3529_v19 = vld [vmem:[%s6203_s1 + $0x8] sm:$0xff]   ;;  %v3530_v20 = vld [vmem:[%s6203_s1 + $0x40] sm:$0xff]   ;;  %v208_v25 = vld [vmem:[%s6204_s0 + $0x578] sm:$0xff] }
   0x8   :  { %2970 = vmatprep.subr.bf16.mxu0 %v3520_v4  ;;  %3502 = vmatprep.subr.bf16.mxu1 %v3520_v4  ;;  %v3531_v21 = vld [vmem:[%s6203_s1] sm:$0xff]   ;;  %v3532_v26 = vld [vmem:[%s6203_s1 + $0xf8] sm:$0xff]   ;;  %v55_v29 = vld [vmem:[%s6204_s0 + $0xb0] sm:$0xff] }
   0x9   :  { %850 = vmatprep.mubr.bf16.mxu0 %v258_v14  ;;  %946 = vmatprep.mubr.bf16.mxu1 %v342_v16  ;;  %v33_v22 = vld [vmem:[%s6204_s0] sm:$0xff]  ;;  %v3533_v27 = vld [vmem:[%s6203_s1 + $0x178] sm:$0xff]   ;;  %v223_v34 = vld [vmem:[%s6204_s0 + $0x5f0] sm:$0xff] }
   0xa   :  { %v201_v24 = vld [vmem:[%s6204_s0 + $0x540] sm:$0xff]  ;;  %v48_v28 = vld [vmem:[%s6204_s0 + $0x78] sm:$0xff]  ;;  %v257_v32 = vpack.c.bf16 %v40_v23, %v33_v22  ;;  %v3536_v36 = vld [vmem:[%s6203_s1 + $0xf0] sm:$0xff]  }
   0xb   :  { %2971 = vmatpush3.bf16.msra.mxu0 %v3521_v5  ;;  %3510 = vmatpush3.bf16.msra.mxu1 %v3521_v5  ;;  %v3534_v30 = vld [vmem:[%s6203_s1 + $0xb8] sm:$0xff]   ;;  %v341_v33 = vpack.c.bf16 %v208_v25, %v201_v24  ;;  %v265_v37 = vpack.c.bf16 %v55_v29, %v48_v28  ;;  %v3537_v38 = vld [vmem:[%s6203_s1 + $0xb0] sm:$0xff]   ;;  %v54_v41 = vld [vmem:[%s6204_s0 + $0xa8] sm:$0xff] }
   0xc   :  { %2972 = vmatprep.subr.bf16.mxu0 %v3522_v6  ;;  %3503 = vmatprep.subr.bf16.mxu1 %v3522_v6  ;;  %v216_v31 = vld [vmem:[%s6204_s0 + $0x5b8] sm:$0xff]  ;;  %v47_v40 = vld [vmem:[%s6204_s0 + $0x70] sm:$0xff]  ;;  %v222_v44 = vld [vmem:[%s6204_s0 + $0x5e8] sm:$0xff] }
   0xd   :  { %v3535_v35 = vld [vmem:[%s6203_s1 + $0x138] sm:$0xff]   ;;  %v349_v39 = vpack.c.bf16 %v223_v34, %v216_v31  ;;  %v3541_v42 = vld [vmem:[%s6203_s1 + $0x170] sm:$0xff]   ;;  %v3538_v45 = vld [vmem:[%s6203_s1 + $0xe8] sm:$0xff]   ;;  %v264_v51 = vpack.c.bf16 %v54_v41, %v47_v40 }
   0xe   :  { %v215_v43 = vld [vmem:[%s6204_s0 + $0x5b0] sm:$0xff]  ;;  %v62_v47 = vld [vmem:[%s6204_s0 + $0xe8] sm:$0xff]  ;;  %v69_v48 = vld [vmem:[%s6204_s0 + $0x120] sm:$0xff] }
   0xf   :  { %2973 = vmatpush3.bf16.msra.mxu0 %v3523_v7  ;;  %3511 = vmatpush3.bf16.msra.mxu1 %v3523_v7  ;;  %v3543_v46 = vld [vmem:[%s6203_s1 + $0x130] sm:$0xff]   ;;  %v230_v49 = vld [vmem:[%s6204_s0 + $0x628] sm:$0xff]  ;;  %v237_v50 = vld [vmem:[%s6204_s0 + $0x660] sm:$0xff]  ;;  %v348_v52 = vpack.c.bf16 %v222_v44, %v215_v43  ;;  %v272_v54 = vpack.c.bf16 %v69_v48, %v62_v47 }
  0x10   :  { %2974 = vmatprep.subr.bf16.mxu0 %v3524_v8  ;;  %3504 = vmatprep.subr.bf16.mxu1 %v3524_v8  ;;  %v3539_v53 = vld [vmem:[%s6203_s1 + $0xa8] sm:$0xff]   ;;  %v3540_v55 = vld [vmem:[%s6203_s1 + $0xe0] sm:$0xff]   ;;  %v356_v56 = vpack.c.bf16 %v237_v50, %v230_v49  ;;  %v68_v59 = vld [vmem:[%s6204_s0 + $0x118] sm:$0xff] }
  0x11   :  { %v3542_v57 = vld [vmem:[%s6203_s1 + $0xa0] sm:$0xff]   ;;  %v236_v61 = vld [vmem:[%s6204_s0 + $0x658] sm:$0xff]  ;;  %v83_v0 = vld [vmem:[%s6204_s0 + $0x190] sm:$0xff] }
  0x12   :  { %v61_v58 = vld [vmem:[%s6204_s0 + $0xe0] sm:$0xff]  ;;  %v3544_v62 = vld [vmem:[%s6203_s1 + $0xd8] sm:$0xff]   ;;  %v3549_v2 = vld [vmem:[%s6203_s1 + $0x168] sm:$0xff]  }
  0x13   :  { %2975 = vmatpush3.bf16.msra.mxu0 %v3525_v9  ;;  %3512 = vmatpush3.bf16.msra.mxu1 %v3525_v9  ;;  %v229_v60 = vld [vmem:[%s6204_s0 + $0x620] sm:$0xff]  ;;  %v76_v63 = vld [vmem:[%s6204_s0 + $0x158] sm:$0xff]  ;;  %v251_v3 = vld [vmem:[%s6204_s0 + $0x6d0] sm:$0xff]  ;;  %v271_v4 = vpack.c.bf16 %v68_v59, %v61_v58 }
  0x14   :  { %2976 = vmatprep.subr.bf16.mxu0 %v3526_v10  ;;  %3505 = vmatprep.subr.bf16.mxu1 %v3526_v10  ;;  %v244_v1 = vld [vmem:[%s6204_s0 + $0x698] sm:$0xff]  ;;  %v355_v5 = vpack.c.bf16 %v236_v61, %v229_v60  ;;  %v3551_v6 = vld [vmem:[%s6203_s1 + $0x128] sm:$0xff]   ;;  %v279_v8 = vpack.c.bf16 %v83_v0, %v76_v63  ;;  %v3546_v9 = vld [vmem:[%s6203_s1 + $0xd0] sm:$0xff]  }
  0x15   :  { %v3545_v7 = vld [vmem:[%s6203_s1 + $0x98] sm:$0xff]   ;;  %v363_v10 = vpack.c.bf16 %v251_v3, %v244_v1  ;;  %v3547_v11 = vld [vmem:[%s6203_s1 + $0x90] sm:$0xff]   ;;  %v82_v13 = vld [vmem:[%s6204_s0 + $0x188] sm:$0xff] }
  0x16   :  { %v75_v12 = vld [vmem:[%s6204_s0 + $0x150] sm:$0xff]  ;;  %v250_v15 = vld [vmem:[%s6204_s0 + $0x6c8] sm:$0xff]  ;;  %v3556_v24 = vld [vmem:[%s6203_s1 + $0x120] sm:$0xff]  }
  0x17   :  { %2977 = vmatpush3.bf16.msra.mxu0 %v3527_v17  ;;  %3513 = vmatpush3.bf16.msra.mxu1 %v3527_v17  ;;  %v243_v14 = vld [vmem:[%s6204_s0 + $0x690] sm:$0xff]  ;;  %v3548_v16 = vld [vmem:[%s6203_s1 + $0xc8] sm:$0xff]   ;;  %v278_v22 = vpack.c.bf16 %v82_v13, %v75_v12  ;;  %v3553_v29 = vld [vmem:[%s6203_s1 + $0x80] sm:$0xff]  }
  0x18   :  { %2978 = vmatprep.subr.bf16.mxu0 %v3528_v18  ;;  %3506 = vmatprep.subr.bf16.mxu1 %v3528_v18  ;;  %v90_v17 = vld [vmem:[%s6204_s0 + $0x1c8] sm:$0xff]  ;;  %v97_v18 = vld [vmem:[%s6204_s0 + $0x200] sm:$0xff]  ;;  %v362_v23 = vpack.c.bf16 %v250_v15, %v243_v14  ;;  %v96_v31 = vld [vmem:[%s6204_s0 + $0x1f8] sm:$0xff] }
  0x19   :  { %v3550_v25 = vld [vmem:[%s6203_s1 + $0x88] sm:$0xff]   ;;  %v3558_v40 = vld [vmem:[%s6203_s1 + $0x118] sm:$0xff]   ;;  %v3560_v48 = vld [vmem:[%s6203_s1 + $0x110] sm:$0xff]  }
  0x1a   :  { %v3554_v34 = vld [vmem:[%s6203_s1 + $0x188] sm:$0xff]   ;;  %v49_v49 = vld [vmem:[%s6204_s0 + $0x80] sm:$0xff]  ;;  %v56_v50 = vld [vmem:[%s6204_s0 + $0xb8] sm:$0xff] }
  0x1b   :  { %2979 = vmatpush3.bf16.msra.mxu0 %v3529_v19  ;;  %3514 = vmatpush3.bf16.msra.mxu1 %v3529_v19  ;;  %v36_v19 = vld [vmem:[%s6204_s0 + $0x18] sm:$0xff]  ;;  %v110_v47 = vld [vmem:[%s6204_s0 + $0x268] sm:$0xff]  ;;  %v117_v60 = vld [vmem:[%s6204_s0 + $0x2a0] sm:$0xff] }
  0x1c   :  { %2980 = vmatprep.subr.bf16.mxu0 %v3530_v20  ;;  %3507 = vmatprep.subr.bf16.mxu1 %v3530_v20  ;;  %v43_v20 = vld [vmem:[%s6204_s0 + $0x50] sm:$0xff]  ;;  %v3561_v59 = vld [vmem:[%s6203_s1 + $0x148] sm:$0xff]   ;;  %v132_v1 = vld [vmem:[%s6204_s0 + $0x318] sm:$0xff] }
  0x1d   :  { %v260_v28 = vpack.c.bf16 %v43_v20, %v36_v19  ;;  %v3562_v61 = vld [vmem:[%s6203_s1 + $0x108] sm:$0xff]   ;;  %v63_v63 = vld [vmem:[%s6204_s0 + $0xf0] sm:$0xff]  ;;  %v77_v13 = vld [vmem:[%s6204_s0 + $0x160] sm:$0xff] }
  0x1e   :  { %v70_v0 = vld [vmem:[%s6204_s0 + $0x128] sm:$0xff]  ;;  %v84_v14 = vld [vmem:[%s6204_s0 + $0x198] sm:$0xff]  ;;  %v3565_v19 = vld [vmem:[%s6203_s1 + $0x180] sm:$0xff]  }
  0x1f   :  { %2981 = vmatpush3.bf16.msra.mxu0 %v3531_v21  ;;  %3515 = vmatpush3.bf16.msra.mxu1 %v3531_v21  ;;  %v3555_v21 = vld [vmem:[%s6203_s1 + $0x160] sm:$0xff]   ;;  %v78_v3 = vld [vmem:[%s6204_s0 + $0x168] sm:$0xff] }
  0x20   :  { %3078 = vmatprep.subr.bf16.mxu1 %v3532_v26  ;;  %3190 = vmatprep.subr.bf16.mxu0 %v3533_v27  ;;  %v286_v26 = vpack.c.bf16 %v97_v18, %v90_v17  ;;  %v3552_v27 = vld [vmem:[%s6203_s1 + $0xc0] sm:$0xff]   ;;  %v138_v12 = vld [vmem:[%s6204_s0 + $0x348] sm:$0xff]  ;;  %v92_v17 = vld [vmem:[%s6204_s0 + $0x1d8] sm:$0xff] }
  0x21   :  { %v146_v15 = vld [vmem:[%s6204_s0 + $0x388] sm:$0xff]  ;;  %v99_v18 = vld [vmem:[%s6204_s0 + $0x210] sm:$0xff] }
  0x22   :  { %851 = vmatmul.mubr.bf16.vlgmr.msra.gmra.mxu0 %v257_v32  ;;  %947 = vmatmul.mubr.bf16.vlgmr.msra.gmra.mxu1 %v341_v33  ;;  %v35_v32 = vld [vmem:[%s6204_s0 + $0x10] sm:$0xff]  ;;  %v42_v33 = vld [vmem:[%s6204_s0 + $0x48] sm:$0xff] }
  0x23   :  { %3079 = vmatpush3.bf16.msra.mxu1 %v3534_v30  ;;  %3191 = vmatpush3.bf16.msra.mxu0 %v3535_v35  ;;  %v89_v30 = vld [vmem:[%s6204_s0 + $0x1c0] sm:$0xff]  ;;  %v104_v35 = vld [vmem:[%s6204_s0 + $0x238] sm:$0xff] }
  0x24   :  { %3080 = vmatprep.subr.bf16.mxu1 %v3536_v36  ;;  %858 = vmatprep.mubr.bf16.mxu0 %v265_v37  ;;  %v111_v36 = vld [vmem:[%s6204_s0 + $0x270] sm:$0xff]  ;;  %v50_v37 = vld [vmem:[%s6204_s0 + $0x88] sm:$0xff]  ;;  %v285_v41 = vpack.c.bf16 %v96_v31, %v89_v30  ;;  %v113_v31 = vld [vmem:[%s6204_s0 + $0x280] sm:$0xff] }
  0x25   :  { %954 = vmatprep.mubr.bf16.mxu1 %v349_v39  ;;  %3192 = vmatprep.subr.bf16.mxu0 %v3541_v42  ;;  %v57_v39 = vld [vmem:[%s6204_s0 + $0xc0] sm:$0xff]  ;;  %v259_v42 = vpack.c.bf16 %v42_v33, %v35_v32  ;;  %v293_v43 = vpack.c.bf16 %v111_v36, %v104_v35  ;;  %v106_v30 = vld [vmem:[%s6204_s0 + $0x248] sm:$0xff]  ;;  %v159_v36 = vld [vmem:[%s6204_s0 + $0x3f0] sm:$0xff] }
  0x26   :  { %v267_v44 = vpack.c.bf16 %v57_v39, %v50_v37  ;;  %v295_v35 = vpack.c.bf16 %v113_v31, %v106_v30  ;;  %v166_v37 = vld [vmem:[%s6204_s0 + $0x428] sm:$0xff]  ;;  %v112_v39 = vld [vmem:[%s6204_s0 + $0x278] sm:$0xff] }
  0x27   :  { %3081 = vmatpush3.bf16.msra.mxu1 %v3537_v38  ;;  %3193 = vmatpush3.bf16.msra.mxu0 %v3543_v46  ;;  %v3557_v38 = vld [vmem:[%s6203_s1 + $0x158] sm:$0xff]   ;;  %v103_v46 = vld [vmem:[%s6204_s0 + $0x230] sm:$0xff] }
  0x28   :  { %3082 = vmatprep.subr.bf16.mxu1 %v3538_v45  ;;  %3194 = vmatprep.subr.bf16.mxu0 %v3549_v2  ;;  %v3559_v45 = vld [vmem:[%s6203_s1 + $0x150] sm:$0xff]  }
  0x29   :  { %v139_v2 = vld [vmem:[%s6204_s0 + $0x350] sm:$0xff] }
  0x2a   :  { %859 = vmatmul.mubr.bf16.gmra.mxu0 %v264_v51  ;;  %955 = vmatmul.mubr.bf16.gmra.mxu1 %v348_v52  ;;  %v118_v51 = vld [vmem:[%s6204_s0 + $0x2a8] sm:$0xff]  ;;  %v125_v52 = vld [vmem:[%s6204_s0 + $0x2e0] sm:$0xff] }
  0x2b   :  { %3083 = vmatpush3.bf16.msra.mxu1 %v3539_v53  ;;  %866 = vmatprep.mubr.bf16.mxu0 %v272_v54  ;;  %v64_v53 = vld [vmem:[%s6204_s0 + $0xf8] sm:$0xff]  ;;  %v71_v54 = vld [vmem:[%s6204_s0 + $0x130] sm:$0xff] }
  0x2c   :  { %3084 = vmatprep.subr.bf16.mxu1 %v3540_v55  ;;  %962 = vmatprep.mubr.bf16.mxu1 %v356_v56  ;;  %v292_v55 = vpack.c.bf16 %v110_v47, %v103_v46  ;;  %v266_v56 = vpack.c.bf16 %v56_v50, %v49_v49  ;;  %v274_v58 = vpack.c.bf16 %v71_v54, %v64_v53  ;;  %v180_v49 = vld [vmem:[%s6204_s0 + $0x498] sm:$0xff]  ;;  %v119_v50 = vld [vmem:[%s6204_s0 + $0x2b0] sm:$0xff]  ;;  %v134_v54 = vld [vmem:[%s6204_s0 + $0x328] sm:$0xff] }
  0x2d   :  { %3195 = vmatpush3.bf16.msra.mxu0 %v3551_v6  ;;  %v195_v53 = vld [vmem:[%s6204_s0 + $0x510] sm:$0xff] }
  0x2e   :  { %3196 = vmatprep.subr.bf16.mxu0 %v3555_v21  ;;  %v280_v21 = vpack.c.bf16 %v84_v14, %v77_v13  ;;  %v169_v13 = vld [vmem:[%s6204_s0 + $0x440] sm:$0xff]  ;;  %v52_v14 = vld [vmem:[%s6204_s0 + $0x98] sm:$0xff] }
  0x2f   :  { %3085 = vmatpush3.bf16.msra.mxu1 %v3542_v57  ;;  %v300_v57 = vpack.c.bf16 %v125_v52, %v118_v51  ;;  %v126_v51 = vld [vmem:[%s6204_s0 + $0x2e8] sm:$0xff]  ;;  %v188_v52 = vld [vmem:[%s6204_s0 + $0x4d8] sm:$0xff] }
  0x30   :  { %3086 = vmatprep.subr.bf16.mxu1 %v3544_v62  ;;  %v124_v62 = vld [vmem:[%s6204_s0 + $0x2d8] sm:$0xff] }
  0x31   :  { %3197 = vmatpush3.bf16.msra.mxu0 %v3556_v24  ;;  %v299_v6 = vpack.c.bf16 %v124_v62, %v117_v60  ;;  %v145_v24 = vld [vmem:[%s6204_s0 + $0x380] sm:$0xff]  ;;  %v187_v60 = vld [vmem:[%s6204_s0 + $0x4d0] sm:$0xff] }
  0x32   :  { %867 = vmatmul.mubr.bf16.gmra.mxu0 %v271_v4  ;;  %963 = vmatmul.mubr.bf16.gmra.mxu1 %v355_v5  ;;  %v85_v4 = vld [vmem:[%s6204_s0 + $0x1a0] sm:$0xff] }
  0x33   :  { %3087 = vmatpush3.bf16.msra.mxu1 %v3545_v7  ;;  %874 = vmatprep.mubr.bf16.mxu0 %v279_v8  ;;  %v3563_v5 = vld [vmem:[%s6203_s1 + $0x140] sm:$0xff]   ;;  %v273_v7 = vpack.c.bf16 %v70_v0, %v63_v63  ;;  %v140_v63 = vld [vmem:[%s6204_s0 + $0x358] sm:$0xff] }
  0x34   :  { %3088 = vmatprep.subr.bf16.mxu1 %v3546_v9  ;;  %970 = vmatprep.mubr.bf16.mxu1 %v363_v10  ;;  %v3564_v8 = vld [vmem:[%s6203_s1 + $0x100] sm:$0xff]   ;;  %v307_v9 = vpack.c.bf16 %v139_v2, %v132_v1  ;;  %v281_v10 = vpack.c.bf16 %v85_v4, %v78_v3  ;;  %v148_v0 = vld [vmem:[%s6204_s0 + $0x398] sm:$0xff]  ;;  %v155_v1 = vld [vmem:[%s6204_s0 + $0x3d0] sm:$0xff] }
  0x35   :  { %3198 = vmatprep.subr.bf16.mxu0 %v3557_v38  ;;  %v105_v38 = vld [vmem:[%s6204_s0 + $0x240] sm:$0xff]  ;;  %v38_v2 = vld [vmem:[%s6204_s0 + $0x28] sm:$0xff] }
  0x36   :  { %3199 = vmatpush3.bf16.msra.mxu0 %v3558_v40  ;;  %v174_v40 = vld [vmem:[%s6204_s0 + $0x468] sm:$0xff]  ;;  %v133_v62 = vld [vmem:[%s6204_s0 + $0x320] sm:$0xff] }
  0x37   :  { %3089 = vmatpush3.bf16.msra.mxu1 %v3547_v11  ;;  %3200 = vmatprep.subr.bf16.mxu0 %v3559_v45  ;;  %v131_v11 = vld [vmem:[%s6204_s0 + $0x310] sm:$0xff]  ;;  %v294_v45 = vpack.c.bf16 %v112_v39, %v105_v38  ;;  %v45_v3 = vld [vmem:[%s6204_s0 + $0x60] sm:$0xff]  ;;  %v80_v38 = vld [vmem:[%s6204_s0 + $0x178] sm:$0xff] }
  0x38   :  { %3090 = vmatprep.subr.bf16.mxu1 %v3548_v16  ;;  %v153_v16 = vld [vmem:[%s6204_s0 + $0x3c0] sm:$0xff]  ;;  %v306_v20 = vpack.c.bf16 %v138_v12, %v131_v11  ;;  %v44_v11 = vld [vmem:[%s6204_s0 + $0x58] sm:$0xff]  ;;  %v162_v12 = vld [vmem:[%s6204_s0 + $0x408] sm:$0xff] }
  0x39   :  { %v87_v39 = vld [vmem:[%s6204_s0 + $0x1b0] sm:$0xff] }
  0x3a   :  { %875 = vmatmul.mubr.bf16.gmra.mxu0 %v278_v22  ;;  %971 = vmatmul.mubr.bf16.gmra.mxu1 %v362_v23  ;;  %v314_v22 = vpack.c.bf16 %v153_v16, %v146_v15  ;;  %v288_v23 = vpack.c.bf16 %v99_v18, %v92_v17  ;;  %v59_v15 = vld [vmem:[%s6204_s0 + $0xd0] sm:$0xff]  ;;  %v323_v18 = vpack.c.bf16 %v169_v13, %v162_v12 }
  0x3b   :  { %3091 = vmatpush3.bf16.msra.mxu1 %v3550_v25  ;;  %882 = vmatprep.mubr.bf16.mxu0 %v286_v26  ;;  %v152_v25 = vld [vmem:[%s6204_s0 + $0x3b8] sm:$0xff]  ;;  %v91_v26 = vld [vmem:[%s6204_s0 + $0x1d0] sm:$0xff] }
  0x3c   :  { %3092 = vmatprep.subr.bf16.mxu1 %v3552_v27  ;;  %1011 = vmatprep.mubr.bf16.mxu1 %v260_v28  ;;  %v98_v27 = vld [vmem:[%s6204_s0 + $0x208] sm:$0xff]  ;;  %v160_v28 = vld [vmem:[%s6204_s0 + $0x3f8] sm:$0xff]  ;;  %v313_v32 = vpack.c.bf16 %v152_v25, %v145_v24  ;;  %v183_v25 = vld [vmem:[%s6204_s0 + $0x4b0] sm:$0xff] }
  0x3d   :  { %3201 = vmatpush3.bf16.msra.mxu0 %v3560_v48  ;;  %v287_v33 = vpack.c.bf16 %v98_v27, %v91_v26  ;;  %v173_v48 = vld [vmem:[%s6204_s0 + $0x460] sm:$0xff]  ;;  %v176_v24 = vld [vmem:[%s6204_s0 + $0x478] sm:$0xff]  ;;  %v66_v26 = vld [vmem:[%s6204_s0 + $0x108] sm:$0xff] }
  0x3e   :  { %3202 = vmatprep.subr.bf16.mxu0 %v3561_v59  ;;  %v73_v27 = vld [vmem:[%s6204_s0 + $0x140] sm:$0xff]  ;;  %v330_v30 = vpack.c.bf16 %v183_v25, %v176_v24 }
  0x3f   :  { %3093 = vmatpush3.bf16.msra.mxu1 %v3553_v29  ;;  %v167_v29 = vld [vmem:[%s6204_s0 + $0x430] sm:$0xff]  ;;  %v276_v31 = vpack.c.bf16 %v73_v27, %v66_v26 }
  0x40   :  { %3368 = vmatprep.subr.bf16.mxu1 %v3554_v34 }
  0x41   :  { %3203 = vmatpush3.bf16.msra.mxu0 %v3562_v61  ;;  %v194_v61 = vld [vmem:[%s6204_s0 + $0x508] sm:$0xff] }
  0x42   :  { %883 = vmatmul.mubr.bf16.gmra.mxu0 %v285_v41  ;;  %1012 = vmatmul.mubr.bf16.vlgmr.msra.gmra.mxu1 %v259_v42  ;;  %v181_v41 = vld [vmem:[%s6204_s0 + $0x4a0] sm:$0xff]  ;;  %v120_v42 = vld [vmem:[%s6204_s0 + $0x2b8] sm:$0xff]  ;;  %v334_v4 = vpack.c.bf16 %v194_v61, %v187_v60  ;;  %v218_v60 = vld [vmem:[%s6204_s0 + $0x5c8] sm:$0xff] }
  0x43   :  { %3369 = vmatpush3.bf16.msra.mxu1 %v3554_v34  ;;  %890 = vmatprep.mubr.bf16.mxu0 %v293_v43  ;;  %v321_v34 = vpack.c.bf16 %v167_v29, %v160_v28  ;;  %v127_v43 = vld [vmem:[%s6204_s0 + $0x2f0] sm:$0xff]  ;;  %v328_v46 = vpack.c.bf16 %v181_v41, %v174_v40  ;;  %v225_v61 = vld [vmem:[%s6204_s0 + $0x600] sm:$0xff] }
  0x44   :  { %1019 = vmatprep.mubr.bf16.mxu1 %v267_v44  ;;  %3204 = vmatprep.subr.bf16.mxu0 %v3563_v5  ;;  %v320_v44 = vpack.c.bf16 %v166_v37, %v159_v36  ;;  %v302_v47 = vpack.c.bf16 %v127_v43, %v120_v42  ;;  %v308_v5 = vpack.c.bf16 %v140_v63, %v133_v62  ;;  %v190_v36 = vld [vmem:[%s6204_s0 + $0x4e8] sm:$0xff]  ;;  %v197_v37 = vld [vmem:[%s6204_s0 + $0x520] sm:$0xff]  ;;  %v108_v62 = vld [vmem:[%s6204_s0 + $0x258] sm:$0xff] }
  0x45   :  { %3205 = vmatpush3.bf16.msra.mxu0 %v3564_v8  ;;  %3370 = vmatprep.subr.bf16.mxu1 %v3565_v19  ;;  %v147_v8 = vld [vmem:[%s6204_s0 + $0x390] sm:$0xff]  ;;  %v337_v42 = vpack.c.bf16 %v197_v37, %v190_v36  ;;  %v283_v43 = vpack.c.bf16 %v87_v39, %v80_v38 }
  0x46   :  { %v115_v63 = vld [vmem:[%s6204_s0 + $0x290] sm:$0xff] }
  0x47   :  { %3371 = vmatpush3.bf16.msra.mxu1 %v3565_v19  ;;  %v269_v19 = vpack.c.bf16 %v59_v15, %v52_v14 }
  0x4a   :  { %891 = vmatmul.mubr.bf16.gmra.mxu0 %v292_v55  ;;  %1020 = vmatmul.mubr.bf16.gmra.mxu1 %v266_v56  ;;  %v141_v55 = vld [vmem:[%s6204_s0 + $0x360] sm:$0xff]  ;;  %v327_v56 = vpack.c.bf16 %v180_v49, %v173_v48  ;;  %v204_v48 = vld [vmem:[%s6204_s0 + $0x558] sm:$0xff]  ;;  %v211_v49 = vld [vmem:[%s6204_s0 + $0x590] sm:$0xff] }
  0x4b   :  { %898 = vmatprep.mubr.bf16.mxu0 %v300_v57  ;;  %1027 = vmatprep.mubr.bf16.mxu1 %v274_v58  ;;  %v301_v57 = vpack.c.bf16 %v126_v51, %v119_v50  ;;  %v335_v58 = vpack.c.bf16 %v195_v53, %v188_v52  ;;  %v309_v59 = vpack.c.bf16 %v141_v55, %v134_v54  ;;  %v94_v50 = vld [vmem:[%s6204_s0 + $0x1e8] sm:$0xff]  ;;  %v101_v51 = vld [vmem:[%s6204_s0 + $0x220] sm:$0xff] }
  0x4c   :  { %v344_v54 = vpack.c.bf16 %v211_v49, %v204_v48  ;;  %v290_v55 = vpack.c.bf16 %v101_v51, %v94_v50 }
  0x52   :  { %899 = vmatmul.mubr.bf16.gmra.mxu0 %v299_v6  ;;  %1028 = vmatmul.mubr.bf16.gmra.mxu1 %v273_v7  ;;  %v316_v6 = vpack.c.bf16 %v155_v1, %v148_v0  ;;  %v262_v7 = vpack.c.bf16 %v45_v3, %v38_v2  ;;  %v351_v2 = vpack.c.bf16 %v225_v61, %v218_v60 }
  0x53   :  { %906 = vmatprep.mubr.bf16.mxu0 %v307_v9  ;;  %1035 = vmatprep.mubr.bf16.mxu1 %v281_v10  ;;  %v154_v9 = vld [vmem:[%s6204_s0 + $0x3c8] sm:$0xff]  ;;  %v37_v10 = vld [vmem:[%s6204_s0 + $0x20] sm:$0xff]  ;;  %v297_v3 = vpack.c.bf16 %v115_v63, %v108_v62 }
  0x54   :  { %v315_v16 = vpack.c.bf16 %v154_v9, %v147_v8  ;;  %v261_v17 = vpack.c.bf16 %v44_v11, %v37_v10  ;;  %v232_v8 = vld [vmem:[%s6204_s0 + $0x638] sm:$0xff]  ;;  %v239_v9 = vld [vmem:[%s6204_s0 + $0x670] sm:$0xff]  ;;  %v122_v10 = vld [vmem:[%s6204_s0 + $0x2c8] sm:$0xff] }
  0x55   :  { %v129_v11 = vld [vmem:[%s6204_s0 + $0x300] sm:$0xff]  ;;  %v358_v14 = vpack.c.bf16 %v239_v9, %v232_v8 }
  0x56   :  { %v304_v15 = vpack.c.bf16 %v129_v11, %v122_v10 }
  0x5a   :  { %907 = vmatmul.mubr.bf16.gmra.mxu0 %v306_v20  ;;  %1036 = vmatmul.mubr.bf16.gmra.mxu1 %v280_v21  ;;  %v161_v20 = vld [vmem:[%s6204_s0 + $0x400] sm:$0xff]  ;;  %v168_v21 = vld [vmem:[%s6204_s0 + $0x438] sm:$0xff] }
  0x5b   :  { %914 = vmatprep.mubr.bf16.mxu0 %v314_v22  ;;  %1043 = vmatprep.mubr.bf16.mxu1 %v288_v23  ;;  %v51_v22 = vld [vmem:[%s6204_s0 + $0x90] sm:$0xff]  ;;  %v58_v23 = vld [vmem:[%s6204_s0 + $0xc8] sm:$0xff]  ;;  %v322_v28 = vpack.c.bf16 %v168_v21, %v161_v20  ;;  %v253_v21 = vld [vmem:[%s6204_s0 + $0x6e0] sm:$0xff] }
  0x5c   :  { %v268_v29 = vpack.c.bf16 %v58_v23, %v51_v22  ;;  %v246_v20 = vld [vmem:[%s6204_s0 + $0x6a8] sm:$0xff]  ;;  %v136_v22 = vld [vmem:[%s6204_s0 + $0x338] sm:$0xff]  ;;  %v143_v23 = vld [vmem:[%s6204_s0 + $0x370] sm:$0xff] }
  0x5d   :  { %v365_v26 = vpack.c.bf16 %v253_v21, %v246_v20  ;;  %v311_v27 = vpack.c.bf16 %v143_v23, %v136_v22 }
  0x62   :  { %915 = vmatmul.mubr.bf16.gmra.mxu0 %v313_v32  ;;  %1044 = vmatmul.mubr.bf16.gmra.mxu1 %v287_v33  ;;  %v175_v32 = vld [vmem:[%s6204_s0 + $0x470] sm:$0xff]  ;;  %v182_v33 = vld [vmem:[%s6204_s0 + $0x4a8] sm:$0xff] }
  0x63   :  { %922 = vmatprep.mubr.bf16.mxu0 %v321_v34  ;;  %1051 = vmatprep.mubr.bf16.mxu1 %v295_v35  ;;  %v65_v34 = vld [vmem:[%s6204_s0 + $0x100] sm:$0xff]  ;;  %v72_v35 = vld [vmem:[%s6204_s0 + $0x138] sm:$0xff]  ;;  %v329_v40 = vpack.c.bf16 %v182_v33, %v175_v32  ;;  %v150_v32 = vld [vmem:[%s6204_s0 + $0x3a8] sm:$0xff] }
  0x64   :  { %v275_v41 = vpack.c.bf16 %v72_v35, %v65_v34  ;;  %v157_v33 = vld [vmem:[%s6204_s0 + $0x3e0] sm:$0xff]  ;;  %v39_v34 = vld [vmem:[%s6204_s0 + $0x30] sm:$0xff]  ;;  %v46_v35 = vld [vmem:[%s6204_s0 + $0x68] sm:$0xff] }
  0x65   :  { %v318_v38 = vpack.c.bf16 %v157_v33, %v150_v32  ;;  %v263_v39 = vpack.c.bf16 %v46_v35, %v39_v34 }
  0x6a   :  { %923 = vmatmul.mubr.bf16.gmra.mxu0 %v320_v44  ;;  %1052 = vmatmul.mubr.bf16.gmra.mxu1 %v294_v45  ;;  %v189_v44 = vld [vmem:[%s6204_s0 + $0x4e0] sm:$0xff]  ;;  %v196_v45 = vld [vmem:[%s6204_s0 + $0x518] sm:$0xff] }
  0x6b   :  { %930 = vmatprep.mubr.bf16.mxu0 %v328_v46  ;;  %1059 = vmatprep.mubr.bf16.mxu1 %v302_v47  ;;  %v79_v46 = vld [vmem:[%s6204_s0 + $0x170] sm:$0xff]  ;;  %v86_v47 = vld [vmem:[%s6204_s0 + $0x1a8] sm:$0xff]  ;;  %v336_v52 = vpack.c.bf16 %v196_v45, %v189_v44  ;;  %v164_v44 = vld [vmem:[%s6204_s0 + $0x418] sm:$0xff] }
  0x6c   :  { %v282_v53 = vpack.c.bf16 %v86_v47, %v79_v46  ;;  %v171_v45 = vld [vmem:[%s6204_s0 + $0x450] sm:$0xff]  ;;  %v74_v47 = vld [vmem:[%s6204_s0 + $0x148] sm:$0xff] }
  0x6d   :  { %v67_v46 = vld [vmem:[%s6204_s0 + $0x110] sm:$0xff]  ;;  %v325_v50 = vpack.c.bf16 %v171_v45, %v164_v44  ;;  %v241_v45 = vld [vmem:[%s6204_s0 + $0x680] sm:$0xff] }
  0x6e   :  { %v277_v51 = vpack.c.bf16 %v74_v47, %v67_v46  ;;  %v207_v46 = vld [vmem:[%s6204_s0 + $0x570] sm:$0xff]  ;;  %v214_v47 = vld [vmem:[%s6204_s0 + $0x5a8] sm:$0xff] }
  0x72   :  { %931 = vmatmul.mubr.bf16.gmra.mxu0 %v327_v56  ;;  %1060 = vmatmul.mubr.bf16.gmra.mxu1 %v301_v57  ;;  %v203_v56 = vld [vmem:[%s6204_s0 + $0x550] sm:$0xff]  ;;  %v210_v57 = vld [vmem:[%s6204_s0 + $0x588] sm:$0xff] }
  0x73   :  { %938 = vmatprep.mubr.bf16.mxu0 %v335_v58  ;;  %1067 = vmatprep.mubr.bf16.mxu1 %v309_v59  ;;  %v93_v58 = vld [vmem:[%s6204_s0 + $0x1e0] sm:$0xff]  ;;  %v100_v59 = vld [vmem:[%s6204_s0 + $0x218] sm:$0xff]  ;;  %v343_v0 = vpack.c.bf16 %v210_v57, %v203_v56  ;;  %v178_v56 = vld [vmem:[%s6204_s0 + $0x488] sm:$0xff] }
  0x74   :  { %v289_v1 = vpack.c.bf16 %v100_v59, %v93_v58  ;;  %v185_v57 = vld [vmem:[%s6204_s0 + $0x4c0] sm:$0xff]  ;;  %v95_v58 = vld [vmem:[%s6204_s0 + $0x1f0] sm:$0xff]  ;;  %v102_v59 = vld [vmem:[%s6204_s0 + $0x228] sm:$0xff] }
  0x75   :  { %v332_v62 = vpack.c.bf16 %v185_v57, %v178_v56  ;;  %v291_v63 = vpack.c.bf16 %v102_v59, %v95_v58 }
  0x7a   :  { %939 = vmatmul.mubr.bf16.gmra.mxu0 %v334_v4  ;;  %1068 = vmatmul.mubr.bf16.gmra.mxu1 %v308_v5  ;;  %v217_v4 = vld [vmem:[%s6204_s0 + $0x5c0] sm:$0xff]  ;;  %v224_v5 = vld [vmem:[%s6204_s0 + $0x5f8] sm:$0xff] }
  0x7b   :  { %1075 = vmatprep.mubr.bf16.mxu1 %v316_v6  ;;  %1172 = vmatprep.mubr.bf16.mxu0 %v262_v7  ;;  %v107_v6 = vld [vmem:[%s6204_s0 + $0x250] sm:$0xff]  ;;  %v114_v7 = vld [vmem:[%s6204_s0 + $0x288] sm:$0xff]  ;;  %v350_v12 = vpack.c.bf16 %v224_v5, %v217_v4  ;;  %v192_v4 = vld [vmem:[%s6204_s0 + $0x4f8] sm:$0xff] }
  0x7c   :  { %v296_v13 = vpack.c.bf16 %v114_v7, %v107_v6  ;;  %v199_v5 = vld [vmem:[%s6204_s0 + $0x530] sm:$0xff]  ;;  %v130_v7 = vld [vmem:[%s6204_s0 + $0x308] sm:$0xff] }
  0x7d   :  { %v123_v6 = vld [vmem:[%s6204_s0 + $0x2d0] sm:$0xff]  ;;  %v339_v10 = vpack.c.bf16 %v199_v5, %v192_v4  ;;  %v242_v5 = vld [vmem:[%s6204_s0 + $0x688] sm:$0xff] }
  0x7e   :  { %v305_v11 = vpack.c.bf16 %v130_v7, %v123_v6  ;;  %v235_v4 = vld [vmem:[%s6204_s0 + $0x650] sm:$0xff] }
  0x82   :  { %1076 = vmatmul.mubr.bf16.gmra.mxu1 %v315_v16  ;;  %1173 = vmatmul.mubr.bf16.vlgmr.msra.gmra.mxu0 %v261_v17  ;;  %v231_v16 = vld [vmem:[%s6204_s0 + $0x630] sm:$0xff]  ;;  %v238_v17 = vld [vmem:[%s6204_s0 + $0x668] sm:$0xff] }
  0x83   :  { %1083 = vmatprep.mubr.bf16.mxu1 %v323_v18  ;;  %1180 = vmatprep.mubr.bf16.mxu0 %v269_v19  ;;  %v121_v18 = vld [vmem:[%s6204_s0 + $0x2c0] sm:$0xff]  ;;  %v128_v19 = vld [vmem:[%s6204_s0 + $0x2f8] sm:$0xff]  ;;  %v357_v24 = vpack.c.bf16 %v238_v17, %v231_v16  ;;  %v206_v16 = vld [vmem:[%s6204_s0 + $0x568] sm:$0xff] }
  0x84   :  { %v303_v25 = vpack.c.bf16 %v128_v19, %v121_v18  ;;  %v213_v17 = vld [vmem:[%s6204_s0 + $0x5a0] sm:$0xff]  ;;  %v151_v18 = vld [vmem:[%s6204_s0 + $0x3b0] sm:$0xff]  ;;  %v158_v19 = vld [vmem:[%s6204_s0 + $0x3e8] sm:$0xff] }
  0x85   :  { %v346_v22 = vpack.c.bf16 %v213_v17, %v206_v16  ;;  %v319_v23 = vpack.c.bf16 %v158_v19, %v151_v18  ;;  %v247_v18 = vld [vmem:[%s6204_s0 + $0x6b0] sm:$0xff]  ;;  %v254_v19 = vld [vmem:[%s6204_s0 + $0x6e8] sm:$0xff] }
  0x8a   :  { %1084 = vmatmul.mubr.bf16.gmra.mxu1 %v322_v28  ;;  %1181 = vmatmul.mubr.bf16.gmra.mxu0 %v268_v29  ;;  %v245_v28 = vld [vmem:[%s6204_s0 + $0x6a0] sm:$0xff]  ;;  %v252_v29 = vld [vmem:[%s6204_s0 + $0x6d8] sm:$0xff] }
  0x8b   :  { %1091 = vmatprep.mubr.bf16.mxu1 %v330_v30  ;;  %1188 = vmatprep.mubr.bf16.mxu0 %v276_v31  ;;  %v135_v30 = vld [vmem:[%s6204_s0 + $0x330] sm:$0xff]  ;;  %v142_v31 = vld [vmem:[%s6204_s0 + $0x368] sm:$0xff]  ;;  %v364_v36 = vpack.c.bf16 %v252_v29, %v245_v28  ;;  %v220_v28 = vld [vmem:[%s6204_s0 + $0x5d8] sm:$0xff] }
  0x8c   :  { %v310_v37 = vpack.c.bf16 %v142_v31, %v135_v30  ;;  %v227_v29 = vld [vmem:[%s6204_s0 + $0x610] sm:$0xff]  ;;  %v186_v31 = vld [vmem:[%s6204_s0 + $0x4c8] sm:$0xff] }
  0x8d   :  { %v179_v30 = vld [vmem:[%s6204_s0 + $0x490] sm:$0xff]  ;;  %v353_v34 = vpack.c.bf16 %v227_v29, %v220_v28  ;;  %v366_v28 = vpack.c.bf16 %v254_v19, %v247_v18 }
  0x8e   :  { %v333_v35 = vpack.c.bf16 %v186_v31, %v179_v30 }
  0x92   :  { %1092 = vmatmul.mubr.bf16.gmra.mxu1 %v329_v40  ;;  %1189 = vmatmul.mubr.bf16.gmra.mxu0 %v275_v41  ;;  %v149_v40 = vld [vmem:[%s6204_s0 + $0x3a0] sm:$0xff]  ;;  %v156_v41 = vld [vmem:[%s6204_s0 + $0x3d8] sm:$0xff] }
  0x93   :  { %1099 = vmatprep.mubr.bf16.mxu1 %v337_v42  ;;  %1196 = vmatprep.mubr.bf16.mxu0 %v283_v43  ;;  %v53_v42 = vld [vmem:[%s6204_s0 + $0xa0] sm:$0xff]  ;;  %v60_v43 = vld [vmem:[%s6204_s0 + $0xd8] sm:$0xff]  ;;  %v317_v48 = vpack.c.bf16 %v156_v41, %v149_v40 }
  0x94   :  { %v270_v49 = vpack.c.bf16 %v60_v43, %v53_v42  ;;  %v193_v40 = vld [vmem:[%s6204_s0 + $0x500] sm:$0xff]  ;;  %v200_v41 = vld [vmem:[%s6204_s0 + $0x538] sm:$0xff]  ;;  %v234_v42 = vld [vmem:[%s6204_s0 + $0x648] sm:$0xff] }
  0x9a   :  { %1100 = vmatmul.mubr.bf16.gmra.mxu1 %v336_v52  ;;  %1197 = vmatmul.mubr.bf16.gmra.mxu0 %v282_v53  ;;  %v163_v52 = vld [vmem:[%s6204_s0 + $0x410] sm:$0xff]  ;;  %v170_v53 = vld [vmem:[%s6204_s0 + $0x448] sm:$0xff] }
  0x9b   :  { %1107 = vmatprep.mubr.bf16.mxu1 %v344_v54  ;;  %1204 = vmatprep.mubr.bf16.mxu0 %v290_v55  ;;  %v81_v54 = vld [vmem:[%s6204_s0 + $0x180] sm:$0xff]  ;;  %v88_v55 = vld [vmem:[%s6204_s0 + $0x1b8] sm:$0xff]  ;;  %v324_v60 = vpack.c.bf16 %v170_v53, %v163_v52  ;;  %v340_v53 = vpack.c.bf16 %v200_v41, %v193_v40 }
  0x9c   :  { %v284_v61 = vpack.c.bf16 %v88_v55, %v81_v54  ;;  %v360_v54 = vpack.c.bf16 %v241_v45, %v234_v42  ;;  %v347_v55 = vpack.c.bf16 %v214_v47, %v207_v46 }
  0xa2   :  { %1108 = vmatmul.mubr.bf16.gmra.mxu1 %v343_v0  ;;  %1205 = vmatmul.mubr.bf16.gmra.mxu0 %v289_v1  ;;  %v177_v0 = vld [vmem:[%s6204_s0 + $0x480] sm:$0xff]  ;;  %v184_v1 = vld [vmem:[%s6204_s0 + $0x4b8] sm:$0xff] }
  0xa3   :  { %1115 = vmatprep.mubr.bf16.mxu1 %v351_v2  ;;  %1212 = vmatprep.mubr.bf16.mxu0 %v297_v3  ;;  %v109_v2 = vld [vmem:[%s6204_s0 + $0x260] sm:$0xff]  ;;  %v116_v3 = vld [vmem:[%s6204_s0 + $0x298] sm:$0xff]  ;;  %v331_v8 = vpack.c.bf16 %v184_v1, %v177_v0 }
  0xa4   :  { %v298_v9 = vpack.c.bf16 %v116_v3, %v109_v2  ;;  %v248_v0 = vld [vmem:[%s6204_s0 + $0x6b8] sm:$0xff]  ;;  %v255_v3 = vld [vmem:[%s6204_s0 + $0x6f0] sm:$0xff] }
  0xaa   :  { %1116 = vmatmul.mubr.bf16.gmra.mxu1 %v350_v12  ;;  %1213 = vmatmul.mubr.bf16.gmra.mxu0 %v296_v13  ;;  %v191_v12 = vld [vmem:[%s6204_s0 + $0x4f0] sm:$0xff]  ;;  %v198_v13 = vld [vmem:[%s6204_s0 + $0x528] sm:$0xff] }
  0xab   :  { %1123 = vmatprep.mubr.bf16.mxu1 %v358_v14  ;;  %1220 = vmatprep.mubr.bf16.mxu0 %v304_v15  ;;  %v137_v14 = vld [vmem:[%s6204_s0 + $0x340] sm:$0xff]  ;;  %v144_v15 = vld [vmem:[%s6204_s0 + $0x378] sm:$0xff]  ;;  %v338_v20 = vpack.c.bf16 %v198_v13, %v191_v12  ;;  %v367_v12 = vpack.c.bf16 %v255_v3, %v248_v0  ;;  %v361_v13 = vpack.c.bf16 %v242_v5, %v235_v4 }
  0xac   :  { %v312_v21 = vpack.c.bf16 %v144_v15, %v137_v14 }
  0xb2   :  { %1124 = vmatmul.mubr.bf16.gmra.mxu1 %v357_v24  ;;  %1221 = vmatmul.mubr.bf16.gmra.mxu0 %v303_v25  ;;  %v205_v24 = vld [vmem:[%s6204_s0 + $0x560] sm:$0xff]  ;;  %v212_v25 = vld [vmem:[%s6204_s0 + $0x598] sm:$0xff] }
  0xb3   :  { %1131 = vmatprep.mubr.bf16.mxu1 %v365_v26  ;;  %1228 = vmatprep.mubr.bf16.mxu0 %v311_v27  ;;  %v165_v26 = vld [vmem:[%s6204_s0 + $0x420] sm:$0xff]  ;;  %v172_v27 = vld [vmem:[%s6204_s0 + $0x458] sm:$0xff]  ;;  %v345_v32 = vpack.c.bf16 %v212_v25, %v205_v24 }
  0xb4   :  { %v326_v33 = vpack.c.bf16 %v172_v27, %v165_v26 }
  0xba   :  { %1132 = vmatmul.mubr.bf16.gmra.mxu1 %v364_v36  ;;  %1229 = vmatmul.mubr.bf16.gmra.mxu0 %v310_v37 }
  0xbb   :  { %1236 = vmatprep.mubr.bf16.mxu0 %v318_v38  ;;  %3372 = vmatprep.mubr.msk.bf16.mxu1 %vm769_vm0, %v263_v39  ;;  %v219_v38 = vld [vmem:[%s6204_s0 + $0x5d0] sm:$0xff]  ;;  %v226_v39 = vld [vmem:[%s6204_s0 + $0x608] sm:$0xff] }
  0xbc   :  { %v352_v52 = vpack.c.bf16 %v226_v39, %v219_v38 }
  0xc2   :  { %1237 = vmatmul.mubr.bf16.gmra.mxu0 %v317_v48  ;;  %3373 = vmatmul.mubr.msk.bf16.vlgmr.msra.gmra.mxu1 %vm769_vm0, %v270_v49 }
  0xc3   :  { %1244 = vmatprep.mubr.bf16.mxu0 %v325_v50  ;;  %3376 = vmatprep.mubr.msk.bf16.mxu1 %vm769_vm0, %v277_v51 }
  0xca   :  { %1245 = vmatmul.mubr.bf16.gmra.mxu0 %v324_v60  ;;  %3377 = vmatmul.mubr.msk.bf16.gmra.mxu1 %vm769_vm0, %v284_v61  ;;  %v233_v60 = vld [vmem:[%s6204_s0 + $0x640] sm:$0xff]  ;;  %v240_v61 = vld [vmem:[%s6204_s0 + $0x678] sm:$0xff] }
  0xcb   :  { %1252 = vmatprep.mubr.bf16.mxu0 %v332_v62  ;;  %3380 = vmatprep.mubr.msk.bf16.mxu1 %vm769_vm0, %v291_v63  ;;  %v221_v62 = vld [vmem:[%s6204_s0 + $0x5e0] sm:$0xff]  ;;  %v228_v63 = vld [vmem:[%s6204_s0 + $0x618] sm:$0xff] }
  0xd2   :  { %1253 = vmatmul.mubr.bf16.gmra.mxu0 %v331_v8  ;;  %3381 = vmatmul.mubr.msk.bf16.gmra.mxu1 %vm769_vm0, %v298_v9 }
  0xd3   :  { %1260 = vmatprep.mubr.bf16.mxu0 %v339_v10  ;;  %3384 = vmatprep.mubr.msk.bf16.mxu1 %vm769_vm0, %v305_v11  ;;  %v359_v10 = vpack.c.bf16 %v240_v61, %v233_v60  ;;  %v354_v11 = vpack.c.bf16 %v228_v63, %v221_v62 }
  0xda   :  { %1261 = vmatmul.mubr.bf16.gmra.mxu0 %v338_v20  ;;  %3385 = vmatmul.mubr.msk.bf16.gmra.mxu1 %vm769_vm0, %v312_v21  ;;  %v249_v20 = vld [vmem:[%s6204_s0 + $0x6c0] sm:$0xff]  ;;  %v256_v21 = vld [vmem:[%s6204_s0 + $0x6f8] sm:$0xff] }
  0xdb   :  { %1268 = vmatprep.mubr.bf16.mxu0 %v346_v22  ;;  %3388 = vmatprep.mubr.msk.bf16.mxu1 %vm769_vm0, %v319_v23  ;;  %v368_v29 = vpack.c.bf16 %v256_v21, %v249_v20 }
  0xe2   :  { %v2982_v36 = vpop.f32.mrf.mxu0  ;;  %v3054_v37 = vpop.f32.mrf.mxu1  ;;  %1269 = vmatmul.mubr.bf16.gmra.mxu0 %v345_v32  ;;  %3389 = vmatmul.mubr.msk.bf16.gmra.mxu1 %vm769_vm0, %v326_v33 }
  0xe3   :  { %1276 = vmatprep.mubr.bf16.mxu0 %v353_v34  ;;  %3392 = vmatprep.mubr.msk.bf16.mxu1 %vm769_vm0, %v333_v35 }
  0xe4   :  { %v2983_v43 = vpop.f32.mrf.mxu0  ;;  %v3055_v44 = vpop.f32.mrf.mxu1 }
  0xe5   :  { %v4561_v48 = vadd.f32 %v2983_v43, %v2982_v36  ;;  %v4563_v49 = vadd.f32 %v3055_v44, %v3054_v37 }
  0xe6   :  { %v4565_v50 = vpop.f32.mrf.mxu0  ;;  %v4567_v51 = vpop.f32.mrf.mxu1 }
  0xe8   :  { %v4569_v56 = vpop.f32.mrf.mxu0  ;;  %v4571_v57 = vpop.f32.mrf.mxu1 }
  0xea   :  { %v2988_v58 = vpop.f32.mrf.mxu0  ;;  %v3060_v59 = vpop.f32.mrf.mxu1  ;;  %1277 = vmatmul.mubr.bf16.gmra.mxu0 %v352_v52  ;;  %3393 = vmatmul.mubr.msk.bf16.gmra.mxu1 %vm769_vm0, %v340_v53 }
  0xeb   :  { %1284 = vmatprep.mubr.bf16.mxu0 %v360_v54  ;;  %3396 = vmatprep.mubr.msk.bf16.mxu1 %vm769_vm0, %v347_v55 }
  0xec   :  { %v2989_v1 = vpop.f32.mrf.mxu0  ;;  %v3061_v2 = vpop.f32.mrf.mxu1 }
  0xed   :  { %v4599_v6 = vadd.f32 %v2989_v1, %v2988_v58  ;;  %v4601_v7 = vadd.f32 %v3061_v2, %v3060_v59  ;;  %v2987_v59 = vadd.f32 %v4569_v56, %v4565_v50 }
  0xee   :  { %v4603_v8 = vpop.f32.mrf.mxu0  ;;  %v4605_v9 = vpop.f32.mrf.mxu1 }
  0xf0   :  { %v2992_v14 = vpop.f32.mrf.mxu0  ;;  %v4607_v15 = vpop.f32.mrf.mxu1 }
  0xf2   :  { %v2994_v16 = vpop.f32.mrf.mxu0  ;;  %v3066_v17 = vpop.f32.mrf.mxu1  ;;  %1285 = vmatmul.mubr.bf16.gmra.mxu0 %v359_v10  ;;  %3397 = vmatmul.mubr.msk.bf16.gmra.mxu1 %vm769_vm0, %v354_v11 }
  0xf3   :  { %1292 = vmatprep.mubr.bf16.mxu0 %v367_v12  ;;  %3400 = vmatprep.mubr.msk.bf16.mxu1 %vm769_vm0, %v361_v13  ;;  %v2993_v12 = vadd.f32 %v2992_v14, %v4603_v8 }
  0xf4   :  { %v2995_v22 = vpop.f32.mrf.mxu0  ;;  %v3067_v23 = vpop.f32.mrf.mxu1 }
  0xf5   :  { %v2996_v24 = vadd.f32 %v2995_v22, %v2994_v16  ;;  %v4623_v25 = vadd.f32 %v3067_v23, %v3066_v17 }
  0xf6   :  { %v2997_v26 = vpop.f32.mrf.mxu0  ;;  %v4625_v27 = vpop.f32.mrf.mxu1 }
  0xf8   :  { %v2998_v30 = vpop.f32.mrf.mxu0  ;;  %v4627_v31 = vpop.f32.mrf.mxu1 }
  0xfa   :  { %v3000_v32 = vpop.f32.mrf.mxu0  ;;  %v3072_v33 = vpop.f32.mrf.mxu1  ;;  %1293 = vmatmul.mubr.bf16.gmra.mxu0 %v366_v28  ;;  %3401 = vmatmul.mubr.msk.bf16.gmra.mxu1 %vm769_vm0, %v368_v29  ;;  %v2999_v29 = vadd.f32 %v2998_v30, %v2997_v26 }
  0xfc   :  { %v3001_v34 = vpop.f32.mrf.mxu0  ;;  %v3073_v35 = vpop.f32.mrf.mxu1 }
  0xfd   :  { %v3002_v36 = vadd.f32 %v3001_v34, %v3000_v32  ;;  %v4630_v37 = vadd.f32 %v3073_v35, %v3072_v33 }
  0xfe   :  { %v3003_v38 = vpop.f32.mrf.mxu0  ;;  %v4632_v39 = vpop.f32.mrf.mxu1 }
 0x100   :  { %v3004_v40 = vpop.f32.mrf.mxu0  ;;  %v4634_v41 = vpop.f32.mrf.mxu1 }
 0x102   :  { %v3006_v42 = vpop.f32.mrf.mxu0  ;;  %v3094_v43 = vpop.f32.mrf.mxu1 }
 0x104   :  { %v3007_v44 = vpop.f32.mrf.mxu0  ;;  %v3095_v45 = vpop.f32.mrf.mxu1 }
 0x105   :  { %v3008_v46 = vadd.f32 %v3007_v44, %v3006_v42  ;;  %v3096_v47 = vadd.f32 %v3095_v45, %v3094_v43 }
 0x106   :  { %v3009_v52 = vpop.f32.mrf.mxu0  ;;  %v3097_v53 = vpop.f32.mrf.mxu1 }
 0x107   :  { %v4637_v54 = vadd.f32 %v3096_v47, %v4561_v48 }
 0x108   :  { %v3010_v55 = vpop.f32.mrf.mxu0  ;;  %v3098_v58 = vpop.f32.mrf.mxu1 }
 0x109   :  { %v3099_v60 = vadd.f32 %v3098_v58, %v3097_v53  ;;  %v3005_v58 = vadd.f32 %v3004_v40, %v3003_v38 }
 0x10a   :  { %v3012_v61 = vpop.f32.mrf.mxu0  ;;  %v3100_v62 = vpop.f32.mrf.mxu1 }
 0x10b   :  { %v4641_v63 = vadd.f32 %v3099_v60, %v2987_v59 }
 0x10c   :  { %v3013_v0 = vpop.f32.mrf.mxu0  ;;  %v3101_v1 = vpop.f32.mrf.mxu1 }
 0x10d   :  { %v3014_v2 = vadd.f32 %v3013_v0, %v3012_v61  ;;  %v3102_v3 = vadd.f32 %v3101_v1, %v3100_v62 }
 0x10e   :  { %v3015_v4 = vpop.f32.mrf.mxu0  ;;  %v3103_v5 = vpop.f32.mrf.mxu1 }
 0x10f   :  { %v4644_v10 = vadd.f32 %v3102_v3, %v4599_v6 }
 0x110   :  { %v3016_v48 = vpop.f32.mrf.mxu0  ;;  %v3104_v11 = vpop.f32.mrf.mxu1 }
 0x111   :  { %v3105_v13 = vadd.f32 %v3104_v11, %v3103_v5 }
 0x112   :  { %v3018_v50 = vpop.f32.mrf.mxu0  ;;  %v3106_v56 = vpop.f32.mrf.mxu1 }
 0x113   :  { %v4647_v16 = vadd.f32 %v3105_v13, %v2993_v12  ;;  %v3011_v13 = vadd.f32 %v3010_v55, %v3009_v52 }
 0x114   :  { %v3019_v17 = vpop.f32.mrf.mxu0  ;;  %v3107_v18 = vpop.f32.mrf.mxu1 }
 0x115   :  { %v3020_v19 = vadd.f32 %v3019_v17, %v3018_v50  ;;  %v3108_v20 = vadd.f32 %v3107_v18, %v3106_v56 }
 0x116   :  { %v4649_v21 = vpop.f32.mrf.mxu0  ;;  %v3109_v22 = vpop.f32.mrf.mxu1 }
 0x117   :  { %v4651_v23 = vadd.f32 %v3108_v20, %v2996_v24 }
 0x118   :  { %v3022_v6 = vpop.f32.mrf.mxu0  ;;  %v3110_v28 = vpop.f32.mrf.mxu1 }
 0x119   :  { %v3111_v32 = vadd.f32 %v3110_v28, %v3109_v22 }
 0x11a   :  { %v3024_v33 = vpop.f32.mrf.mxu0  ;;  %v3112_v8 = vpop.f32.mrf.mxu1 }
 0x11b   :  { %v4653_v14 = vadd.f32 %v3111_v32, %v2999_v29 }
 0x11c   :  { %v3025_v34 = vpop.f32.mrf.mxu0  ;;  %v3113_v35 = vpop.f32.mrf.mxu1 }
 0x11d   :  { %v4655_v42 = vadd.f32 %v3025_v34, %v3024_v33  ;;  %v3114_v43 = vadd.f32 %v3113_v35, %v3112_v8  ;;  %v3017_v34 = vadd.f32 %v3016_v48, %v3015_v4 }
 0x11e   :  { %v4657_v44 = vpop.f32.mrf.mxu0  ;;  %v3115_v45 = vpop.f32.mrf.mxu1 }
 0x11f   :  { %v4659_v47 = vadd.f32 %v3114_v43, %v3002_v36 }
 0x120   :  { %v3028_v24 = vpop.f32.mrf.mxu0  ;;  %v3116_v53 = vpop.f32.mrf.mxu1 }
 0x121   :  { %v3117_v59 = vadd.f32 %v3116_v53, %v3115_v45 }
 0x122   :  { %v3030_v26 = vpop.f32.mrf.mxu0  ;;  %v3118_v30 = vpop.f32.mrf.mxu1 }
 0x123   :  { %v4661_v60 = vadd.f32 %v3117_v59, %v3005_v58 }
 0x124   :  { %v3031_v61 = vpop.f32.mrf.mxu0  ;;  %v3119_v62 = vpop.f32.mrf.mxu1 }
 0x125   :  { %v4663_v0 = vadd.f32 %v3031_v61, %v3030_v26  ;;  %v3120_v1 = vadd.f32 %v3119_v62, %v3118_v30 }
 0x126   :  { %v3033_v3 = vpop.f32.mrf.mxu0  ;;  %v3121_v5 = vpop.f32.mrf.mxu1 }
 0x127   :  { %v4665_v11 = vadd.f32 %v3120_v1, %v3008_v46 }
 0x128   :  { %v3034_v12 = vpop.f32.mrf.mxu0  ;;  %v3122_v36 = vpop.f32.mrf.mxu1 }
 0x129   :  { %v4667_v50 = vadd.f32 %v3034_v12, %v3033_v3  ;;  %v3123_v38 = vadd.f32 %v3122_v36, %v3121_v5  ;;  %v3023_v3 = vadd.f32 %v3022_v6, %v4649_v21 }
 0x12a   :  { %v3036_v40 = vpop.f32.mrf.mxu0  ;;  %v3124_v56 = vpop.f32.mrf.mxu1 }
 0x12b   :  { %v4669_v17 = vadd.f32 %v3123_v38, %v3011_v13 }
 0x12c   :  { %v3037_v18 = vpop.f32.mrf.mxu0  ;;  %v3125_v20 = vpop.f32.mrf.mxu1 }
 0x12d   :  { %v3038_v22 = vadd.f32 %v3037_v18, %v3036_v40  ;;  %v3126_v28 = vadd.f32 %v3125_v20, %v3124_v56 }
 0x12e   :  { %v3039_v29 = vpop.f32.mrf.mxu0  ;;  %v3127_v32 = vpop.f32.mrf.mxu1 }
 0x12f   :  { %v4671_v33 = vadd.f32 %v3126_v28, %v3014_v2 }
 0x130   :  { %v3040_v46 = vpop.f32.mrf.mxu0  ;;  %v3128_v8 = vpop.f32.mrf.mxu1 }
 0x131   :  { %v3041_v35 = vadd.f32 %v3040_v46, %v3039_v29  ;;  %v3129_v52 = vadd.f32 %v3128_v8, %v3127_v32  ;;  %v3029_v32 = vadd.f32 %v3028_v24, %v4657_v44 }
 0x132   :  { %v3042_v55 = vpop.f32.mrf.mxu0  ;;  %v3130_v43 = vpop.f32.mrf.mxu1 }
 0x133   :  { %v4673_v45 = vadd.f32 %v3129_v52, %v3017_v34 }
 0x134   :  { %v3043_v53 = vpop.f32.mrf.mxu0  ;;  %v3131_v58 = vpop.f32.mrf.mxu1 }
 0x135   :  { %v3044_v59 = vadd.f32 %v3043_v53, %v3042_v55  ;;  %v3132_v26 = vadd.f32 %v3131_v58, %v3130_v43 }
 0x136   :  { %v3045_v30 = vpop.f32.mrf.mxu0  ;;  %v3133_v61 = vpop.f32.mrf.mxu1 }
 0x137   :  { %v4675_v62 = vadd.f32 %v3132_v26, %v3020_v19 }
 0x138   :  { %v3046_v1 = vpop.f32.mrf.mxu0  ;;  %v3134_v2 = vpop.f32.mrf.mxu1 }
 0x139   :  { %v3047_v5 = vadd.f32 %v3046_v1, %v3045_v30  ;;  %v3135_v4 = vadd.f32 %v3134_v2, %v3133_v61 }
 0x13a   :  { %v3048_v48 = vpop.f32.mrf.mxu0  ;;  %v3136_v12 = vpop.f32.mrf.mxu1 }
 0x13b   :  { %v4678_v36 = vadd.f32 %v3135_v4, %v3023_v3 }
 0x13c   :  { %v3049_v13 = vpop.f32.mrf.mxu0  ;;  %v3137_v38 = vpop.f32.mrf.mxu1 }
 0x13d   :  { %v3050_v40 = vadd.f32 %v3049_v13, %v3048_v48  ;;  %v3138_v56 = vadd.f32 %v3137_v38, %v3136_v12 }
 0x13e   :  { %v3051_v18 = vpop.f32.mrf.mxu0  ;;  %v3139_v20 = vpop.f32.mrf.mxu1 }
 0x13f   :  { %v4681_v28 = vadd.f32 %v3138_v56, %v4655_v42 }
 0x140   :  { %v3052_v19 = vpop.f32.mrf.mxu0  ;;  %v3140_v29 = vpop.f32.mrf.mxu1 }
 0x141   :  { %v3053_v21 = vadd.f32 %v3052_v19, %v3051_v18  ;;  %v3141_v6 = vadd.f32 %v3140_v29, %v3139_v20 }
 0x142   :  { %v3142_v46 = vpop.f32.mrf.mxu1  ;;  %v3206_v8 = vpop.f32.mrf.mxu0 }
 0x143   :  { %v4684_v34 = vadd.f32 %v3141_v6, %v3029_v32 }
 0x144   :  { %v3143_v52 = vpop.f32.mrf.mxu1  ;;  %v3207_v55 = vpop.f32.mrf.mxu0 }
 0x145   :  { %v3144_v43 = vadd.f32 %v3143_v52, %v3142_v46  ;;  %v3208_v53 = vadd.f32 %v3207_v55, %v3206_v8 }
 0x146   :  { %v3145_v58 = vpop.f32.mrf.mxu1  ;;  %v4686_v26 = vpop.f32.mrf.mxu0 }
 0x147   :  { %v4689_v42 = vadd.f32 %v3144_v43, %v4663_v0  ;;  %v4692_v30 = vadd.f32 %v3208_v53, %v4637_v54 }
 0x148   :  { %v3146_v44 = vpop.f32.mrf.mxu1  ;;  %v4694_v24 = vpop.f32.mrf.mxu0 }
 0x149   :  { %v3147_v61 = vadd.f32 %v3146_v44, %v3145_v58 }
 0x14a   :  { %v3148_v1 = vpop.f32.mrf.mxu1  ;;  %v4696_v2 = vpop.f32.mrf.mxu0 }
 0x14b   :  { %v4699_v3 = vadd.f32 %v3147_v61, %v4667_v50 }
 0x14c   :  { %v3149_v4 = vpop.f32.mrf.mxu1  ;;  %v4701_v48 = vpop.f32.mrf.mxu0 }
 0x14d   :  { %v3150_v12 = vadd.f32 %v3149_v4, %v3148_v1 }
 0x14e   :  { %v3151_v13 = vpop.f32.mrf.mxu1  ;;  %v4703_v0 = vpop.f32.mrf.mxu0 }
 0x14f   :  { %v4705_v38 = vadd.f32 %v3150_v12, %v3038_v22 }
 0x150   :  { %v3152_v54 = vpop.f32.mrf.mxu1  ;;  %v4707_v56 = vpop.f32.mrf.mxu0 }
 0x151   :  { %6213 = vst [vmem:[#allocation2_spill] sm:$0xff] %v4705_v38  ;;  %v3153_v18 = vadd.f32 %v3152_v54, %v3151_v13 }
 0x152   :  { %v3154_v20 = vpop.f32.mrf.mxu1  ;;  %v4709_v19 = vpop.f32.mrf.mxu0 }
 0x153   :  { %v4711_v29 = vadd.f32 %v3153_v18, %v3041_v35 }
 0x154   :  { %v3155_v50 = vpop.f32.mrf.mxu1  ;;  %v4713_v32 = vpop.f32.mrf.mxu0 }
 0x155   :  { %6214 = vst [vmem:[#allocation3_spill] sm:$0xff] %v4711_v29  ;;  %v3156_v6 = vadd.f32 %v3155_v50, %v3154_v20 }
 0x156   :  { %v3157_v46 = vpop.f32.mrf.mxu1  ;;  %v4715_v8 = vpop.f32.mrf.mxu0 }
 0x157   :  { %v4717_v52 = vadd.f32 %v3156_v6, %v3044_v59 }
 0x158   :  { %v3158_v22 = vpop.f32.mrf.mxu1  ;;  %v4719_v55 = vpop.f32.mrf.mxu0 }
 0x159   :  { %6215 = vst [vmem:[#allocation4_spill] sm:$0xff] %v4717_v52  ;;  %v3159_v43 = vadd.f32 %v3158_v22, %v3157_v46 }
 0x15a   :  { %v3160_v53 = vpop.f32.mrf.mxu1  ;;  %v4721_v58 = vpop.f32.mrf.mxu0 }
 0x15b   :  { %v4723_v44 = vadd.f32 %v3159_v43, %v3047_v5 }
 0x15c   :  { %v3161_v35 = vpop.f32.mrf.mxu1  ;;  %v4725_v61 = vpop.f32.mrf.mxu0 }
 0x15d   :  { %6216 = vst [vmem:[#allocation5_spill] sm:$0xff] %v4723_v44  ;;  %v3162_v1 = vadd.f32 %v3161_v35, %v3160_v53 }
 0x15e   :  { %v3163_v4 = vpop.f32.mrf.mxu1  ;;  %v4727_v12 = vpop.f32.mrf.mxu0 }
 0x15f   :  { %v4729_v13 = vadd.f32 %v3162_v1, %v3050_v40 }
 0x160   :  { %v3164_v59 = vpop.f32.mrf.mxu1  ;;  %v4731_v54 = vpop.f32.mrf.mxu0 }
 0x161   :  { %6217 = vst [vmem:[#allocation6_spill] sm:$0xff] %v4729_v13  ;;  %v3165_v18 = vadd.f32 %v3164_v59, %v3163_v4  ;;  %v3059_v4 = vadd.f32 %v4571_v57, %v4567_v51  ;;  %v3065_v51 = vadd.f32 %v4607_v15, %v4605_v9  ;;  %v3071_v9 = vadd.f32 %v4627_v31, %v4625_v27 }
 0x162   :  { %v3166_v20 = vpop.f32.mrf.mxu1  ;;  %v4733_v50 = vpop.f32.mrf.mxu0  ;;  %v3077_v27 = vadd.f32 %v4634_v41, %v4632_v39  ;;  %v3217_v39 = vadd.f32 %v4707_v56, %v4703_v0  ;;  %v3223_v0 = vadd.f32 %v4719_v55, %v4715_v8 }
 0x163   :  { %v4735_v6 = vadd.f32 %v3165_v18, %v3053_v21 }
 0x164   :  { %v3167_v5 = vpop.f32.mrf.mxu1  ;;  %v4737_v46 = vpop.f32.mrf.mxu0  ;;  %v1186_v56 = vadd.f32 %v3217_v39, %v4647_v16  ;;  %v3229_v16 = vadd.f32 %v4731_v54, %v4727_v12 }
 0x165   :  { %6218 = vst [vmem:[#allocation7_spill] sm:$0xff] %v4735_v6  ;;  %v3168_v22 = vadd.f32 %v3167_v5, %v3166_v20 }
 0x166   :  { %v3169_v43 = vpop.f32.mrf.mxu1  ;;  %v4739_v53 = vpop.f32.mrf.mxu0 }
 0x167   :  { %v4742_v35 = vadd.f32 %v3168_v22, %v4563_v49 }
 0x168   :  { %v3170_v40 = vpop.f32.mrf.mxu1  ;;  %v4744_v1 = vpop.f32.mrf.mxu0 }
 0x169   :  { %6219 = vst [vmem:[#allocation8_spill] sm:$0xff] %v4742_v35  ;;  %v3171_v59 = vadd.f32 %v3170_v40, %v3169_v43  ;;  %v3235_v54 = vadd.f32 %v4744_v1, %v4739_v53 }
 0x16a   :  { %v3172_v13 = vpop.f32.mrf.mxu1  ;;  %v4748_v21 = vpop.f32.mrf.mxu0 }
 0x16b   :  { %v4750_v18 = vadd.f32 %v3171_v59, %v3059_v4 }
 0x16c   :  { %v3173_v6 = vpop.f32.mrf.mxu1  ;;  %v4752_v20 = vpop.f32.mrf.mxu0 }
 0x16d   :  { %6220 = vst [vmem:[#allocation9_spill] sm:$0xff] %v4750_v18  ;;  %v3174_v5 = vadd.f32 %v3173_v6, %v3172_v13 }
 0x16e   :  { %v3175_v44 = vpop.f32.mrf.mxu1  ;;  %v4754_v52 = vpop.f32.mrf.mxu0 }
 0x16f   :  { %v4757_v49 = vadd.f32 %v3174_v5, %v4601_v7 }
 0x170   :  { %v3176_v22 = vpop.f32.mrf.mxu1  ;;  %v4759_v35 = vpop.f32.mrf.mxu0 }
 0x171   :  { %6221 = vst [vmem:[#allocation10_spill] sm:$0xff] %v4757_v49  ;;  %v3177_v57 = vadd.f32 %v3176_v22, %v3175_v44  ;;  %v3241_v53 = vadd.f32 %v4759_v35, %v4754_v52 }
 0x172   :  { %v3178_v43 = vpop.f32.mrf.mxu1  ;;  %v4763_v40 = vpop.f32.mrf.mxu0 }
 0x173   :  { %v4765_v4 = vadd.f32 %v3177_v57, %v3065_v51 }
 0x174   :  { %v3179_v59 = vpop.f32.mrf.mxu1  ;;  %v4767_v13 = vpop.f32.mrf.mxu0 }
 0x175   :  { %6222 = vst [vmem:[#allocation11_spill] sm:$0xff] %v4765_v4  ;;  %v3180_v6 = vadd.f32 %v3179_v59, %v3178_v43 }
 0x176   :  { %v3181_v18 = vpop.f32.mrf.mxu1  ;;  %v4769_v29 = vpop.f32.mrf.mxu0 }
 0x177   :  { %v4772_v7 = vadd.f32 %v3180_v6, %v4623_v25 }
 0x178   :  { %v3182_v5 = vpop.f32.mrf.mxu1  ;;  %v4774_v49 = vpop.f32.mrf.mxu0 }
 0x179   :  { %6223 = vst [vmem:[#allocation12_spill] sm:$0xff] %v4772_v7  ;;  %v3183_v15 = vadd.f32 %v3182_v5, %v3181_v18  ;;  %v3247_v52 = vadd.f32 %v4774_v49, %v4769_v29 }
 0x17a   :  { %v3184_v44 = vpop.f32.mrf.mxu1  ;;  %v4778_v22 = vpop.f32.mrf.mxu0 }
 0x17b   :  { %v4780_v51 = vadd.f32 %v3183_v15, %v3071_v9  ;;  %v3211_v9 = vadd.f32 %v4694_v24, %v4686_v26  ;;  %v3220_v26 = vadd.f32 %v4713_v32, %v4709_v19 }
 0x17c   :  { %v3185_v57 = vpop.f32.mrf.mxu1  ;;  %v4782_v43 = vpop.f32.mrf.mxu0 }
 0x17d   :  { %6224 = vst [vmem:[#allocation13_spill] sm:$0xff] %v4780_v51  ;;  %v3186_v59 = vadd.f32 %v3185_v57, %v3184_v44  ;;  %v1178_v41 = vadd.f32 %v3211_v9, %v4641_v63 }
 0x17e   :  { %v3187_v4 = vpop.f32.mrf.mxu1  ;;  %v4784_v38 = vpop.f32.mrf.mxu0 }
 0x17f   :  { %v4787_v25 = vadd.f32 %v3186_v59, %v4630_v37  ;;  %v3214_v37 = vadd.f32 %v4701_v48, %v4696_v2 }
 0x180   :  { %v3188_v6 = vpop.f32.mrf.mxu1  ;;  %v4789_v7 = vpop.f32.mrf.mxu0 }
 0x181   :  { %v3189_v31 = vadd.f32 %v3188_v6, %v3187_v4  ;;  %v1183_v24 = vadd.f32 %v3214_v37, %v4644_v10  ;;  %v1191_v37 = vadd.f32 %v3220_v26, %v4651_v23  ;;  %v3253_v29 = vadd.f32 %v4789_v7, %v4784_v38 }
 0x182   :  { %v4793_v18 = vpop.f32.mrf.mxu0  ;;  %v3374_v5 = vpop.f32.mrf.mxu1 }
 0x183   :  { %v4797_v15 = vadd.f32 %v3189_v31, %v3077_v27  ;;  %v4822_v63 = vadd.f32 %v3374_v5, %v1183_v24 }
 0x184   :  { %v4799_v44 = vpop.f32.mrf.mxu0  ;;  %v1335_v57 = vpop.f32.mrf.mxu1 }
 0x185   :  { %v4814_v27 = vadd.f32 %v1335_v57, %v4692_v30  ;;  %v3226_v30 = vadd.f32 %v4725_v61, %v4721_v58  ;;  %v3232_v61 = vadd.f32 %v4737_v46, %v4733_v50 }
 0x186   :  { %v4803_v59 = vpop.f32.mrf.mxu0  ;;  %v3375_v51 = vpop.f32.mrf.mxu1 }
 0x187   :  { %v4831_v9 = vadd.f32 %v3375_v51, %v1186_v56  ;;  %v1199_v23 = vadd.f32 %v3226_v30, %v4659_v47  ;;  %v3238_v47 = vadd.f32 %v4752_v20, %v4748_v21  ;;  %v1207_v30 = vadd.f32 %v3232_v61, %v4665_v11 }
 0x188   :  { %v4808_v4 = vpop.f32.mrf.mxu0  ;;  %v1338_v6 = vpop.f32.mrf.mxu1  ;;  %v3244_v21 = vadd.f32 %v4767_v13, %v4763_v40 }
 0x189   :  { %v4816_v2 = vadd.f32 %v1338_v6, %v1178_v41  ;;  %v1194_v41 = vadd.f32 %v3223_v0, %v4653_v14  ;;  %v1202_v14 = vadd.f32 %v3229_v16, %v4661_v60  ;;  %v1215_v20 = vadd.f32 %v3238_v47, %v4671_v33 }
 0x18a   :  { %v4818_v48 = vpop.f32.mrf.mxu0  ;;  %v3378_v31 = vpop.f32.mrf.mxu1  ;;  %v3250_v33 = vadd.f32 %v4782_v43, %v4778_v22  ;;  %v3256_v22 = vadd.f32 %v4799_v44, %v4793_v18  ;;  %v3259_v38 = vadd.f32 %v4808_v4, %v4803_v59 }
 0x18b   :  { %v1464_v19 = vadd.f32 %v4816_v2, %v4814_v27  ;;  %v4855_v56 = vadd.f32 %v3378_v31, %v1199_v23  ;;  %v1210_v31 = vadd.f32 %v3235_v54, %v4669_v17  ;;  %v1218_v17 = vadd.f32 %v3241_v53, %v4673_v45 }
 0x18c   :  { %v4827_v32 = vpop.f32.mrf.mxu0  ;;  %v1351_v10 = vpop.f32.mrf.mxu1  ;;  %v1223_v54 = vadd.f32 %v3244_v21, %v4675_v62  ;;  %v1231_v43 = vadd.f32 %v3250_v33, %v4681_v28 }
 0x18d   :  { %v1465_v57 = vadd.f32 %v1464_v19, %v4822_v63  ;;  %v4839_v5 = vadd.f32 %v1351_v10, %v1191_v37  ;;  %v3262_v28 = vadd.f32 %v4827_v32, %v4818_v48  ;;  %v6225_v32 = vld [vmem:[#allocation2_spill] sm:$0xff] }
 0x18e   :  { %v4835_v8 = vpop.f32.mrf.mxu0  ;;  %v3379_v55 = vpop.f32.mrf.mxu1 }
 0x18f   :  { %v1466_v39 = vadd.f32 %v1465_v57, %v4831_v9  ;;  %v4861_v46 = vadd.f32 %v3379_v55, %v1202_v14 }
 0x190   :  { %v4843_v6 = vpop.f32.mrf.mxu0  ;;  %v1354_v58 = vpop.f32.mrf.mxu1 }
 0x191   :  { %v1467_v51 = vadd.f32 %v1466_v39, %v4839_v5  ;;  %v4849_v26 = vadd.f32 %v1354_v58, %v1194_v41  ;;  %v3265_v59 = vadd.f32 %v4843_v6, %v4835_v8  ;;  %v6226_v6 = vld [vmem:[#allocation3_spill] sm:$0xff] }
 0x192   :  { %v4851_v24 = vpop.f32.mrf.mxu0  ;;  %v3382_v12 = vpop.f32.mrf.mxu1 }
 0x193   :  { %v1468_v0 = vadd.f32 %v1467_v51, %v4849_v26  ;;  %v4879_v35 = vadd.f32 %v3382_v12, %v1215_v20  ;;  %v1226_v12 = vadd.f32 %v3247_v52, %v4678_v36  ;;  %v1234_v36 = vadd.f32 %v3253_v29, %v4684_v34 }
 0x194   :  { %v3267_v19 = vpop.f32.mrf.mxu0  ;;  %v1367_v50 = vpop.f32.mrf.mxu1 }
 0x195   :  { %v1469_v10 = vadd.f32 %v1468_v0, %v4855_v56  ;;  %v4867_v1 = vadd.f32 %v1367_v50, %v1207_v30  ;;  %v3268_v48 = vadd.f32 %v3267_v19, %v4851_v24  ;;  %v6227_v19 = vld [vmem:[#allocation4_spill] sm:$0xff] }
 0x196   :  { %v3269_v57 = vpop.f32.mrf.mxu0  ;;  %v3383_v37 = vpop.f32.mrf.mxu1 }
 0x197   :  { %v1470_v60 = vadd.f32 %v1469_v10, %v4861_v46  ;;  %v4885_v40 = vadd.f32 %v3383_v37, %v1218_v17  ;;  %v1247_v17 = vadd.f32 %v3262_v28, %v6225_v32  ;;  %v6229_v28 = vld [vmem:[#allocation6_spill] sm:$0xff] }
 0x198   :  { %v3270_v16 = vpop.f32.mrf.mxu0  ;;  %v1370_v39 = vpop.f32.mrf.mxu1 }
 0x199   :  { %v1471_v11 = vadd.f32 %v1470_v60, %v4867_v1  ;;  %v4875_v55 = vadd.f32 %v1370_v39, %v1210_v31  ;;  %v1239_v39 = vadd.f32 %v3256_v22, %v4689_v42 }
 0x19a   :  { %v3272_v41 = vpop.f32.mrf.mxu0  ;;  %v3386_v58 = vpop.f32.mrf.mxu1 }
 0x19b   :  { %v1472_v61 = vadd.f32 %v1471_v11, %v4875_v55  ;;  %v4903_v7 = vadd.f32 %v3386_v58, %v1231_v43  ;;  %v1242_v11 = vadd.f32 %v3259_v38, %v4699_v3 }
 0x19c   :  { %v3273_v23 = vpop.f32.mrf.mxu0  ;;  %v1383_v51 = vpop.f32.mrf.mxu1 }
 0x19d   :  { %v1473_v13 = vadd.f32 %v1472_v61, %v4879_v35  ;;  %v4891_v49 = vadd.f32 %v1383_v51, %v1223_v54  ;;  %v1250_v54 = vadd.f32 %v3265_v59, %v6226_v6 }
 0x19e   :  { %v3275_v14 = vpop.f32.mrf.mxu0  ;;  %v3387_v0 = vpop.f32.mrf.mxu1 }
 0x19f   :  { %v1474_v45 = vadd.f32 %v1473_v13, %v4885_v40  ;;  %v4909_v18 = vadd.f32 %v3387_v0, %v1234_v36  ;;  %v3271_v13 = vadd.f32 %v3270_v16, %v3269_v57  ;;  %v6228_v16 = vld [vmem:[#allocation5_spill] sm:$0xff] }
 0x1a0   :  { %v3276_v50 = vpop.f32.mrf.mxu0  ;;  %v1386_v47 = vpop.f32.mrf.mxu1 }
 0x1a1   :  { %v1475_v62 = vadd.f32 %v1474_v45, %v4891_v49  ;;  %v4899_v10 = vadd.f32 %v1386_v47, %v1226_v12  ;;  %v3274_v45 = vadd.f32 %v3273_v23, %v3272_v41  ;;  %v1255_v47 = vadd.f32 %v3268_v48, %v6227_v19 }
 0x1a2   :  { %v3278_v30 = vpop.f32.mrf.mxu0  ;;  %v3390_v37 = vpop.f32.mrf.mxu1 }
 0x1a3   :  { %v1476_v53 = vadd.f32 %v1475_v62, %v4899_v10  ;;  %v4924_v8 = vadd.f32 %v3390_v37, %v1247_v17  ;;  %v3277_v62 = vadd.f32 %v3276_v50, %v3275_v14  ;;  %v1258_v37 = vadd.f32 %v3271_v13, %v6228_v16  ;;  %v6230_v14 = vld [vmem:[#allocation7_spill] sm:$0xff] }
 0x1a4   :  { %v3279_v60 = vpop.f32.mrf.mxu0  ;;  %v1399_v31 = vpop.f32.mrf.mxu1  ;;  %v1263_v41 = vadd.f32 %v3274_v45, %v6229_v28  ;;  %v6234_v16 = vld [vmem:[#allocation11_spill] sm:$0xff] }
 0x1a5   :  { %v1477_v44 = vadd.f32 %v1476_v53, %v4903_v7  ;;  %v4915_v4 = vadd.f32 %v1399_v31, %v1239_v39  ;;  %v3280_v31 = vadd.f32 %v3279_v60, %v3278_v30  ;;  %v1266_v50 = vadd.f32 %v3277_v62, %v6230_v14  ;;  %v6231_v60 = vld [vmem:[#allocation8_spill] sm:$0xff] }
 0x1a6   :  { %v3281_v21 = vpop.f32.mrf.mxu0  ;;  %v3391_v20 = vpop.f32.mrf.mxu1  ;;  %v6235_v14 = vld [vmem:[#allocation12_spill] sm:$0xff] }
 0x1a7   :  { %v1478_v34 = vadd.f32 %v1477_v44, %v4909_v18  ;;  %v4928_v12 = vadd.f32 %v3391_v20, %v1250_v54 }
 0x1a8   :  { %v3282_v58 = vpop.f32.mrf.mxu0  ;;  %v1402_v52 = vpop.f32.mrf.mxu1 }
 0x1a9   :  { %v1479_v61 = vadd.f32 %v1478_v34, %v4915_v4  ;;  %v4922_v42 = vadd.f32 %v1402_v52, %v1242_v11  ;;  %v3283_v59 = vadd.f32 %v3282_v58, %v3281_v21  ;;  %v6232_v58 = vld [vmem:[#allocation9_spill] sm:$0xff] }
 0x1aa   :  { %v3284_v51 = vpop.f32.mrf.mxu0  ;;  %v3394_v33 = vpop.f32.mrf.mxu1 }
 0x1ab   :  { %v1480_v0 = vadd.f32 %v1479_v61, %v4922_v42  ;;  %v4940_v34 = vadd.f32 %v3394_v33, %v1263_v41  ;;  %v1271_v61 = vadd.f32 %v3280_v31, %v6231_v60  ;;  %v1274_v33 = vadd.f32 %v3283_v59, %v6232_v58  ;;  %v3567_v41 = vld [vmem:[%s6205_s4 + $0x30] sm:$0xff]  }
 0x1ac   :  { %v3285_v3 = vpop.f32.mrf.mxu0  ;;  %v1415_v29 = vpop.f32.mrf.mxu1 }
 0x1ad   :  { %v1481_v24 = vadd.f32 %v1480_v0, %v4924_v8  ;;  %v4932_v38 = vadd.f32 %v1415_v29, %v1255_v47  ;;  %v3286_v32 = vadd.f32 %v3285_v3, %v3284_v51  ;;  %v3566_v51 = vld [vmem:[%s6205_s4 + $0x38] sm:$0xff]   ;;  %v6233_v3 = vld [vmem:[#allocation10_spill] sm:$0xff] }
 0x1ae   :  { %v3287_v22 = vpop.f32.mrf.mxu0  ;;  %v3395_v43 = vpop.f32.mrf.mxu1  ;;  %3404 = vmatprep.subr.bf16.mxu1 %v3566_v51 }
 0x1af   :  { %v1482_v57 = vadd.f32 %v1481_v24, %v4928_v12  ;;  %v4944_v17 = vadd.f32 %v3395_v43, %v1266_v50  ;;  %v1279_v24 = vadd.f32 %v3286_v32, %v6233_v3  ;;  %3405 = vmatpush3.bf16.msra.mxu1 %v3566_v51 }
 0x1b0   :  { %v3288_v36 = vpop.f32.mrf.mxu0  ;;  %v1418_v53 = vpop.f32.mrf.mxu1  ;;  %3406 = vmatprep.subr.bf16.mxu1 %v3567_v41 }
 0x1b1   :  { %v1483_v23 = vadd.f32 %v1482_v57, %v4932_v38  ;;  %v4938_v44 = vadd.f32 %v1418_v53, %v1258_v37  ;;  %v3289_v54 = vadd.f32 %v3288_v36, %v3287_v22 }
 0x1b2   :  { %v3290_v39 = vpop.f32.mrf.mxu0  ;;  %v3398_v20 = vpop.f32.mrf.mxu1 }
 0x1b3   :  { %v1484_v11 = vadd.f32 %v1483_v23, %v4938_v44  ;;  %v4959_v57 = vadd.f32 %v3398_v20, %v1279_v24  ;;  %v1282_v37 = vadd.f32 %v3289_v54, %v6234_v16  ;;  %3407 = vmatpush3.bf16.msra.mxu1 %v3567_v41 }
 0x1b4   :  { %v3291_v52 = vpop.f32.mrf.mxu0  ;;  %v1431_v48 = vpop.f32.mrf.mxu1 }
 0x1b5   :  { %v1485_v30 = vadd.f32 %v1484_v11, %v4940_v34  ;;  %v4948_v0 = vadd.f32 %v1431_v48, %v1271_v61  ;;  %v3292_v19 = vadd.f32 %v3291_v52, %v3290_v39 }
 0x1b6   :  { %v3293_v13 = vpop.f32.mrf.mxu0  ;;  %v3399_v6 = vpop.f32.mrf.mxu1 }
 0x1b7   :  { %v1486_v21 = vadd.f32 %v1485_v30, %v4944_v17  ;;  %v4966_v23 = vadd.f32 %v3399_v6, %v1282_v37  ;;  %v1287_v20 = vadd.f32 %v3292_v19, %v6235_v14  ;;  %v6236_v30 = vld [vmem:[#allocation13_spill] sm:$0xff]  ;;  %v3568_v6 = vld [vmem:[%s6205_s4 + $0x28] sm:$0xff]  }
 0x1b8   :  { %v3294_v29 = vpop.f32.mrf.mxu0  ;;  %v1434_v45 = vpop.f32.mrf.mxu1  ;;  %3408 = vmatprep.subr.bf16.mxu1 %v3568_v6  ;;  %v3570_v19 = vld [vmem:[%s6205_s4 + $0x18] sm:$0xff]   ;;  %v3572_v37 = vld [vmem:[%s6205_s4 + $0x8] sm:$0xff]  }
 0x1b9   :  { %v1487_v47 = vadd.f32 %v1486_v21, %v4948_v0  ;;  %v4957_v43 = vadd.f32 %v1434_v45, %v1274_v33  ;;  %v3295_v36 = vadd.f32 %v3294_v29, %v3293_v13  ;;  %3409 = vmatpush3.bf16.msra.mxu1 %v3568_v6  ;;  %v3569_v45 = vld [vmem:[%s6205_s4 + $0x20] sm:$0xff]  }
 0x1ba   :  { %v3296_v22 = vpop.f32.mrf.mxu0  ;;  %v3402_v62 = vpop.f32.mrf.mxu1  ;;  %3410 = vmatprep.subr.bf16.mxu1 %v3569_v45 }
 0x1bb   :  { %v1488_v53 = vadd.f32 %v1487_v47, %v4957_v43  ;;  %v1290_v60 = vadd.f32 %v3295_v36, %v6236_v30 }
 0x1bc   :  { %v3297_v31 = vpop.f32.mrf.mxu0  ;;  %v1447_v28 = vpop.f32.mrf.mxu1 }
 0x1bd   :  { %v1489_v39 = vadd.f32 %v1488_v53, %v4959_v57  ;;  %v3298_v59 = vadd.f32 %v3297_v31, %v3296_v22  ;;  %v1448_v48 = vadd.f32 %v1447_v28, %v1287_v20  ;;  %3411 = vmatpush3.bf16.msra.mxu1 %v3569_v45  ;;  %v3573_v31 = vld [vmem:[%s6205_s4] sm:$0xff]  }
 0x1be   :  { %v3299_v50 = vpop.f32.mrf.mxu0  ;;  %v3403_v11 = vpop.f32.mrf.mxu1  ;;  %3412 = vmatprep.subr.bf16.mxu1 %v3570_v19 }
 0x1bf   :  { %v1295_v52 = vadd.f32 %v3298_v59, %v4787_v25  ;;  %v1490_v32 = vadd.f32 %v1489_v39, %v4966_v23 }
 0x1c0   :  { %v3300_v61 = vpop.f32.mrf.mxu0  ;;  %v1450_v13 = vpop.f32.mrf.mxu1 }
 0x1c1   :  { %v1491_v54 = vadd.f32 %v1490_v32, %v1448_v48  ;;  %v3301_v21 = vadd.f32 %v3300_v61, %v3299_v50  ;;  %v1451_v58 = vadd.f32 %v1450_v13, %v1290_v60  ;;  %v1456_v33 = vadd.f32 %v3402_v62, %v1295_v52  ;;  %3413 = vmatpush3.bf16.msra.mxu1 %v3570_v19 }
 0x1c3   :  { %v1298_v29 = vadd.f32 %v3301_v21, %v4797_v15  ;;  %v1492_v25 = vadd.f32 %v1491_v54, %v1451_v58  ;;  %v3571_v15 = vld [vmem:[%s6205_s4 + $0x10] sm:$0xff]  }
 0x1c4   :  { %3414 = vmatprep.subr.bf16.mxu1 %v3571_v15 }
 0x1c5   :  { %v1459_v51 = vadd.f32 %v3403_v11, %v1298_v29  ;;  %v1493_v3 = vadd.f32 %v1492_v25, %v1456_v33  ;;  %3415 = vmatpush3.bf16.msra.mxu1 %v3571_v15 }
 0x1c6   :  { %3416 = vmatprep.subr.bf16.mxu1 %v3572_v37 }
 0x1c7   :  { %v1494_v24 = vadd.f32 %v1493_v3, %v1459_v51 }
 0x1c9   :  { %v1495_v47 = vrot.slane %v1494_v24, 4  ;;  %3417 = vmatpush3.bf16.msra.mxu1 %v3572_v37 }
 0x1ca   :  { %3418 = vmatprep.subr.bf16.mxu1 %v3573_v31 }
 0x1cb   :  { %v1496_v22 = vadd.f32 %v1495_v47, %v1494_v24 }
 0x1cd   :  { %v1497_v62 = vrot.slane %v1496_v22, 2  ;;  %3419 = vmatpush3.bf16.msra.mxu1 %v3573_v31 }
 0x1cf   :  { %v1498_v16 = vadd.f32 %v1497_v62, %v1496_v22 }
 0x1d1   :  { %v1499_v36 = vrot.slane %v1498_v16, 1 }
 0x1d3   :  { %v1500_v53 = vadd.f32 %v1499_v36, %v1498_v16 }
 0x1d5   :  { %v1502_v28 = vmul.f32 0.00390625, %v1500_v53 }
 0x1d7   :  { %v4993_v41 = vsub.f32 %v4867_v1, %v1502_v28  ;;  %v4996_v39 = vsub.f32 %v4875_v55, %v1502_v28  ;;  %v4999_v59 = vsub.f32 %v4879_v35, %v1502_v28  ;;  %v5002_v14 = vsub.f32 %v4885_v40, %v1502_v28 }
 0x1d8   :  { %v5005_v20 = vsub.f32 %v4891_v49, %v1502_v28  ;;  %v5008_v50 = vsub.f32 %v4899_v10, %v1502_v28  ;;  %v5011_v11 = vsub.f32 %v4903_v7, %v1502_v28  ;;  %v5014_v1 = vsub.f32 %v4909_v18, %v1502_v28 }
 0x1d9   :  { %v5017_v55 = vsub.f32 %v4915_v4, %v1502_v28  ;;  %v5020_v35 = vsub.f32 %v4922_v42, %v1502_v28  ;;  %v5023_v40 = vsub.f32 %v4924_v8, %v1502_v28  ;;  %v5026_v49 = vsub.f32 %v4928_v12, %v1502_v28 }
 0x1da   :  { %v5029_v10 = vsub.f32 %v4932_v38, %v1502_v28  ;;  %v5032_v7 = vsub.f32 %v4938_v44, %v1502_v28  ;;  %v5035_v18 = vsub.f32 %v4940_v34, %v1502_v28  ;;  %v5038_v4 = vsub.f32 %v4944_v17, %v1502_v28 }
 0x1db   :  { %v5041_v42 = vsub.f32 %v4948_v0, %v1502_v28  ;;  %v5044_v8 = vsub.f32 %v4957_v43, %v1502_v28  ;;  %v5047_v12 = vsub.f32 %v4959_v57, %v1502_v28  ;;  %v5050_v38 = vsub.f32 %v4966_v23, %v1502_v28 }
 0x1dc   :  { %v5052_v44 = vsub.f32 %v1448_v48, %v1502_v28  ;;  %v5054_v52 = vsub.f32 %v1451_v58, %v1502_v28  ;;  %v5056_v34 = vsub.f32 %v1456_v33, %v1502_v28  ;;  %v5058_v17 = vsub.f32 %v1459_v51, %v1502_v28 }
 0x1dd   :  { %v5061_v0 = vsub.f32 %v4814_v27, %v1502_v28  ;;  %v5064_v43 = vsub.f32 %v4816_v2, %v1502_v28  ;;  %v5067_v57 = vsub.f32 %v4822_v63, %v1502_v28  ;;  %v5074_v32 = vsub.f32 %v4831_v9, %v1502_v28 }
 0x1de   :  { %v5077_v30 = vsub.f32 %v4839_v5, %v1502_v28  ;;  %v5082_v60 = vsub.f32 %v4849_v26, %v1502_v28  ;;  %v5087_v13 = vsub.f32 %v4855_v56, %v1502_v28  ;;  %v5092_v5 = vsub.f32 %v4861_v46, %v1502_v28 }
 0x1df   :  { %v1535_v23 = vmul.f32 %v5061_v0, %v5061_v0  ;;  %v1536_v48 = vmul.f32 %v5064_v43, %v5064_v43  ;;  %v1537_v27 = vmul.f32 %v5067_v57, %v5067_v57  ;;  %v1538_v63 = vmul.f32 %v5074_v32, %v5074_v32 }
 0x1e0   :  { %v1539_v9 = vmul.f32 %v5077_v30, %v5077_v30  ;;  %v1540_v54 = vmul.f32 %v5082_v60, %v5082_v60  ;;  %v1541_v26 = vmul.f32 %v5087_v13, %v5087_v13  ;;  %v1542_v33 = vmul.f32 %v5092_v5, %v5092_v5 }
 0x1e1   :  { %v1567_v2 = vadd.f32 %v1536_v48, %v1535_v23  ;;  %v1543_v29 = vmul.f32 %v4993_v41, %v4993_v41  ;;  %v1544_v46 = vmul.f32 %v4996_v39, %v4996_v39  ;;  %v1545_v51 = vmul.f32 %v4999_v59, %v4999_v59 }
 0x1e2   :  { %v1546_v24 = vmul.f32 %v5002_v14, %v5002_v14  ;;  %v1547_v47 = vmul.f32 %v5005_v20, %v5005_v20  ;;  %v1548_v15 = vmul.f32 %v5008_v50, %v5008_v50  ;;  %v1549_v16 = vmul.f32 %v5011_v11, %v5011_v11 }
 0x1e3   :  { %v1568_v61 = vadd.f32 %v1567_v2, %v1537_v27  ;;  %v1550_v36 = vmul.f32 %v5014_v1, %v5014_v1  ;;  %v1551_v31 = vmul.f32 %v5017_v55, %v5017_v55  ;;  %v1552_v23 = vmul.f32 %v5020_v35, %v5020_v35 }
 0x1e4   :  { %v1553_v27 = vmul.f32 %v5023_v40, %v5023_v40 }
 0x1e5   :  { %v1569_v6 = vadd.f32 %v1568_v61, %v1538_v63  ;;  %v1554_v63 = vmul.f32 %v5026_v49, %v5026_v49 }
 0x1e7   :  { %v1570_v21 = vadd.f32 %v1569_v6, %v1539_v9  ;;  %v1555_v9 = vmul.f32 %v5029_v10, %v5029_v10 }
 0x1e9   :  { %v1571_v58 = vadd.f32 %v1570_v21, %v1540_v54  ;;  %v1556_v54 = vmul.f32 %v5032_v7, %v5032_v7 }
 0x1eb   :  { %v1572_v56 = vadd.f32 %v1571_v58, %v1541_v26  ;;  %v1557_v26 = vmul.f32 %v5035_v18, %v5035_v18 }
 0x1ed   :  { %v1573_v25 = vadd.f32 %v1572_v56, %v1542_v33  ;;  %v1558_v33 = vmul.f32 %v5038_v4, %v5038_v4 }
 0x1ef   :  { %v1574_v45 = vadd.f32 %v1573_v25, %v1543_v29  ;;  %v1559_v29 = vmul.f32 %v5041_v42, %v5041_v42 }
 0x1f1   :  { %v1575_v3 = vadd.f32 %v1574_v45, %v1544_v46  ;;  %v1560_v46 = vmul.f32 %v5044_v8, %v5044_v8 }
 0x1f3   :  { %v1576_v19 = vadd.f32 %v1575_v3, %v1545_v51  ;;  %v1561_v51 = vmul.f32 %v5047_v12, %v5047_v12 }
 0x1f5   :  { %v1577_v22 = vadd.f32 %v1576_v19, %v1546_v24  ;;  %v1562_v24 = vmul.f32 %v5050_v38, %v5050_v38 }
 0x1f7   :  { %v1578_v62 = vadd.f32 %v1577_v22, %v1547_v47  ;;  %v1563_v47 = vmul.f32 %v5052_v44, %v5052_v44 }
 0x1f9   :  { %v1579_v37 = vadd.f32 %v1578_v62, %v1548_v15  ;;  %v1564_v15 = vmul.f32 %v5054_v52, %v5054_v52 }
 0x1fb   :  { %v1580_v53 = vadd.f32 %v1579_v37, %v1549_v16  ;;  %v1565_v16 = vmul.f32 %v5056_v34, %v5056_v34 }
 0x1fd   :  { %v1581_v28 = vadd.f32 %v1580_v53, %v1550_v36  ;;  %v1566_v36 = vmul.f32 %v5058_v17, %v5058_v17 }
 0x1ff   :  { %v1582_v48 = vadd.f32 %v1581_v28, %v1551_v31 }
 0x201   :  { %v1583_v2 = vadd.f32 %v1582_v48, %v1552_v23 }
 0x203   :  { %v1584_v61 = vadd.f32 %v1583_v2, %v1553_v27 }
 0x205   :  { %v1585_v6 = vadd.f32 %v1584_v61, %v1554_v63 }
 0x207   :  { %v1586_v21 = vadd.f32 %v1585_v6, %v1555_v9  ;;  %v1609_v6 = vlaneseq }
 0x209   :  { %v1587_v58 = vadd.f32 %v1586_v21, %v1556_v54  ;;  %v5149_v54 = vshrl.u32 %v1609_v6, 7 }
 0x20b   :  { %v1588_v56 = vadd.f32 %v1587_v58, %v1557_v26  ;;  %v1462_v26 = vld [vmem:[%s6206_s2] sm:$0x1] }
 0x20d   :  { %v1589_v25 = vadd.f32 %v1588_v56, %v1558_v33  ;;  %v1611_v33 = vsub.s32 0, %v5149_v54 }
 0x20f   :  { %v1590_v45 = vadd.f32 %v1589_v25, %v1559_v29 }
 0x211   :  { %v1591_v3 = vadd.f32 %v1590_v45, %v1560_v46  ;;  %v5166_v46 = vld [vmem:[%s6207_s3] ss:$0 sm:$0xff] }
 0x213   :  { %v1592_v19 = vadd.f32 %v1591_v3, %v1561_v51 }
 0x215   :  { %v1593_v22 = vadd.f32 %v1592_v19, %v1562_v24 }
 0x217   :  { %v1594_v62 = vadd.f32 %v1593_v22, %v1563_v47 }
 0x219   :  { %v1595_v37 = vadd.f32 %v1594_v62, %v1564_v15 }
 0x21b   :  { %v1596_v53 = vadd.f32 %v1595_v37, %v1565_v16 }
 0x21d   :  { %v1597_v31 = vadd.f32 %v1596_v53, %v1566_v36 }
 0x21f   :  { %v1598_v28 = vrot.slane %v1597_v31, 4 }
 0x221   :  { %v1599_v23 = vadd.f32 %v1598_v28, %v1597_v31 }
 0x223   :  { %v1600_v48 = vrot.slane %v1599_v23, 2 }
 0x225   :  { %v1601_v27 = vadd.f32 %v1600_v48, %v1599_v23 }
 0x227   :  { %v1602_v2 = vrot.slane %v1601_v27, 1 }
 0x229   :  { %v1603_v63 = vadd.f32 %v1602_v2, %v1601_v27 }
 0x22b   :  { %v1604_v61 = vmul.f32 0.00390625, %v1603_v63 }
 0x22d   :  { %v1605_v9 = vadd.f32 1e-05, %v1604_v61 }
 0x22f   :  { %3582 = vrsqrt.f32 %v1605_v9 }
 0x23c   :  { %v3583_v21 = vpop.eup %3582 }
 0x23d   :  { %v1607_v58 = vmul.f32 %v3583_v21, %v1462_v26 }
 0x23f   :  { %v5157_v56 = vrot.slane %v1607_v58, %v1611_v33 }
 0x241   :  { %v1616_v29 = vmul.f32 %v5157_v56, %v5067_v57  ;;  %v1617_v25 = vmul.f32 %v5157_v56, %v5074_v32  ;;  %v1614_v3 = vmul.f32 %v5157_v56, %v5061_v0  ;;  %v1615_v24 = vmul.f32 %v5157_v56, %v5064_v43 }
 0x242   :  { %v1618_v57 = vmul.f32 %v5157_v56, %v5077_v30  ;;  %v1619_v32 = vmul.f32 %v5157_v56, %v5082_v60  ;;  %v1620_v0 = vmul.f32 %v5157_v56, %v5087_v13  ;;  %v1621_v43 = vmul.f32 %v5157_v56, %v5092_v5 }
 0x243   :  { %v1654_v45 = vadd.f32 %v5166_v46, %v1616_v29  ;;  %v1655_v51 = vadd.f32 %v5166_v46, %v1617_v25  ;;  %v1652_v22 = vadd.f32 %v5166_v46, %v1614_v3  ;;  %v1653_v15 = vadd.f32 %v5166_v46, %v1615_v24 }
 0x244   :  { %v1656_v62 = vadd.f32 %v5166_v46, %v1618_v57  ;;  %v1622_v30 = vmul.f32 %v5157_v56, %v4993_v41  ;;  %v1657_v16 = vadd.f32 %v5166_v46, %v1619_v32  ;;  %v1623_v60 = vmul.f32 %v5157_v56, %v4996_v39 }
 0x245   :  { %v1686_v19 = vmax.f32 %v1654_v45, 0.0  ;;  %v1687_v47 = vmax.f32 %v1655_v51, 0.0  ;;  %v1684_v37 = vmax.f32 %v1652_v22, 0.0  ;;  %v1685_v36 = vmax.f32 %v1653_v15, 0.0 }
 0x246   :  { %v1688_v53 = vmax.f32 %v1656_v62, 0.0  ;;  %v1689_v28 = vmax.f32 %v1657_v16, 0.0  ;;  %v1658_v48 = vadd.f32 %v5166_v46, %v1620_v0  ;;  %v1659_v13 = vadd.f32 %v5166_v46, %v1621_v43 }
 0x247   :  { %v1717_v31 = vpack.c.bf16 %v1687_v47, %v1686_v19  ;;  %v1716_v23 = vpack.c.bf16 %v1685_v36, %v1684_v37  ;;  %v1660_v27 = vadd.f32 %v5166_v46, %v1622_v30  ;;  %v1661_v41 = vadd.f32 %v5166_v46, %v1623_v60 }
 0x248   :  { %v1718_v5 = vpack.c.bf16 %v1689_v28, %v1688_v53  ;;  %v1624_v39 = vmul.f32 %v5157_v56, %v4999_v59  ;;  %v1625_v2 = vmul.f32 %v5157_v56, %v5002_v14  ;;  %v1690_v63 = vmax.f32 %v1658_v48, 0.0 }
 0x249   :  { %3420 = vmatprep.mubr.bf16.mxu1 %v1716_v23  ;;  %v1691_v61 = vmax.f32 %v1659_v13, 0.0  ;;  %v1626_v9 = vmul.f32 %v5157_v56, %v5005_v20  ;;  %v1627_v21 = vmul.f32 %v5157_v56, %v5008_v50  ;;  %v1692_v26 = vmax.f32 %v1660_v27, 0.0 }
 0x24a   :  { %3421 = vmatmul.mubr.bf16.vlgmr.msra.gmra.mxu1 %v1717_v31  ;;  %v1693_v58 = vmax.f32 %v1661_v41, 0.0  ;;  %v1662_v29 = vadd.f32 %v5166_v46, %v1624_v39  ;;  %v1663_v25 = vadd.f32 %v5166_v46, %v1625_v2  ;;  %v1628_v20 = vmul.f32 %v5157_v56, %v5011_v11 }
 0x24b   :  { %3424 = vmatprep.mubr.bf16.mxu1 %v1718_v5  ;;  %v1719_v45 = vpack.c.bf16 %v1691_v61, %v1690_v63  ;;  %v1664_v59 = vadd.f32 %v5166_v46, %v1626_v9  ;;  %v1665_v14 = vadd.f32 %v5166_v46, %v1627_v21  ;;  %v1629_v50 = vmul.f32 %v5157_v56, %v5014_v1 }
 0x24c   :  { %v1720_v51 = vpack.c.bf16 %v1693_v58, %v1692_v26  ;;  %v1694_v3 = vmax.f32 %v1662_v29, 0.0  ;;  %v1695_v24 = vmax.f32 %v1663_v25, 0.0  ;;  %v1630_v57 = vmul.f32 %v5157_v56, %v5017_v55 }
 0x24d   :  { %v1631_v32 = vmul.f32 %v5157_v56, %v5020_v35  ;;  %v1696_v19 = vmax.f32 %v1664_v59, 0.0  ;;  %v1697_v47 = vmax.f32 %v1665_v14, 0.0  ;;  %v1666_v22 = vadd.f32 %v5166_v46, %v1628_v20 }
 0x24e   :  { %v1667_v15 = vadd.f32 %v5166_v46, %v1629_v50  ;;  %v1721_v62 = vpack.c.bf16 %v1695_v24, %v1694_v3  ;;  %v1668_v11 = vadd.f32 %v5166_v46, %v1630_v57  ;;  %v1632_v55 = vmul.f32 %v5157_v56, %v5023_v40 }
 0x24f   :  { %v1722_v0 = vpack.c.bf16 %v1697_v47, %v1696_v19  ;;  %v1669_v1 = vadd.f32 %v5166_v46, %v1631_v32  ;;  %v1633_v35 = vmul.f32 %v5157_v56, %v5026_v49  ;;  %v1698_v43 = vmax.f32 %v1666_v22, 0.0 }
 0x250   :  { %v1699_v30 = vmax.f32 %v1667_v15, 0.0  ;;  %v1634_v16 = vmul.f32 %v5157_v56, %v5029_v10  ;;  %v1635_v60 = vmul.f32 %v5157_v56, %v5032_v7  ;;  %v1700_v37 = vmax.f32 %v1668_v11, 0.0 }
 0x251   :  { %v1701_v36 = vmax.f32 %v1669_v1, 0.0  ;;  %v1670_v53 = vadd.f32 %v5166_v46, %v1632_v55  ;;  %v1671_v31 = vadd.f32 %v5166_v46, %v1633_v35  ;;  %v1636_v10 = vmul.f32 %v5157_v56, %v5035_v18 }
 0x252   :  { %3425 = vmatmul.mubr.bf16.gmra.mxu1 %v1719_v45  ;;  %v1723_v28 = vpack.c.bf16 %v1699_v30, %v1698_v43  ;;  %v1672_v40 = vadd.f32 %v5166_v46, %v1634_v16  ;;  %v1673_v49 = vadd.f32 %v5166_v46, %v1635_v60  ;;  %v1637_v7 = vmul.f32 %v5157_v56, %v5038_v4 }
 0x253   :  { %3428 = vmatprep.mubr.bf16.mxu1 %v1720_v51  ;;  %v1724_v23 = vpack.c.bf16 %v1701_v36, %v1700_v37  ;;  %v1702_v48 = vmax.f32 %v1670_v53, 0.0  ;;  %v1703_v13 = vmax.f32 %v1671_v31, 0.0  ;;  %v1638_v5 = vmul.f32 %v5157_v56, %v5041_v42 }
 0x254   :  { %v1639_v27 = vmul.f32 %v5157_v56, %v5044_v8  ;;  %v1704_v41 = vmax.f32 %v1672_v40, 0.0  ;;  %v1705_v39 = vmax.f32 %v1673_v49, 0.0  ;;  %v1674_v2 = vadd.f32 %v5166_v46, %v1636_v10 }
 0x255   :  { %v1675_v63 = vadd.f32 %v5166_v46, %v1637_v7  ;;  %v1725_v61 = vpack.c.bf16 %v1703_v13, %v1702_v48  ;;  %v1676_v18 = vadd.f32 %v5166_v46, %v1638_v5  ;;  %v1640_v42 = vmul.f32 %v5157_v56, %v5047_v12 }
 0x256   :  { %v1726_v9 = vpack.c.bf16 %v1705_v39, %v1704_v41  ;;  %v1677_v4 = vadd.f32 %v5166_v46, %v1639_v27  ;;  %v1641_v8 = vmul.f32 %v5157_v56, %v5050_v38  ;;  %v1706_v21 = vmax.f32 %v1674_v2, 0.0 }
 0x257   :  { %v1707_v26 = vmax.f32 %v1675_v63, 0.0  ;;  %v1643_v58 = vmul.f32 %v5157_v56, %v5054_v52  ;;  %v1642_v29 = vmul.f32 %v5157_v56, %v5052_v44  ;;  %v1708_v25 = vmax.f32 %v1676_v18, 0.0 }
 0x258   :  { %v1709_v45 = vmax.f32 %v1677_v4, 0.0  ;;  %v1678_v51 = vadd.f32 %v5166_v46, %v1640_v42  ;;  %v1679_v59 = vadd.f32 %v5166_v46, %v1641_v8  ;;  %v1644_v52 = vmul.f32 %v5157_v56, %v5056_v34 }
 0x259   :  { %v1727_v14 = vpack.c.bf16 %v1707_v26, %v1706_v21  ;;  %v1680_v12 = vadd.f32 %v5166_v46, %v1642_v29  ;;  %v1681_v38 = vadd.f32 %v5166_v46, %v1643_v58  ;;  %v1645_v44 = vmul.f32 %v5157_v56, %v5058_v17 }
 0x25a   :  { %3429 = vmatmul.mubr.bf16.gmra.mxu1 %v1721_v62  ;;  %v1728_v20 = vpack.c.bf16 %v1709_v45, %v1708_v25  ;;  %v1710_v50 = vmax.f32 %v1678_v51, 0.0  ;;  %v1711_v3 = vmax.f32 %v1679_v59, 0.0  ;;  %v1682_v19 = vadd.f32 %v5166_v46, %v1644_v52 }
 0x25b   :  { %3432 = vmatprep.mubr.bf16.mxu1 %v1722_v0  ;;  %v1712_v24 = vmax.f32 %v1680_v12, 0.0  ;;  %v1713_v57 = vmax.f32 %v1681_v38, 0.0  ;;  %v1683_v47 = vadd.f32 %v5166_v46, %v1645_v44 }
 0x25c   :  { %v1729_v32 = vpack.c.bf16 %v1711_v3, %v1710_v50  ;;  %v1714_v15 = vmax.f32 %v1682_v19, 0.0 }
 0x25d   :  { %v1730_v22 = vpack.c.bf16 %v1713_v57, %v1712_v24  ;;  %v1715_v62 = vmax.f32 %v1683_v47, 0.0  ;;  %v3574_v47 = vld [vmem:[%s6208_s7 + $0x38] sm:$0xff]  }
 0x25e   :  { %3452 = vmatprep.subr.bf16.mxu0 %v3574_v47 }
 0x25f   :  { %v1731_v0 = vpack.c.bf16 %v1715_v62, %v1714_v15  ;;  %3453 = vmatpush3.bf16.msra.mxu0 %v3574_v47 }
 0x262   :  { %3433 = vmatmul.mubr.bf16.gmra.mxu1 %v1723_v28 }
 0x263   :  { %3436 = vmatprep.mubr.bf16.mxu1 %v1724_v23 }
 0x26a   :  { %3437 = vmatmul.mubr.bf16.gmra.mxu1 %v1725_v61 }
 0x26b   :  { %3440 = vmatprep.mubr.bf16.mxu1 %v1726_v9 }
 0x272   :  { %3441 = vmatmul.mubr.bf16.gmra.mxu1 %v1727_v14 }
 0x273   :  { %3444 = vmatprep.mubr.bf16.mxu1 %v1728_v20 }
 0x27a   :  { %3445 = vmatmul.mubr.bf16.gmra.mxu1 %v1729_v32 }
 0x27b   :  { %3448 = vmatprep.mubr.bf16.mxu1 %v1730_v22 }
 0x282   :  { %3449 = vmatmul.mubr.bf16.gmra.mxu1 %v1731_v0 }
 0x30a   :  { %v5260_v34 = vpop.f32.mrf.mxu1 }
 0x30c   :  { %v5262_v11 = vpop.f32.mrf.mxu1 }
 0x30e   :  { %v5264_v17 = vpop.f32.mrf.mxu1 }
 0x310   :  { %v5266_v56 = vpop.f32.mrf.mxu1 }
 0x311   :  { %v1959_v1 = vadd.f32 %v5266_v56, %v5262_v11 }
 0x312   :  { %v5270_v55 = vpop.f32.mrf.mxu1 }
 0x313   :  { %v1960_v46 = vadd.f32 %v5260_v34, %v1959_v1  ;;  %v3575_v1 = vld [vmem:[%s6208_s7 + $0x30] sm:$0xff]  }
 0x314   :  { %v5273_v35 = vpop.f32.mrf.mxu1  ;;  %3454 = vmatprep.subr.bf16.mxu0 %v3575_v1 }
 0x315   :  { %v1961_v43 = vadd.f32 %v5264_v17, %v1960_v46  ;;  %3455 = vmatpush3.bf16.msra.mxu0 %v3575_v1 }
 0x316   :  { %v5276_v30 = vpop.f32.mrf.mxu1 }
 0x317   :  { %v1962_v16 = vadd.f32 %v1961_v43, %v5273_v35 }
 0x318   :  { %v5279_v60 = vpop.f32.mrf.mxu1 }
 0x319   :  { %v1963_v37 = vadd.f32 %v1962_v16, %v5279_v60  ;;  %v3576_v16 = vld [vmem:[%s6208_s7 + $0x28] sm:$0xff]  }
 0x31a   :  { %v5282_v36 = vpop.f32.mrf.mxu1  ;;  %3456 = vmatprep.subr.bf16.mxu0 %v3576_v16 }
 0x31b   :  { %v1964_v53 = vadd.f32 %v5270_v55, %v1963_v37  ;;  %3457 = vmatpush3.bf16.msra.mxu0 %v3576_v16 }
 0x31c   :  { %v5285_v31 = vpop.f32.mrf.mxu1 }
 0x31d   :  { %v1965_v28 = vadd.f32 %v5276_v30, %v1964_v53 }
 0x31e   :  { %v5288_v23 = vpop.f32.mrf.mxu1 }
 0x31f   :  { %v1966_v40 = vadd.f32 %v1965_v28, %v5285_v31  ;;  %v3577_v28 = vld [vmem:[%s6208_s7 + $0x20] sm:$0xff]  }
 0x320   :  { %v5291_v49 = vpop.f32.mrf.mxu1  ;;  %3458 = vmatprep.subr.bf16.mxu0 %v3577_v28 }
 0x321   :  { %v1967_v10 = vadd.f32 %v1966_v40, %v5291_v49  ;;  %3459 = vmatpush3.bf16.msra.mxu0 %v3577_v28 }
 0x322   :  { %v5294_v7 = vpop.f32.mrf.mxu1 }
 0x323   :  { %v1968_v48 = vadd.f32 %v5282_v36, %v1967_v10 }
 0x324   :  { %v5297_v13 = vpop.f32.mrf.mxu1 }
 0x325   :  { %v1969_v5 = vadd.f32 %v5288_v23, %v1968_v48  ;;  %v3578_v48 = vld [vmem:[%s6208_s7 + $0x18] sm:$0xff]  }
 0x326   :  { %v5300_v27 = vpop.f32.mrf.mxu1  ;;  %3460 = vmatprep.subr.bf16.mxu0 %v3578_v48 }
 0x327   :  { %v1970_v41 = vadd.f32 %v1969_v5, %v5297_v13  ;;  %3461 = vmatpush3.bf16.msra.mxu0 %v3578_v48 }
 0x328   :  { %v5303_v39 = vpop.f32.mrf.mxu1 }
 0x329   :  { %v1971_v2 = vadd.f32 %v1970_v41, %v5303_v39  ;;  %v3579_v41 = vld [vmem:[%s6208_s7 + $0x10] sm:$0xff]  }
 0x32a   :  { %v5306_v63 = vpop.f32.mrf.mxu1  ;;  %3462 = vmatprep.subr.bf16.mxu0 %v3579_v41 }
 0x32b   :  { %v1972_v61 = vadd.f32 %v5294_v7, %v1971_v2  ;;  %3463 = vmatpush3.bf16.msra.mxu0 %v3579_v41 }
 0x32c   :  { %v5309_v9 = vpop.f32.mrf.mxu1 }
 0x32d   :  { %v1973_v18 = vadd.f32 %v5300_v27, %v1972_v61  ;;  %v3580_v61 = vld [vmem:[%s6208_s7 + $0x8] sm:$0xff]  }
 0x32e   :  { %v5312_v4 = vpop.f32.mrf.mxu1  ;;  %3464 = vmatprep.subr.bf16.mxu0 %v3580_v61 }
 0x32f   :  { %v1974_v42 = vadd.f32 %v1973_v18, %v5309_v9  ;;  %3465 = vmatpush3.bf16.msra.mxu0 %v3580_v61 }
 0x330   :  { %v5315_v8 = vpop.f32.mrf.mxu1 }
 0x331   :  { %v1975_v21 = vadd.f32 %v1974_v42, %v5315_v8  ;;  %v3581_v42 = vld [vmem:[%s6208_s7] sm:$0xff]  }
 0x332   :  { %v5318_v26 = vpop.f32.mrf.mxu1  ;;  %3466 = vmatprep.subr.bf16.mxu0 %v3581_v42 }
 0x333   :  { %v1976_v58 = vadd.f32 %v5306_v63, %v1975_v21  ;;  %3467 = vmatpush3.bf16.msra.mxu0 %v3581_v42 }
 0x334   :  { %v5321_v29 = vpop.f32.mrf.mxu1 }
 0x335   :  { %v1977_v25 = vadd.f32 %v5312_v4, %v1976_v58 }
 0x336   :  { %v5324_v45 = vpop.f32.mrf.mxu1 }
 0x337   :  { %v1978_v51 = vadd.f32 %v1977_v25, %v5321_v29 }
 0x338   :  { %v5327_v59 = vpop.f32.mrf.mxu1 }
 0x339   :  { %v1979_v14 = vadd.f32 %v1978_v51, %v5327_v59 }
 0x33a   :  { %v5330_v20 = vpop.f32.mrf.mxu1 }
 0x33b   :  { %v1980_v12 = vadd.f32 %v5318_v26, %v1979_v14 }
 0x33c   :  { %v5333_v38 = vpop.f32.mrf.mxu1 }
 0x33d   :  { %v1981_v52 = vadd.f32 %v5324_v45, %v1980_v12 }
 0x33e   :  { %v5336_v44 = vpop.f32.mrf.mxu1 }
 0x33f   :  { %v1982_v50 = vadd.f32 %v1981_v52, %v5333_v38 }
 0x340   :  { %v5339_v3 = vpop.f32.mrf.mxu1 }
 0x341   :  { %v1983_v24 = vadd.f32 %v1982_v50, %v5339_v3 }
 0x342   :  { %v5342_v57 = vpop.f32.mrf.mxu1 }
 0x343   :  { %v1984_v32 = vadd.f32 %v5330_v20, %v1983_v24 }
 0x344   :  { %v5345_v19 = vpop.f32.mrf.mxu1 }
 0x345   :  { %v1985_v22 = vadd.f32 %v5336_v44, %v1984_v32 }
 0x346   :  { %v5351_v15 = vpop.f32.mrf.mxu1 }
 0x347   :  { %v1986_v62 = vadd.f32 %v1985_v22, %v5345_v19 }
 0x348   :  { %v5354_v0 = vpop.f32.mrf.mxu1 }
 0x349   :  { %v1987_v46 = vadd.f32 %v1986_v62, %v5354_v0 }
 0x34b   :  { %v1988_v43 = vadd.f32 %v5342_v57, %v1987_v46 }
 0x34d   :  { %v1989_v37 = vadd.f32 %v5351_v15, %v1988_v43 }
 0x34f   :  { %v1990_v53 = vrot.slane %v1989_v37, 4 }
 0x351   :  { %v1991_v40 = vadd.f32 %v1990_v53, %v1989_v37 }
 0x353   :  { %v1992_v10 = vrot.slane %v1991_v40, 2 }
 0x355   :  { %v1993_v5 = vadd.f32 %v1992_v10, %v1991_v40 }
 0x357   :  { %v1994_v2 = vrot.slane %v1993_v5, 1 }
 0x359   :  { %v1995_v18 = vadd.f32 %v1994_v2, %v1993_v5 }
 0x35b   :  { %v5380_v21 = vmul.f32 0.00390625, %v1995_v18 }
 0x35d   :  { %v5384_v58 = vsub.f32 %v5262_v11, %v5380_v21  ;;  %v5388_v25 = vsub.f32 %v5266_v56, %v5380_v21  ;;  %v5392_v51 = vsub.f32 %v5260_v34, %v5380_v21  ;;  %v5400_v52 = vsub.f32 %v5264_v17, %v5380_v21 }
 0x35e   :  { %v5404_v11 = vsub.f32 %v5273_v35, %v5380_v21  ;;  %v5410_v34 = vsub.f32 %v5279_v60, %v5380_v21  ;;  %v5416_v17 = vsub.f32 %v5270_v55, %v5380_v21  ;;  %v5422_v22 = vsub.f32 %v5276_v30, %v5380_v21 }
 0x35f   :  { %v2029_v14 = vmul.f32 %v5384_v58, %v5384_v58  ;;  %v2030_v12 = vmul.f32 %v5388_v25, %v5388_v25  ;;  %v2031_v56 = vmul.f32 %v5392_v51, %v5392_v51  ;;  %v2032_v24 = vmul.f32 %v5400_v52, %v5400_v52 }
 0x360   :  { %v2033_v35 = vmul.f32 %v5404_v11, %v5404_v11  ;;  %v2034_v60 = vmul.f32 %v5410_v34, %v5410_v34  ;;  %v5428_v1 = vsub.f32 %v5285_v31, %v5380_v21  ;;  %v2035_v55 = vmul.f32 %v5416_v17, %v5416_v17 }
 0x361   :  { %v2061_v50 = vadd.f32 %v2030_v12, %v2029_v14  ;;  %v5434_v43 = vsub.f32 %v5291_v49, %v5380_v21  ;;  %v2036_v30 = vmul.f32 %v5422_v22, %v5422_v22  ;;  %v5440_v37 = vsub.f32 %v5282_v36, %v5380_v21 }
 0x362   :  { %v2037_v31 = vmul.f32 %v5428_v1, %v5428_v1  ;;  %v5446_v28 = vsub.f32 %v5288_v23, %v5380_v21  ;;  %v5452_v10 = vsub.f32 %v5297_v13, %v5380_v21  ;;  %v5458_v5 = vsub.f32 %v5303_v39, %v5380_v21 }
 0x363   :  { %v2062_v32 = vadd.f32 %v2061_v50, %v2031_v56  ;;  %v2038_v49 = vmul.f32 %v5434_v43, %v5434_v43  ;;  %v2039_v36 = vmul.f32 %v5440_v37, %v5440_v37  ;;  %v5464_v2 = vsub.f32 %v5294_v7, %v5380_v21 }
 0x364   :  { %v2040_v23 = vmul.f32 %v5446_v28, %v5446_v28  ;;  %v2041_v13 = vmul.f32 %v5452_v10, %v5452_v10  ;;  %v5470_v18 = vsub.f32 %v5300_v27, %v5380_v21  ;;  %v2042_v39 = vmul.f32 %v5458_v5, %v5458_v5 }
 0x365   :  { %v2063_v47 = vadd.f32 %v2062_v32, %v2032_v24  ;;  %v5476_v14 = vsub.f32 %v5309_v9, %v5380_v21  ;;  %v2043_v7 = vmul.f32 %v5464_v2, %v5464_v2  ;;  %v5482_v56 = vsub.f32 %v5315_v8, %v5380_v21 }
 0x366   :  { %v2044_v27 = vmul.f32 %v5470_v18, %v5470_v18  ;;  %v5488_v24 = vsub.f32 %v5306_v63, %v5380_v21 }
 0x367   :  { %v2064_v62 = vadd.f32 %v2063_v47, %v2033_v35  ;;  %v2045_v9 = vmul.f32 %v5476_v14, %v5476_v14  ;;  %v5494_v35 = vsub.f32 %v5312_v4, %v5380_v21  ;;  %v2046_v8 = vmul.f32 %v5482_v56, %v5482_v56 }
 0x368   :  { %v2047_v63 = vmul.f32 %v5488_v24, %v5488_v24 }
 0x369   :  { %v2065_v46 = vadd.f32 %v2064_v62, %v2034_v60  ;;  %v5500_v60 = vsub.f32 %v5321_v29, %v5380_v21  ;;  %v2048_v4 = vmul.f32 %v5494_v35, %v5494_v35 }
 0x36b   :  { %v2066_v16 = vadd.f32 %v2065_v46, %v2035_v55  ;;  %v5506_v55 = vsub.f32 %v5327_v59, %v5380_v21  ;;  %v2049_v29 = vmul.f32 %v5500_v60, %v5500_v60 }
 0x36d   :  { %v2067_v53 = vadd.f32 %v2066_v16, %v2036_v30  ;;  %v5512_v30 = vsub.f32 %v5318_v26, %v5380_v21  ;;  %v2050_v59 = vmul.f32 %v5506_v55, %v5506_v55 }
 0x36f   :  { %v2068_v40 = vadd.f32 %v2067_v53, %v2037_v31  ;;  %v5518_v31 = vsub.f32 %v5324_v45, %v5380_v21  ;;  %v2051_v26 = vmul.f32 %v5512_v30, %v5512_v30 }
 0x371   :  { %v2069_v48 = vadd.f32 %v2068_v40, %v2038_v49  ;;  %v5524_v49 = vsub.f32 %v5333_v38, %v5380_v21  ;;  %v2052_v45 = vmul.f32 %v5518_v31, %v5518_v31 }
 0x373   :  { %v2070_v41 = vadd.f32 %v2069_v48, %v2039_v36  ;;  %v5530_v36 = vsub.f32 %v5339_v3, %v5380_v21  ;;  %v2053_v38 = vmul.f32 %v5524_v49, %v5524_v49 }
 0x375   :  { %v2071_v61 = vadd.f32 %v2070_v41, %v2040_v23  ;;  %v5536_v23 = vsub.f32 %v5330_v20, %v5380_v21  ;;  %v2054_v3 = vmul.f32 %v5530_v36, %v5530_v36 }
 0x377   :  { %v2072_v42 = vadd.f32 %v2071_v61, %v2041_v13  ;;  %v5542_v13 = vsub.f32 %v5336_v44, %v5380_v21  ;;  %v2055_v20 = vmul.f32 %v5536_v23, %v5536_v23 }
 0x379   :  { %v2073_v12 = vadd.f32 %v2072_v42, %v2042_v39  ;;  %v5548_v39 = vsub.f32 %v5345_v19, %v5380_v21  ;;  %v2056_v44 = vmul.f32 %v5542_v13, %v5542_v13 }
 0x37b   :  { %v2074_v50 = vadd.f32 %v2073_v12, %v2043_v7  ;;  %v5554_v7 = vsub.f32 %v5354_v0, %v5380_v21  ;;  %v2057_v19 = vmul.f32 %v5548_v39, %v5548_v39 }
 0x37d   :  { %v2075_v32 = vadd.f32 %v2074_v50, %v2044_v27  ;;  %v5560_v27 = vsub.f32 %v5342_v57, %v5380_v21  ;;  %v2058_v0 = vmul.f32 %v5554_v7, %v5554_v7 }
 0x37f   :  { %v2076_v47 = vadd.f32 %v2075_v32, %v2045_v9  ;;  %v5566_v9 = vsub.f32 %v5351_v15, %v5380_v21 }
 0x381   :  { %v2077_v62 = vadd.f32 %v2076_v47, %v2046_v8  ;;  %v2059_v8 = vmul.f32 %v5560_v27, %v5560_v27  ;;  %v2060_v57 = vmul.f32 %v5566_v9, %v5566_v9 }
 0x383   :  { %v2078_v46 = vadd.f32 %v2077_v62, %v2047_v63 }
 0x385   :  { %v2079_v16 = vadd.f32 %v2078_v46, %v2048_v4 }
 0x387   :  { %v2080_v53 = vadd.f32 %v2079_v16, %v2049_v29 }
 0x389   :  { %v2081_v40 = vadd.f32 %v2080_v53, %v2050_v59 }
 0x38b   :  { %v2082_v48 = vadd.f32 %v2081_v40, %v2051_v26  ;;  %v1957_v40 = vld [vmem:[%s6209_s5] sm:$0x1] }
 0x38d   :  { %v2083_v41 = vadd.f32 %v2082_v48, %v2052_v45 }
 0x38f   :  { %v2084_v61 = vadd.f32 %v2083_v41, %v2053_v38 }
 0x391   :  { %v2085_v42 = vadd.f32 %v2084_v61, %v2054_v3  ;;  %v5588_v3 = vld [vmem:[%s6210_s6] ss:$0 sm:$0xff] }
 0x393   :  { %v2086_v12 = vadd.f32 %v2085_v42, %v2055_v20 }
 0x395   :  { %v2087_v50 = vadd.f32 %v2086_v12, %v2056_v44 }
 0x397   :  { %v2088_v32 = vadd.f32 %v2087_v50, %v2057_v19 }
 0x399   :  { %v2089_v47 = vadd.f32 %v2088_v32, %v2058_v0 }
 0x39b   :  { %v2090_v63 = vadd.f32 %v2089_v47, %v2059_v8 }
 0x39d   :  { %v2091_v62 = vadd.f32 %v2090_v63, %v2060_v57 }
 0x39f   :  { %v2092_v4 = vrot.slane %v2091_v62, 4 }
 0x3a1   :  { %v2093_v46 = vadd.f32 %v2092_v4, %v2091_v62 }
 0x3a3   :  { %v2094_v29 = vrot.slane %v2093_v46, 2 }
 0x3a5   :  { %v2095_v16 = vadd.f32 %v2094_v29, %v2093_v46 }
 0x3a7   :  { %v2096_v59 = vrot.slane %v2095_v16, 1 }
 0x3a9   :  { %v2097_v15 = vadd.f32 %v2096_v59, %v2095_v16 }
 0x3ab   :  { %v2098_v21 = vmul.f32 0.00390625, %v2097_v15 }
 0x3ad   :  { %v2099_v53 = vadd.f32 1e-05, %v2098_v21 }
 0x3af   :  { %3584 = vrsqrt.f32 %v2099_v53 }
 0x3bc   :  { %v3585_v26 = vpop.eup %3584 }
 0x3bd   :  { %v2101_v45 = vmul.f32 %v3585_v26, %v1957_v40 }
 0x3bf   :  { %v5579_v48 = vrot.slane %v2101_v45, %v1611_v33 }
 0x3c1   :  { %v2110_v38 = vmul.f32 %v5579_v48, %v5392_v51  ;;  %v2111_v41 = vmul.f32 %v5579_v48, %v5400_v52  ;;  %v2108_v61 = vmul.f32 %v5579_v48, %v5384_v58  ;;  %v2109_v20 = vmul.f32 %v5579_v48, %v5388_v25 }
 0x3c2   :  { %v2112_v54 = vmul.f32 %v5579_v48, %v5404_v11  ;;  %v2113_v33 = vmul.f32 %v5579_v48, %v5410_v34  ;;  %v2114_v11 = vmul.f32 %v5579_v48, %v5416_v17  ;;  %v2115_v34 = vmul.f32 %v5579_v48, %v5422_v22 }
 0x3c3   :  { %v2148_v51 = vadd.f32 %v5588_v3, %v2110_v38  ;;  %v2149_v52 = vadd.f32 %v5588_v3, %v2111_v41  ;;  %v2146_v42 = vadd.f32 %v5588_v3, %v2108_v61  ;;  %v2147_v44 = vadd.f32 %v5588_v3, %v2109_v20 }
 0x3c4   :  { %v2150_v12 = vadd.f32 %v5588_v3, %v2112_v54  ;;  %v2151_v58 = vadd.f32 %v5588_v3, %v2113_v33  ;;  %v2116_v50 = vmul.f32 %v5579_v48, %v5428_v1  ;;  %v2117_v0 = vmul.f32 %v5579_v48, %v5434_v43 }
 0x3c5   :  { %v2180_v19 = vmax.f32 %v2148_v51, 0.0  ;;  %v2181_v25 = vmax.f32 %v2149_v52, 0.0  ;;  %v2178_v32 = vmax.f32 %v2146_v42, 0.0  ;;  %v2179_v8 = vmax.f32 %v2147_v44, 0.0 }
 0x3c6   :  { %v2182_v57 = vmax.f32 %v2150_v12, 0.0  ;;  %v2183_v63 = vmax.f32 %v2151_v58, 0.0  ;;  %v2152_v4 = vadd.f32 %v5588_v3, %v2114_v11  ;;  %v2153_v46 = vadd.f32 %v5588_v3, %v2115_v34 }
 0x3c7   :  { %v2211_v47 = vpack.c.bf16 %v2181_v25, %v2180_v19  ;;  %v2210_v62 = vpack.c.bf16 %v2179_v8, %v2178_v32  ;;  %v2154_v17 = vadd.f32 %v5588_v3, %v2116_v50  ;;  %v2155_v22 = vadd.f32 %v5588_v3, %v2117_v0 }
 0x3c8   :  { %v2212_v29 = vpack.c.bf16 %v2183_v63, %v2182_v57  ;;  %v2118_v1 = vmul.f32 %v5579_v48, %v5440_v37  ;;  %v2119_v43 = vmul.f32 %v5579_v48, %v5446_v28  ;;  %v2184_v16 = vmax.f32 %v2152_v4, 0.0 }
 0x3c9   :  { %3468 = vmatprep.mubr.bf16.mxu0 %v2210_v62  ;;  %v2185_v59 = vmax.f32 %v2153_v46, 0.0  ;;  %v2120_v15 = vmul.f32 %v5579_v48, %v5452_v10  ;;  %v2121_v21 = vmul.f32 %v5579_v48, %v5458_v5  ;;  %v2186_v53 = vmax.f32 %v2154_v17, 0.0 }
 0x3ca   :  { %3469 = vmatmul.mubr.bf16.vlgmr.msra.gmra.mxu0 %v2211_v47  ;;  %v2187_v26 = vmax.f32 %v2155_v22, 0.0  ;;  %v2156_v40 = vadd.f32 %v5588_v3, %v2118_v1  ;;  %v2157_v45 = vadd.f32 %v5588_v3, %v2119_v43  ;;  %v2122_v10 = vmul.f32 %v5579_v48, %v5464_v2 }
 0x3cb   :  { %3472 = vmatprep.mubr.bf16.mxu0 %v2212_v29  ;;  %v2213_v38 = vpack.c.bf16 %v2185_v59, %v2184_v16  ;;  %v2158_v37 = vadd.f32 %v5588_v3, %v2120_v15  ;;  %v2159_v41 = vadd.f32 %v5588_v3, %v2121_v21  ;;  %v2123_v5 = vmul.f32 %v5579_v48, %v5470_v18 }
 0x3cc   :  { %v2214_v28 = vpack.c.bf16 %v2187_v26, %v2186_v53  ;;  %v2188_v61 = vmax.f32 %v2156_v40, 0.0  ;;  %v2189_v20 = vmax.f32 %v2157_v45, 0.0  ;;  %v2124_v54 = vmul.f32 %v5579_v48, %v5476_v14 }
 0x3cd   :  { %v2125_v33 = vmul.f32 %v5579_v48, %v5482_v56  ;;  %v2190_v51 = vmax.f32 %v2158_v37, 0.0  ;;  %v2191_v52 = vmax.f32 %v2159_v41, 0.0  ;;  %v2160_v42 = vadd.f32 %v5588_v3, %v2122_v10 }
 0x3ce   :  { %v2161_v44 = vadd.f32 %v5588_v3, %v2123_v5  ;;  %v2215_v12 = vpack.c.bf16 %v2189_v20, %v2188_v61  ;;  %v2162_v2 = vadd.f32 %v5588_v3, %v2124_v54  ;;  %v2126_v14 = vmul.f32 %v5579_v48, %v5488_v24 }
 0x3cf   :  { %v2163_v58 = vadd.f32 %v5588_v3, %v2125_v33  ;;  %v2216_v18 = vpack.c.bf16 %v2191_v52, %v2190_v51  ;;  %v2127_v56 = vmul.f32 %v5579_v48, %v5494_v35  ;;  %v2192_v19 = vmax.f32 %v2160_v42, 0.0 }
 0x3d0   :  { %v2193_v25 = vmax.f32 %v2161_v44, 0.0  ;;  %v2128_v11 = vmul.f32 %v5579_v48, %v5500_v60  ;;  %v2129_v34 = vmul.f32 %v5579_v48, %v5506_v55  ;;  %v2194_v50 = vmax.f32 %v2162_v2, 0.0 }
 0x3d1   :  { %v2195_v0 = vmax.f32 %v2163_v58, 0.0  ;;  %v2164_v32 = vadd.f32 %v5588_v3, %v2126_v14  ;;  %v2165_v8 = vadd.f32 %v5588_v3, %v2127_v56  ;;  %v2130_v60 = vmul.f32 %v5579_v48, %v5512_v30 }
 0x3d2   :  { %3473 = vmatmul.mubr.bf16.gmra.mxu0 %v2213_v38  ;;  %v2217_v47 = vpack.c.bf16 %v2193_v25, %v2192_v19  ;;  %v2166_v24 = vadd.f32 %v5588_v3, %v2128_v11  ;;  %v2167_v57 = vadd.f32 %v5588_v3, %v2129_v34  ;;  %v2131_v55 = vmul.f32 %v5579_v48, %v5518_v31 }
 0x3d3   :  { %3476 = vmatprep.mubr.bf16.mxu0 %v2214_v28  ;;  %v2218_v35 = vpack.c.bf16 %v2195_v0, %v2194_v50  ;;  %v2196_v63 = vmax.f32 %v2164_v32, 0.0  ;;  %v2197_v62 = vmax.f32 %v2165_v8, 0.0  ;;  %v2132_v4 = vmul.f32 %v5579_v48, %v5524_v49 }
 0x3d4   :  { %v2133_v46 = vmul.f32 %v5579_v48, %v5530_v36  ;;  %v2198_v17 = vmax.f32 %v2166_v24, 0.0  ;;  %v2199_v22 = vmax.f32 %v2167_v57, 0.0  ;;  %v2168_v29 = vadd.f32 %v5588_v3, %v2130_v60 }
 0x3d5   :  { %v2169_v1 = vadd.f32 %v5588_v3, %v2131_v55  ;;  %v2219_v43 = vpack.c.bf16 %v2197_v62, %v2196_v63  ;;  %v2170_v30 = vadd.f32 %v5588_v3, %v2132_v4  ;;  %v2134_v49 = vmul.f32 %v5579_v48, %v5536_v23 }
 0x3d6   :  { %v2171_v16 = vadd.f32 %v5588_v3, %v2133_v46  ;;  %v2220_v31 = vpack.c.bf16 %v2199_v22, %v2198_v17  ;;  %v2135_v36 = vmul.f32 %v5579_v48, %v5542_v13  ;;  %v2200_v59 = vmax.f32 %v2168_v29, 0.0 }
 0x3d7   :  { %v2201_v15 = vmax.f32 %v2169_v1, 0.0  ;;  %v2137_v21 = vmul.f32 %v5579_v48, %v5554_v7  ;;  %v2136_v53 = vmul.f32 %v5579_v48, %v5548_v39  ;;  %v2202_v26 = vmax.f32 %v2170_v30, 0.0 }
 0x3d8   :  { %v2203_v40 = vmax.f32 %v2171_v16, 0.0  ;;  %v2172_v45 = vadd.f32 %v5588_v3, %v2134_v49  ;;  %v2173_v38 = vadd.f32 %v5588_v3, %v2135_v36  ;;  %v2138_v7 = vmul.f32 %v5579_v48, %v5560_v27 }
 0x3d9   :  { %v2221_v37 = vpack.c.bf16 %v2201_v15, %v2200_v59  ;;  %v2175_v23 = vadd.f32 %v5588_v3, %v2137_v21  ;;  %v2174_v41 = vadd.f32 %v5588_v3, %v2136_v53  ;;  %v2139_v39 = vmul.f32 %v5579_v48, %v5566_v9  ;;  %v5688_v9 = vld [vmem:[%s6211_s8] ss:$0 sm:$0xff] }
 0x3da   :  { %3477 = vmatmul.mubr.bf16.gmra.mxu0 %v2215_v12  ;;  %v2222_v13 = vpack.c.bf16 %v2203_v40, %v2202_v26  ;;  %v2204_v28 = vmax.f32 %v2172_v45, 0.0  ;;  %v2205_v10 = vmax.f32 %v2173_v38, 0.0  ;;  %v2176_v20 = vadd.f32 %v5588_v3, %v2138_v7 }
 0x3db   :  { %3480 = vmatprep.mubr.bf16.mxu0 %v2216_v18  ;;  %v2207_v5 = vmax.f32 %v2175_v23, 0.0  ;;  %v2206_v61 = vmax.f32 %v2174_v41, 0.0  ;;  %v2177_v54 = vadd.f32 %v5588_v3, %v2139_v39  ;;  %v5683_v27 = vand.u32 127, %v1609_v6 }
 0x3dc   :  { %v2223_v33 = vpack.c.bf16 %v2205_v10, %v2204_v28  ;;  %v2208_v52 = vmax.f32 %v2176_v20, 0.0 }
 0x3dd   :  { %v2224_v51 = vpack.c.bf16 %v2207_v5, %v2206_v61  ;;  %v2209_v42 = vmax.f32 %v2177_v54, 0.0  ;;  %vm2460_vm1 = vcmp.lt.s32.totalorder %v5683_v27, 10 }
 0x3df   :  { %v2225_v44 = vpack.c.bf16 %v2209_v42, %v2208_v52 }
 0x3e2   :  { %3481 = vmatmul.mubr.bf16.gmra.mxu0 %v2217_v47 }
 0x3e3   :  { %3484 = vmatprep.mubr.bf16.mxu0 %v2218_v35 }
 0x3ea   :  { %3485 = vmatmul.mubr.bf16.gmra.mxu0 %v2219_v43 }
 0x3eb   :  { %3488 = vmatprep.mubr.bf16.mxu0 %v2220_v31 }
 0x3f2   :  { %3489 = vmatmul.mubr.bf16.gmra.mxu0 %v2221_v37 }
 0x3f3   :  { %3492 = vmatprep.mubr.bf16.mxu0 %v2222_v13 }
 0x3fa   :  { %3493 = vmatmul.mubr.bf16.gmra.mxu0 %v2223_v33 }
 0x3fb   :  { %3496 = vmatprep.mubr.bf16.mxu0 %v2224_v51 }
 0x402   :  { %3497 = vmatmul.mubr.bf16.gmra.mxu0 %v2225_v44 }
 0x48a   :  { %v3470_v48 = vpop.f32.mrf.mxu0 }
 0x48b   :  { %v2340_v3 = vadd.f32 %v3470_v48, %v5688_v9 }
 0x48c   :  { %v2331_v12 = vpop.f32.mrf.mxu0 }
 0x48d   :  { %v2332_v2 = vadd.f32 %v5688_v9, %v2331_v12  ;;  %v5695_v58 = vsel %vm2460_vm1, %v2340_v3, -inf }
 0x48e   :  { %2497 = vmax.xlane.f32.xlu1 %v5695_v58  ;;  %v3471_v6 = vpop.f32.mrf.mxu0 }
 0x48f   :  { %v2343_v18 = vadd.f32 %v3471_v6, %v5688_v9  ;;  %v5701_v14 = vsel %vm2460_vm1, %v2332_v2, -inf }
 0x490   :  { %v2334_v56 = vpop.f32.mrf.mxu0  ;;  %2493 = vmax.xlane.f32.xlu0 %v5701_v14 }
 0x491   :  { %v2335_v19 = vadd.f32 %v5688_v9, %v2334_v56  ;;  %v5707_v25 = vsel %vm2460_vm1, %v2343_v18, -inf }
 0x492   :  { %2499 = vmax.xlane.f32.xlu1 %v5707_v25  ;;  %v3474_v11 = vpop.f32.mrf.mxu0 }
 0x493   :  { %v2356_v34 = vadd.f32 %v3474_v11, %v5688_v9  ;;  %v5713_v50 = vsel %vm2460_vm1, %v2335_v19, -inf }
 0x494   :  { %v2347_v0 = vpop.f32.mrf.mxu0  ;;  %2495 = vmax.xlane.f32.xlu0 %v5713_v50 }
 0x495   :  { %v2348_v8 = vadd.f32 %v5688_v9, %v2347_v0  ;;  %v5720_v24 = vsel %vm2460_vm1, %v2356_v34, -inf }
 0x496   :  { %v3475_v32 = vpop.f32.mrf.mxu0 }
 0x497   :  { %v2359_v47 = vadd.f32 %v3475_v32, %v5688_v9  ;;  %v5732_v62 = vsel %vm2460_vm1, %v2348_v8, -inf }
 0x498   :  { %v2350_v57 = vpop.f32.mrf.mxu0  ;;  %2505 = vmax.xlane.f32.xlu0 %v5720_v24 }
 0x499   :  { %v2351_v35 = vadd.f32 %v5688_v9, %v2350_v57  ;;  %v5726_v60 = vsel %vm2460_vm1, %v2359_v47, -inf }
 0x49a   :  { %2507 = vmax.xlane.f32.xlu1 %v5726_v60  ;;  %v3478_v55 = vpop.f32.mrf.mxu0 }
 0x49b   :  { %v2372_v63 = vadd.f32 %v3478_v55, %v5688_v9  ;;  %v5737_v46 = vsel %vm2460_vm1, %v2351_v35, -inf }
 0x49c   :  { %v2363_v4 = vpop.f32.mrf.mxu0  ;;  %2501 = vmax.xlane.f32.xlu0 %v5732_v62 }
 0x49d   :  { %v2364_v22 = vadd.f32 %v5688_v9, %v2363_v4  ;;  %v5744_v1 = vsel %vm2460_vm1, %v2372_v63, -inf }
 0x49e   :  { %v3479_v17 = vpop.f32.mrf.mxu0  ;;  %2503 = vmax.xlane.f32.xlu1 %v5737_v46 }
 0x49f   :  { %v2375_v29 = vadd.f32 %v3479_v17, %v5688_v9  ;;  %v5756_v36 = vsel %vm2460_vm1, %v2364_v22, -inf }
 0x4a0   :  { %v2366_v43 = vpop.f32.mrf.mxu0  ;;  %2513 = vmax.xlane.f32.xlu0 %v5744_v1 }
 0x4a1   :  { %v2367_v30 = vadd.f32 %v5688_v9, %v2366_v43  ;;  %v5750_v16 = vsel %vm2460_vm1, %v2375_v29, -inf }
 0x4a2   :  { %v3482_v31 = vpop.f32.mrf.mxu0  ;;  %2515 = vmax.xlane.f32.xlu1 %v5750_v16 }
 0x4a3   :  { %v2388_v49 = vadd.f32 %v3482_v31, %v5688_v9  ;;  %v5761_v15 = vsel %vm2460_vm1, %v2367_v30, -inf }
 0x4a4   :  { %v2379_v59 = vpop.f32.mrf.mxu0  ;;  %2509 = vmax.xlane.f32.xlu0 %v5756_v36 }
 0x4a5   :  { %v2380_v53 = vadd.f32 %v5688_v9, %v2379_v59  ;;  %v5768_v40 = vsel %vm2460_vm1, %v2388_v49, -inf }
 0x4a6   :  { %v3483_v21 = vpop.f32.mrf.mxu0  ;;  %2511 = vmax.xlane.f32.xlu1 %v5761_v15 }
 0x4a7   :  { %v2391_v26 = vadd.f32 %v3483_v21, %v5688_v9  ;;  %v5780_v13 = vsel %vm2460_vm1, %v2380_v53, -inf }
 0x4a8   :  { %v2382_v45 = vpop.f32.mrf.mxu0  ;;  %2521 = vmax.xlane.f32.xlu0 %v5768_v40 }
 0x4a9   :  { %v2383_v38 = vadd.f32 %v5688_v9, %v2382_v45  ;;  %v5774_v37 = vsel %vm2460_vm1, %v2391_v26, -inf }
 0x4aa   :  { %v3486_v23 = vpop.f32.mrf.mxu0  ;;  %2523 = vmax.xlane.f32.xlu1 %v5774_v37 }
 0x4ab   :  { %v2404_v41 = vadd.f32 %v3486_v23, %v5688_v9  ;;  %v5785_v39 = vsel %vm2460_vm1, %v2383_v38, -inf }
 0x4ac   :  { %v2395_v7 = vpop.f32.mrf.mxu0  ;;  %2517 = vmax.xlane.f32.xlu0 %v5780_v13 }
 0x4ad   :  { %v2396_v10 = vadd.f32 %v5688_v9, %v2395_v7  ;;  %v5792_v61 = vsel %vm2460_vm1, %v2404_v41, -inf }
 0x4ae   :  { %v3487_v28 = vpop.f32.mrf.mxu0  ;;  %2519 = vmax.xlane.f32.xlu1 %v5785_v39 }
 0x4af   :  { %v2407_v5 = vadd.f32 %v3487_v28, %v5688_v9  ;;  %v5804_v42 = vsel %vm2460_vm1, %v2396_v10, -inf }
 0x4b0   :  { %v2398_v20 = vpop.f32.mrf.mxu0  ;;  %2529 = vmax.xlane.f32.xlu0 %v5792_v61 }
 0x4b1   :  { %v2399_v54 = vadd.f32 %v5688_v9, %v2398_v20  ;;  %v5798_v33 = vsel %vm2460_vm1, %v2407_v5, -inf }
 0x4b2   :  { %v3490_v51 = vpop.f32.mrf.mxu0  ;;  %2531 = vmax.xlane.f32.xlu1 %v5798_v33 }
 0x4b3   :  { %v2420_v52 = vadd.f32 %v3490_v51, %v5688_v9  ;;  %v5809_v48 = vsel %vm2460_vm1, %v2399_v54, -inf }
 0x4b4   :  { %v2411_v44 = vpop.f32.mrf.mxu0  ;;  %2525 = vmax.xlane.f32.xlu0 %v5804_v42 }
 0x4b5   :  { %v2412_v12 = vadd.f32 %v5688_v9, %v2411_v44  ;;  %v5816_v6 = vsel %vm2460_vm1, %v2420_v52, -inf }
 0x4b6   :  { %v3491_v3 = vpop.f32.mrf.mxu0  ;;  %2527 = vmax.xlane.f32.xlu1 %v5809_v48 }
 0x4b7   :  { %v2423_v2 = vadd.f32 %v3491_v3, %v5688_v9  ;;  %v5828_v0 = vsel %vm2460_vm1, %v2412_v12, -inf }
 0x4b8   :  { %v2414_v18 = vpop.f32.mrf.mxu0  ;;  %2537 = vmax.xlane.f32.xlu0 %v5816_v6 }
 0x4b9   :  { %v2415_v56 = vadd.f32 %v5688_v9, %v2414_v18  ;;  %v5822_v19 = vsel %vm2460_vm1, %v2423_v2, -inf }
 0x4ba   :  { %v3494_v11 = vpop.f32.mrf.mxu0  ;;  %2539 = vmax.xlane.f32.xlu1 %v5822_v19 }
 0x4bb   :  { %v2436_v34 = vadd.f32 %v3494_v11, %v5688_v9  ;;  %v5833_v8 = vsel %vm2460_vm1, %v2415_v56, -inf }
 0x4bc   :  { %v2427_v32 = vpop.f32.mrf.mxu0  ;;  %2533 = vmax.xlane.f32.xlu0 %v5828_v0 }
 0x4bd   :  { %v2428_v57 = vadd.f32 %v5688_v9, %v2427_v32  ;;  %v5840_v55 = vsel %vm2460_vm1, %v2436_v34, -inf }
 0x4be   :  { %v3495_v47 = vpop.f32.mrf.mxu0  ;;  %2535 = vmax.xlane.f32.xlu1 %v5833_v8 }
 0x4bf   :  { %v2439_v35 = vadd.f32 %v3495_v47, %v5688_v9  ;;  %v5851_v29 = vsel %vm2460_vm1, %v2428_v57, -inf }
 0x4c0   :  { %v2430_v63 = vpop.f32.mrf.mxu0  ;;  %2545 = vmax.xlane.f32.xlu0 %v5840_v55 }
 0x4c1   :  { %v2431_v4 = vadd.f32 %v5688_v9, %v2430_v63  ;;  %v5846_v17 = vsel %vm2460_vm1, %v2439_v35, -inf }
 0x4c2   :  { %v3498_v22 = vpop.f32.mrf.mxu0  ;;  %2547 = vmax.xlane.f32.xlu1 %v5846_v17 }
 0x4c3   :  { %v5857_v31 = vsel %vm2460_vm1, %v2431_v4, -inf  ;;  %v2452_v59 = vadd.f32 %v3498_v22, %v5688_v9 }
 0x4c4   :  { %v2443_v43 = vpop.f32.mrf.mxu0  ;;  %2541 = vmax.xlane.f32.xlu0 %v5851_v29 }
 0x4c5   :  { %v2444_v30 = vadd.f32 %v5688_v9, %v2443_v43  ;;  %v5874_v23 = vsel %vm2460_vm1, %v2452_v59, -inf }
 0x4c6   :  { %v3499_v49 = vpop.f32.mrf.mxu0  ;;  %2543 = vmax.xlane.f32.xlu1 %v5857_v31 }
 0x4c7   :  { %v5863_v21 = vsel %vm2460_vm1, %v2444_v30, -inf  ;;  %v2455_v45 = vadd.f32 %v3499_v49, %v5688_v9 }
 0x4c8   :  { %v2446_v53 = vpop.f32.mrf.mxu0  ;;  %2549 = vmax.xlane.f32.xlu0 %v5863_v21 }
 0x4c9   :  { %v2447_v26 = vadd.f32 %v5688_v9, %v2446_v53  ;;  %v5880_v41 = vsel %vm2460_vm1, %v2455_v45, -inf }
 0x4cb   :  { %v5870_v38 = vsel %vm2460_vm1, %v2447_v26, -inf }
 0x4cc   :  { %2551 = vmax.xlane.f32.xlu1 %v5870_v38  ;;  %2553 = vmax.xlane.f32.xlu0 %v5874_v23 }
 0x4d0   :  { %2555 = vmax.xlane.f32.xlu1 %v5880_v41 }
 0x517   :  { %v2498_v7 = vpop.xlane.xlu1 %2497 }
 0x518   :  { %v5884_v9 = vsub.f32 %v5695_v58, %v2498_v7 }
 0x519   :  { %v2494_v28 = vpop.xlane.xlu0 %2493 }
 0x51a   :  { %v2593_v10 = vmul.f32 1.442695, %v5884_v9  ;;  %v5888_v5 = vsub.f32 %v5701_v14, %v2494_v28 }
 0x51b   :  { %v2500_v20 = vpop.xlane.xlu1 %2499 }
 0x51c   :  { %3586 = vpow2.f32 %v2593_v10  ;;  %v2589_v54 = vmul.f32 1.442695, %v5888_v5  ;;  %v5892_v51 = vsub.f32 %v5707_v25, %v2500_v20 }
 0x51d   :  { %v2496_v52 = vpop.xlane.xlu0 %2495 }
 0x51e   :  { %v2595_v44 = vmul.f32 1.442695, %v5892_v51  ;;  %v5896_v3 = vsub.f32 %v5713_v50, %v2496_v52  ;;  %3588 = vpow2.f32 %v2589_v54 }
 0x520   :  { %3590 = vpow2.f32 %v2595_v44  ;;  %v2591_v58 = vmul.f32 1.442695, %v5896_v3 }
 0x521   :  { %v2506_v12 = vpop.xlane.xlu0 %2505 }
 0x522   :  { %v5900_v14 = vsub.f32 %v5720_v24, %v2506_v12  ;;  %3592 = vpow2.f32 %v2591_v58 }
 0x523   :  { %v2508_v2 = vpop.xlane.xlu1 %2507 }
 0x524   :  { %v2601_v18 = vmul.f32 1.442695, %v5900_v14  ;;  %v5904_v25 = vsub.f32 %v5726_v60, %v2508_v2 }
 0x525   :  { %v2502_v56 = vpop.xlane.xlu0 %2501 }
 0x526   :  { %3594 = vpow2.f32 %v2601_v18  ;;  %v2603_v50 = vmul.f32 1.442695, %v5904_v25  ;;  %v5908_v11 = vsub.f32 %v5732_v62, %v2502_v56 }
 0x527   :  { %v2504_v34 = vpop.xlane.xlu1 %2503 }
 0x528   :  { %3596 = vpow2.f32 %v2603_v50  ;;  %v2597_v32 = vmul.f32 1.442695, %v5908_v11  ;;  %v5912_v24 = vsub.f32 %v5737_v46, %v2504_v34 }
 0x529   :  { %v3587_v47 = vpop.eup %3586  ;;  %v2514_v57 = vpop.xlane.xlu0 %2513 }
 0x52a   :  { %3598 = vpow2.f32 %v2597_v32  ;;  %v2599_v60 = vmul.f32 1.442695, %v5912_v24  ;;  %v5916_v35 = vsub.f32 %v5744_v1, %v2514_v57  ;;  %2657 = vadd.xlane.f32.xlu0 %v3587_v47 }
 0x52b   :  { %v2516_v63 = vpop.xlane.xlu1 %2515  ;;  %v3589_v4 = vpop.eup %3588 }
 0x52c   :  { %3600 = vpow2.f32 %v2599_v60  ;;  %v2609_v62 = vmul.f32 1.442695, %v5916_v35  ;;  %v5920_v22 = vsub.f32 %v5750_v16, %v2516_v63 }
 0x52d   :  { %v3591_v43 = vpop.eup %3590  ;;  %v2510_v46 = vpop.xlane.xlu0 %2509 }
 0x52e   :  { %3602 = vpow2.f32 %v2609_v62  ;;  %v2611_v30 = vmul.f32 1.442695, %v5920_v22  ;;  %v5924_v49 = vsub.f32 %v5756_v36, %v2510_v46  ;;  %2659 = vadd.xlane.f32.xlu1 %v3591_v43  ;;  %2653 = vadd.xlane.f32.xlu0 %v3589_v4 }
 0x52f   :  { %v2512_v1 = vpop.xlane.xlu1 %2511  ;;  %v3593_v26 = vpop.eup %3592 }
 0x530   :  { %3604 = vpow2.f32 %v2611_v30  ;;  %v2605_v59 = vmul.f32 1.442695, %v5924_v49  ;;  %v5928_v53 = vsub.f32 %v5761_v15, %v2512_v1 }
 0x531   :  { %v2522_v16 = vpop.xlane.xlu0 %2521 }
 0x532   :  { %3606 = vpow2.f32 %v2605_v59  ;;  %v2607_v45 = vmul.f32 1.442695, %v5928_v53  ;;  %v5932_v7 = vsub.f32 %v5768_v40, %v2522_v16  ;;  %2655 = vadd.xlane.f32.xlu1 %v3593_v26 }
 0x533   :  { %v3595_v36 = vpop.eup %3594  ;;  %v2524_v28 = vpop.xlane.xlu1 %2523 }
 0x534   :  { %3608 = vpow2.f32 %v2607_v45  ;;  %v2617_v10 = vmul.f32 1.442695, %v5932_v7  ;;  %v5936_v20 = vsub.f32 %v5774_v37, %v2524_v28  ;;  %2665 = vadd.xlane.f32.xlu0 %v3595_v36 }
 0x535   :  { %v3597_v15 = vpop.eup %3596  ;;  %v2518_v54 = vpop.xlane.xlu0 %2517 }
 0x536   :  { %3610 = vpow2.f32 %v2617_v10  ;;  %v2619_v52 = vmul.f32 1.442695, %v5936_v20  ;;  %v5940_v44 = vsub.f32 %v5780_v13, %v2518_v54  ;;  %2667 = vadd.xlane.f32.xlu1 %v3597_v15 }
 0x537   :  { %v3599_v40 = vpop.eup %3598  ;;  %v2520_v58 = vpop.xlane.xlu1 %2519 }
 0x538   :  { %3612 = vpow2.f32 %v2619_v52  ;;  %v2613_v12 = vmul.f32 1.442695, %v5940_v44  ;;  %v5944_v2 = vsub.f32 %v5785_v39, %v2520_v58  ;;  %2661 = vadd.xlane.f32.xlu0 %v3599_v40 }
 0x539   :  { %v3601_v37 = vpop.eup %3600  ;;  %v2530_v18 = vpop.xlane.xlu0 %2529 }
 0x53a   :  { %3614 = vpow2.f32 %v2613_v12  ;;  %v2615_v56 = vmul.f32 1.442695, %v5944_v2  ;;  %v5948_v50 = vsub.f32 %v5792_v61, %v2530_v18  ;;  %2663 = vadd.xlane.f32.xlu1 %v3601_v37 }
 0x53b   :  { %v3603_v13 = vpop.eup %3602  ;;  %v2532_v34 = vpop.xlane.xlu1 %2531 }
 0x53c   :  { %3616 = vpow2.f32 %v2615_v56  ;;  %v2625_v32 = vmul.f32 1.442695, %v5948_v50  ;;  %v5952_v47 = vsub.f32 %v5798_v33, %v2532_v34  ;;  %2673 = vadd.xlane.f32.xlu0 %v3603_v13 }
 0x53d   :  { %v3605_v39 = vpop.eup %3604  ;;  %v2526_v57 = vpop.xlane.xlu0 %2525 }
 0x53e   :  { %3618 = vpow2.f32 %v2625_v32  ;;  %v2627_v60 = vmul.f32 1.442695, %v5952_v47  ;;  %v5956_v63 = vsub.f32 %v5804_v42, %v2526_v57  ;;  %2675 = vadd.xlane.f32.xlu1 %v3605_v39 }
 0x53f   :  { %v3607_v61 = vpop.eup %3606  ;;  %v2528_v4 = vpop.xlane.xlu1 %2527 }
 0x540   :  { %3620 = vpow2.f32 %v2627_v60  ;;  %v2621_v62 = vmul.f32 1.442695, %v5956_v63  ;;  %v5960_v43 = vsub.f32 %v5809_v48, %v2528_v4  ;;  %2669 = vadd.xlane.f32.xlu0 %v3607_v61 }
 0x541   :  { %v3609_v33 = vpop.eup %3608  ;;  %v2538_v46 = vpop.xlane.xlu0 %2537 }
 0x542   :  { %3622 = vpow2.f32 %v2621_v62  ;;  %v2623_v30 = vmul.f32 1.442695, %v5960_v43  ;;  %v5964_v1 = vsub.f32 %v5816_v6, %v2538_v46  ;;  %2671 = vadd.xlane.f32.xlu1 %v3609_v33 }
 0x543   :  { %v3611_v42 = vpop.eup %3610  ;;  %v2540_v59 = vpop.xlane.xlu1 %2539 }
 0x544   :  { %3624 = vpow2.f32 %v2623_v30  ;;  %v2633_v26 = vmul.f32 1.442695, %v5964_v1  ;;  %v5968_v16 = vsub.f32 %v5822_v19, %v2540_v59  ;;  %2681 = vadd.xlane.f32.xlu0 %v3611_v42 }
 0x545   :  { %v3613_v48 = vpop.eup %3612  ;;  %v2534_v45 = vpop.xlane.xlu0 %2533 }
 0x546   :  { %3626 = vpow2.f32 %v2633_v26  ;;  %v2635_v36 = vmul.f32 1.442695, %v5968_v16  ;;  %v5972_v28 = vsub.f32 %v5828_v0, %v2534_v45  ;;  %2683 = vadd.xlane.f32.xlu1 %v3613_v48 }
 0x547   :  { %v3615_v6 = vpop.eup %3614  ;;  %v2536_v10 = vpop.xlane.xlu1 %2535 }
 0x548   :  { %3628 = vpow2.f32 %v2635_v36  ;;  %v2629_v15 = vmul.f32 1.442695, %v5972_v28  ;;  %v5976_v54 = vsub.f32 %v5833_v8, %v2536_v10  ;;  %2677 = vadd.xlane.f32.xlu0 %v3615_v6 }
 0x549   :  { %v3617_v19 = vpop.eup %3616  ;;  %v2546_v52 = vpop.xlane.xlu0 %2545 }
 0x54a   :  { %3630 = vpow2.f32 %v2629_v15  ;;  %v2631_v40 = vmul.f32 1.442695, %v5976_v54  ;;  %v5980_v58 = vsub.f32 %v5840_v55, %v2546_v52  ;;  %2679 = vadd.xlane.f32.xlu1 %v3617_v19 }
 0x54b   :  { %v3619_v0 = vpop.eup %3618  ;;  %v2548_v12 = vpop.xlane.xlu1 %2547 }
 0x54c   :  { %3632 = vpow2.f32 %v2631_v40  ;;  %v2641_v37 = vmul.f32 1.442695, %v5980_v58  ;;  %v5984_v18 = vsub.f32 %v5846_v17, %v2548_v12  ;;  %2689 = vadd.xlane.f32.xlu0 %v3619_v0 }
 0x54d   :  { %v3621_v8 = vpop.eup %3620  ;;  %v2542_v56 = vpop.xlane.xlu0 %2541 }
 0x54e   :  { %3634 = vpow2.f32 %v2641_v37  ;;  %v2643_v13 = vmul.f32 1.442695, %v5984_v18  ;;  %v5988_v34 = vsub.f32 %v5851_v29, %v2542_v56  ;;  %2691 = vadd.xlane.f32.xlu1 %v3621_v8 }
 0x54f   :  { %v3623_v55 = vpop.eup %3622  ;;  %v2544_v32 = vpop.xlane.xlu1 %2543 }
 0x550   :  { %3636 = vpow2.f32 %v2643_v13  ;;  %v2637_v39 = vmul.f32 1.442695, %v5988_v34  ;;  %v5992_v57 = vsub.f32 %v5857_v31, %v2544_v32  ;;  %2685 = vadd.xlane.f32.xlu0 %v3623_v55 }
 0x551   :  { %v3625_v17 = vpop.eup %3624  ;;  %v2550_v60 = vpop.xlane.xlu0 %2549 }
 0x552   :  { %3638 = vpow2.f32 %v2637_v39  ;;  %v2639_v61 = vmul.f32 1.442695, %v5992_v57  ;;  %v5996_v4 = vsub.f32 %v5863_v21, %v2550_v60  ;;  %2687 = vadd.xlane.f32.xlu1 %v3625_v17 }
 0x553   :  { %v3627_v29 = vpop.eup %3626 }
 0x554   :  { %3640 = vpow2.f32 %v2639_v61  ;;  %v2645_v62 = vmul.f32 1.442695, %v5996_v4  ;;  %2697 = vadd.xlane.f32.xlu0 %v3627_v29 }
 0x555   :  { %v3629_v33 = vpop.eup %3628  ;;  %v2552_v46 = vpop.xlane.xlu1 %2551 }
 0x556   :  { %v2554_v30 = vpop.xlane.xlu0 %2553  ;;  %3642 = vpow2.f32 %v2645_v62  ;;  %v6000_v31 = vsub.f32 %v5870_v38, %v2552_v46  ;;  %2699 = vadd.xlane.f32.xlu1 %v3629_v33 }
 0x557   :  { %v6003_v42 = vsub.f32 %v5874_v23, %v2554_v30  ;;  %v3631_v59 = vpop.eup %3630 }
 0x558   :  { %v2647_v21 = vmul.f32 1.442695, %v6000_v31  ;;  %2693 = vadd.xlane.f32.xlu0 %v3631_v59 }
 0x559   :  { %v2649_v26 = vmul.f32 1.442695, %v6003_v42  ;;  %v3633_v48 = vpop.eup %3632  ;;  %v2556_v45 = vpop.xlane.xlu1 %2555 }
 0x55a   :  { %3644 = vpow2.f32 %v2647_v21  ;;  %v6008_v36 = vsub.f32 %v5880_v41, %v2556_v45  ;;  %2695 = vadd.xlane.f32.xlu1 %v3633_v48 }
 0x55b   :  { %v3635_v6 = vpop.eup %3634  ;;  %3646 = vpow2.f32 %v2649_v26 }
 0x55c   :  { %v2651_v38 = vmul.f32 1.442695, %v6008_v36  ;;  %2705 = vadd.xlane.f32.xlu0 %v3635_v6 }
 0x55d   :  { %v3637_v23 = vpop.eup %3636 }
 0x55e   :  { %3648 = vpow2.f32 %v2651_v38  ;;  %2707 = vadd.xlane.f32.xlu1 %v3637_v23 }
 0x55f   :  { %v3639_v10 = vpop.eup %3638 }
 0x560   :  { %2701 = vadd.xlane.f32.xlu0 %v3639_v10 }
 0x561   :  { %v3641_v15 = vpop.eup %3640 }
 0x562   :  { %2703 = vadd.xlane.f32.xlu1 %v3641_v15 }
 0x563   :  { %v3643_v19 = vpop.eup %3642 }
 0x564   :  { %2709 = vadd.xlane.f32.xlu0 %v3643_v19 }
 0x567   :  { %v3645_v52 = vpop.eup %3644 }
 0x568   :  { %v3647_v40 = vpop.eup %3646  ;;  %2711 = vadd.xlane.f32.xlu1 %v3645_v52 }
 0x569   :  { %2713 = vadd.xlane.f32.xlu0 %v3647_v40 }
 0x56b   :  { %v3649_v41 = vpop.eup %3648 }
 0x56c   :  { %2715 = vadd.xlane.f32.xlu1 %v3649_v41 }
 0x5b3   :  { %v2658_v0 = vpop.xlane.xlu0 %2657 }
 0x5b4   :  { %3650 = vlog2.f32 %v2658_v0 }
 0x5b7   :  { %v2660_v12 = vpop.xlane.xlu1 %2659  ;;  %v2654_v37 = vpop.xlane.xlu0 %2653 }
 0x5b8   :  { %3652 = vlog2.f32 %v2660_v12 }
 0x5b9   :  { %3654 = vlog2.f32 %v2654_v37 }
 0x5bb   :  { %v2656_v8 = vpop.xlane.xlu1 %2655 }
 0x5bc   :  { %3656 = vlog2.f32 %v2656_v8 }
 0x5bd   :  { %v2666_v56 = vpop.xlane.xlu0 %2665 }
 0x5be   :  { %3658 = vlog2.f32 %v2666_v56 }
 0x5bf   :  { %v2668_v13 = vpop.xlane.xlu1 %2667 }
 0x5c0   :  { %3660 = vlog2.f32 %v2668_v13 }
 0x5c1   :  { %v3651_v55 = vpop.eup %3650  ;;  %v2662_v32 = vpop.xlane.xlu0 %2661 }
 0x5c2   :  { %v2722_v39 = vmul.f32 0.6931472, %v3651_v55  ;;  %3662 = vlog2.f32 %v2662_v32 }
 0x5c3   :  { %v2664_v17 = vpop.xlane.xlu1 %2663 }
 0x5c4   :  { %v2783_v60 = vsub.f32 %v5884_v9, %v2722_v39  ;;  %3664 = vlog2.f32 %v2664_v17 }
 0x5c5   :  { %v3653_v61 = vpop.eup %3652  ;;  %v2674_v29 = vpop.xlane.xlu0 %2673 }
 0x5c6   :  { %v3655_v62 = vpop.eup %3654  ;;  %v2815_v33 = vsel %vm2460_vm1, %v2783_v60, 0.0  ;;  %v2724_v46 = vmul.f32 0.6931472, %v3653_v61  ;;  %3666 = vlog2.f32 %v2674_v29 }
 0x5c7   :  { %2847 = vst [vmem:[%s6212_s9 + $0x10] sm:$0xff] %v2815_v33  ;;  %v2718_v30 = vmul.f32 0.6931472, %v3655_v62  ;;  %v2676_v59 = vpop.xlane.xlu1 %2675 }
 0x5c8   :  { %v2784_v21 = vsub.f32 %v5892_v51, %v2724_v46  ;;  %3668 = vlog2.f32 %v2676_v59 }
 0x5c9   :  { %v3657_v26 = vpop.eup %3656  ;;  %v2781_v9 = vsub.f32 %v5888_v5, %v2718_v30  ;;  %v2670_v48 = vpop.xlane.xlu0 %2669 }
 0x5ca   :  { %v2816_v45 = vsel %vm2460_vm1, %v2784_v21, 0.0  ;;  %v2720_v6 = vmul.f32 0.6931472, %v3657_v26  ;;  %3670 = vlog2.f32 %v2670_v48 }
 0x5cb   :  { %v3659_v38 = vpop.eup %3658  ;;  %2848 = vst [vmem:[%s6212_s9 + $0x18] sm:$0xff] %v2816_v45  ;;  %v2813_v23 = vsel %vm2460_vm1, %v2781_v9, 0.0  ;;  %v2672_v10 = vpop.xlane.xlu1 %2671 }
 0x5cc   :  { %2845 = vst [vmem:[%s6212_s9] sm:$0xff] %v2813_v23  ;;  %v2782_v5 = vsub.f32 %v5896_v3, %v2720_v6  ;;  %v2730_v51 = vmul.f32 0.6931472, %v3659_v38  ;;  %3672 = vlog2.f32 %v2672_v10 }
 0x5cd   :  { %v3661_v15 = vpop.eup %3660  ;;  %v2682_v19 = vpop.xlane.xlu0 %2681 }
 0x5ce   :  { %v2814_v52 = vsel %vm2460_vm1, %v2782_v5, 0.0  ;;  %v2787_v40 = vsub.f32 %v5900_v14, %v2730_v51  ;;  %v2732_v41 = vmul.f32 0.6931472, %v3661_v15  ;;  %3674 = vlog2.f32 %v2682_v19 }
 0x5cf   :  { %v3663_v0 = vpop.eup %3662  ;;  %2846 = vst [vmem:[%s6212_s9 + $0x8] sm:$0xff] %v2814_v52  ;;  %v2684_v12 = vpop.xlane.xlu1 %2683 }
 0x5d0   :  { %v2819_v3 = vsel %vm2460_vm1, %v2787_v40, 0.0  ;;  %v2788_v37 = vsub.f32 %v5904_v25, %v2732_v41  ;;  %v2726_v8 = vmul.f32 0.6931472, %v3663_v0  ;;  %3676 = vlog2.f32 %v2684_v12 }
 0x5d1   :  { %v3665_v56 = vpop.eup %3664  ;;  %2851 = vst [vmem:[%s6212_s9 + $0x30] sm:$0xff] %v2819_v3  ;;  %v2678_v14 = vpop.xlane.xlu0 %2677 }
 0x5d2   :  { %v2820_v13 = vsel %vm2460_vm1, %v2788_v37, 0.0  ;;  %v2785_v55 = vsub.f32 %v5908_v11, %v2726_v8  ;;  %v2728_v32 = vmul.f32 0.6931472, %v3665_v56  ;;  %3678 = vlog2.f32 %v2678_v14 }
 0x5d3   :  { %v3667_v39 = vpop.eup %3666  ;;  %2852 = vst [vmem:[%s6212_s9 + $0x38] sm:$0xff] %v2820_v13  ;;  %v2680_v25 = vpop.xlane.xlu1 %2679 }
 0x5d4   :  { %v2817_v17 = vsel %vm2460_vm1, %v2785_v55, 0.0  ;;  %v2786_v60 = vsub.f32 %v5912_v24, %v2728_v32  ;;  %v2738_v61 = vmul.f32 0.6931472, %v3667_v39  ;;  %3680 = vlog2.f32 %v2680_v25 }
 0x5d5   :  { %v3669_v29 = vpop.eup %3668  ;;  %2849 = vst [vmem:[%s6212_s9 + $0x20] sm:$0xff] %v2817_v17  ;;  %v2690_v11 = vpop.xlane.xlu0 %2689 }
 0x5d6   :  { %v2818_v62 = vsel %vm2460_vm1, %v2786_v60, 0.0  ;;  %v2791_v33 = vsub.f32 %v5916_v35, %v2738_v61  ;;  %v2740_v46 = vmul.f32 0.6931472, %v3669_v29  ;;  %3682 = vlog2.f32 %v2690_v11 }
 0x5d7   :  { %v3671_v30 = vpop.eup %3670  ;;  %2850 = vst [vmem:[%s6212_s9 + $0x28] sm:$0xff] %v2818_v62  ;;  %v2692_v24 = vpop.xlane.xlu1 %2691 }
 0x5d8   :  { %v2823_v59 = vsel %vm2460_vm1, %v2791_v33, 0.0  ;;  %v2792_v21 = vsub.f32 %v5920_v22, %v2740_v46  ;;  %v2734_v26 = vmul.f32 0.6931472, %v3671_v30  ;;  %3684 = vlog2.f32 %v2692_v24 }
 0x5d9   :  { %v3673_v9 = vpop.eup %3672  ;;  %2855 = vst [vmem:[%s6212_s9 + $0x50] sm:$0xff] %v2823_v59  ;;  %v2686_v35 = vpop.xlane.xlu0 %2685 }
 0x5da   :  { %v2824_v48 = vsel %vm2460_vm1, %v2792_v21, 0.0  ;;  %v2789_v45 = vsub.f32 %v5924_v49, %v2734_v26  ;;  %v2736_v6 = vmul.f32 0.6931472, %v3673_v9  ;;  %3686 = vlog2.f32 %v2686_v35 }
 0x5db   :  { %v3675_v38 = vpop.eup %3674  ;;  %2856 = vst [vmem:[%s6212_s9 + $0x58] sm:$0xff] %v2824_v48  ;;  %v2688_v22 = vpop.xlane.xlu1 %2687 }
 0x5dc   :  { %v2821_v23 = vsel %vm2460_vm1, %v2789_v45, 0.0  ;;  %v2790_v10 = vsub.f32 %v5928_v53, %v2736_v6  ;;  %v2746_v5 = vmul.f32 0.6931472, %v3675_v38  ;;  %3688 = vlog2.f32 %v2688_v22 }
 0x5dd   :  { %v3677_v51 = vpop.eup %3676  ;;  %2853 = vst [vmem:[%s6212_s9 + $0x40] sm:$0xff] %v2821_v23  ;;  %v2698_v49 = vpop.xlane.xlu0 %2697 }
 0x5de   :  { %v2822_v15 = vsel %vm2460_vm1, %v2790_v10, 0.0  ;;  %v2795_v19 = vsub.f32 %v5932_v7, %v2746_v5  ;;  %v2748_v52 = vmul.f32 0.6931472, %v3677_v51  ;;  %3690 = vlog2.f32 %v2698_v49 }
 0x5df   :  { %v3679_v40 = vpop.eup %3678  ;;  %2854 = vst [vmem:[%s6212_s9 + $0x48] sm:$0xff] %v2822_v15  ;;  %v2700_v53 = vpop.xlane.xlu1 %2699 }
 0x5e0   :  { %v2827_v41 = vsel %vm2460_vm1, %v2795_v19, 0.0  ;;  %v2796_v0 = vsub.f32 %v5936_v20, %v2748_v52  ;;  %v2742_v12 = vmul.f32 0.6931472, %v3679_v40  ;;  %3692 = vlog2.f32 %v2700_v53 }
 0x5e1   :  { %v3681_v3 = vpop.eup %3680  ;;  %2859 = vst [vmem:[%s6212_s9 + $0x70] sm:$0xff] %v2827_v41  ;;  %v2694_v7 = vpop.xlane.xlu0 %2693 }
 0x5e2   :  { %v2828_v37 = vsel %vm2460_vm1, %v2796_v0, 0.0  ;;  %v2793_v8 = vsub.f32 %v5940_v44, %v2742_v12  ;;  %v2744_v56 = vmul.f32 0.6931472, %v3681_v3  ;;  %3694 = vlog2.f32 %v2694_v7 }
 0x5e3   :  { %v3683_v14 = vpop.eup %3682  ;;  %2860 = vst [vmem:[%s6212_s9 + $0x78] sm:$0xff] %v2828_v37  ;;  %v2696_v20 = vpop.xlane.xlu1 %2695 }
 0x5e4   :  { %v2825_v13 = vsel %vm2460_vm1, %v2793_v8, 0.0  ;;  %v2794_v55 = vsub.f32 %v5944_v2, %v2744_v56  ;;  %v2754_v32 = vmul.f32 0.6931472, %v3683_v14  ;;  %3696 = vlog2.f32 %v2696_v20 }
 0x5e5   :  { %v3685_v39 = vpop.eup %3684  ;;  %2857 = vst [vmem:[%s6212_s9 + $0x60] sm:$0xff] %v2825_v13  ;;  %v2706_v44 = vpop.xlane.xlu0 %2705 }
 0x5e6   :  { %v2826_v25 = vsel %vm2460_vm1, %v2794_v55, 0.0  ;;  %v2799_v17 = vsub.f32 %v5948_v50, %v2754_v32  ;;  %v2756_v60 = vmul.f32 0.6931472, %v3685_v39  ;;  %3698 = vlog2.f32 %v2706_v44 }
 0x5e7   :  { %v3687_v61 = vpop.eup %3686  ;;  %2858 = vst [vmem:[%s6212_s9 + $0x68] sm:$0xff] %v2826_v25  ;;  %v2708_v2 = vpop.xlane.xlu1 %2707 }
 0x5e8   :  { %v2831_v29 = vsel %vm2460_vm1, %v2799_v17, 0.0  ;;  %v2800_v11 = vsub.f32 %v5952_v47, %v2756_v60  ;;  %v2750_v62 = vmul.f32 0.6931472, %v3687_v61  ;;  %3700 = vlog2.f32 %v2708_v2 }
 0x5e9   :  { %v3689_v33 = vpop.eup %3688  ;;  %2863 = vst [vmem:[%s6212_s9 + $0x90] sm:$0xff] %v2831_v29  ;;  %v2702_v50 = vpop.xlane.xlu0 %2701 }
 0x5ea   :  { %v2832_v46 = vsel %vm2460_vm1, %v2800_v11, 0.0  ;;  %v2797_v30 = vsub.f32 %v5956_v63, %v2750_v62  ;;  %v2752_v24 = vmul.f32 0.6931472, %v3689_v33  ;;  %3702 = vlog2.f32 %v2702_v50 }
 0x5eb   :  { %v3691_v59 = vpop.eup %3690  ;;  %2864 = vst [vmem:[%s6212_s9 + $0x98] sm:$0xff] %v2832_v46  ;;  %v2704_v47 = vpop.xlane.xlu1 %2703 }
 0x5ec   :  { %v2829_v21 = vsel %vm2460_vm1, %v2797_v30, 0.0  ;;  %v2798_v26 = vsub.f32 %v5960_v43, %v2752_v24  ;;  %v2762_v9 = vmul.f32 0.6931472, %v3691_v59  ;;  %3704 = vlog2.f32 %v2704_v47 }
 0x5ed   :  { %v3693_v35 = vpop.eup %3692  ;;  %2861 = vst [vmem:[%s6212_s9 + $0x80] sm:$0xff] %v2829_v21  ;;  %v2710_v63 = vpop.xlane.xlu0 %2709 }
 0x5ee   :  { %v2830_v48 = vsel %vm2460_vm1, %v2798_v26, 0.0  ;;  %v2803_v45 = vsub.f32 %v5964_v1, %v2762_v9  ;;  %v2764_v6 = vmul.f32 0.6931472, %v3693_v35  ;;  %3706 = vlog2.f32 %v2710_v63 }
 0x5ef   :  { %v3695_v38 = vpop.eup %3694  ;;  %2862 = vst [vmem:[%s6212_s9 + $0x88] sm:$0xff] %v2830_v48 }
 0x5f0   :  { %v2835_v43 = vsel %vm2460_vm1, %v2803_v45, 0.0  ;;  %v2804_v22 = vsub.f32 %v5968_v16, %v2764_v6  ;;  %v2758_v23 = vmul.f32 0.6931472, %v3695_v38 }
 0x5f1   :  { %v3697_v10 = vpop.eup %3696  ;;  %2867 = vst [vmem:[%s6212_s9 + $0xb0] sm:$0xff] %v2835_v43  ;;  %v2712_v5 = vpop.xlane.xlu1 %2711 }
 0x5f2   :  { %v2836_v1 = vsel %vm2460_vm1, %v2804_v22, 0.0  ;;  %v2801_v51 = vsub.f32 %v5972_v28, %v2758_v23  ;;  %v2760_v49 = vmul.f32 0.6931472, %v3697_v10  ;;  %3708 = vlog2.f32 %v2712_v5  ;;  %v2714_v15 = vpop.xlane.xlu0 %2713 }
 0x5f3   :  { %v3699_v19 = vpop.eup %3698  ;;  %2868 = vst [vmem:[%s6212_s9 + $0xb8] sm:$0xff] %v2836_v1  ;;  %3710 = vlog2.f32 %v2714_v15 }
 0x5f4   :  { %v2833_v16 = vsel %vm2460_vm1, %v2801_v51, 0.0  ;;  %v2802_v52 = vsub.f32 %v5976_v54, %v2760_v49  ;;  %v2770_v40 = vmul.f32 0.6931472, %v3699_v19 }
 0x5f5   :  { %v3701_v53 = vpop.eup %3700  ;;  %2865 = vst [vmem:[%s6212_s9 + $0xa0] sm:$0xff] %v2833_v16  ;;  %v2716_v28 = vpop.xlane.xlu1 %2715 }
 0x5f6   :  { %v2834_v41 = vsel %vm2460_vm1, %v2802_v52, 0.0  ;;  %v2807_v0 = vsub.f32 %v5980_v58, %v2770_v40  ;;  %v2772_v12 = vmul.f32 0.6931472, %v3701_v53  ;;  %3712 = vlog2.f32 %v2716_v28 }
 0x5f7   :  { %v3703_v3 = vpop.eup %3702  ;;  %2866 = vst [vmem:[%s6212_s9 + $0xa8] sm:$0xff] %v2834_v41 }
 0x5f8   :  { %v2839_v54 = vsel %vm2460_vm1, %v2807_v0, 0.0  ;;  %v2808_v7 = vsub.f32 %v5984_v18, %v2772_v12  ;;  %v2766_v37 = vmul.f32 0.6931472, %v3703_v3 }
 0x5f9   :  { %v3705_v8 = vpop.eup %3704  ;;  %2871 = vst [vmem:[%s6212_s9 + $0xd0] sm:$0xff] %v2839_v54 }
 0x5fa   :  { %v2840_v58 = vsel %vm2460_vm1, %v2808_v7, 0.0  ;;  %v2805_v56 = vsub.f32 %v5988_v34, %v2766_v37  ;;  %v2768_v14 = vmul.f32 0.6931472, %v3705_v8 }
 0x5fb   :  { %v3707_v20 = vpop.eup %3706  ;;  %2872 = vst [vmem:[%s6212_s9 + $0xd8] sm:$0xff] %v2840_v58 }
 0x5fc   :  { %v2837_v18 = vsel %vm2460_vm1, %v2805_v56, 0.0  ;;  %v2806_v13 = vsub.f32 %v5992_v57, %v2768_v14  ;;  %v2774_v55 = vmul.f32 0.6931472, %v3707_v20 }
 0x5fd   :  { %2869 = vst [vmem:[%s6212_s9 + $0xc0] sm:$0xff] %v2837_v18 }
 0x5fe   :  { %v2838_v32 = vsel %vm2460_vm1, %v2806_v13, 0.0  ;;  %v2809_v34 = vsub.f32 %v5996_v4, %v2774_v55 }
 0x5ff   :  { %v3709_v39 = vpop.eup %3708  ;;  %2870 = vst [vmem:[%s6212_s9 + $0xc8] sm:$0xff] %v2838_v32 }
 0x600   :  { %v3711_v44 = vpop.eup %3710  ;;  %v2841_v25 = vsel %vm2460_vm1, %v2809_v34, 0.0  ;;  %v2776_v57 = vmul.f32 0.6931472, %v3709_v39 }
 0x601   :  { %2873 = vst [vmem:[%s6212_s9 + $0xe0] sm:$0xff] %v2841_v25  ;;  %v2778_v17 = vmul.f32 0.6931472, %v3711_v44 }
 0x602   :  { %v2810_v60 = vsub.f32 %v6000_v31, %v2776_v57 }
 0x603   :  { %v3713_v61 = vpop.eup %3712  ;;  %v2811_v4 = vsub.f32 %v6003_v42, %v2778_v17 }
 0x604   :  { %v2842_v2 = vsel %vm2460_vm1, %v2810_v60, 0.0  ;;  %v2780_v29 = vmul.f32 0.6931472, %v3713_v61 }
 0x605   :  { %2874 = vst [vmem:[%s6212_s9 + $0xe8] sm:$0xff] %v2842_v2  ;;  %v2843_v11 = vsel %vm2460_vm1, %v2811_v4, 0.0 }
 0x606   :  { %2875 = vst [vmem:[%s6212_s9 + $0xf0] sm:$0xff] %v2843_v11  ;;  %v2812_v31 = vsub.f32 %v6008_v36, %v2780_v29 }
 0x608   :  { %v2844_v42 = vsel %vm2460_vm1, %v2812_v31, 0.0 }
 0x609   :  { %2876 = vst [vmem:[%s6212_s9 + $0xf8] sm:$0xff] %v2844_v42 }

</bundles_post_ra>
